<compile_context>
chip_gen: v6e
topology: v6e:2x2x1
jax: 0.10.0
libtpu: 0.0.40
codegen_flags: <defaults>
</compile_context>

<pallas_src>
import functools

import jax
import jax.numpy as jnp
from jax.experimental import pallas as pl
from jax.experimental.pallas import tpu as pltpu

BN_EPS = 1e-4       # matches the PyTorch module's BN_EPS = 0.0001
BIAS_ROWS = 16      # ones-row block folded into each conv matmul (bf16 tile)

# 3x3 conv taps in (kh, kw) row-major order: di = kh-1, dj = kw-1.
_TAPS = tuple((di, dj) for di in (-1, 0, 1) for dj in (-1, 0, 1))


def _roundup(x, m):
    return (x + m - 1) // m * m


# ----------------------------- Pallas kernel --------------------------------
def _stack_decoder_kernel(xlow_ref, xbig_ref, u_ref, w1_ref, w2_ref, w3_ref,
                          mask_ref, out_ref, stack_ref, *, img_w, cin1, cin23):
    """Fused StackDecoder forward for one batch tile.

    xlow_ref : (Cx_p,  B*h*w)   low-res input, channels in sublanes, bf16
    xbig_ref : (Cb_p,  B*H*W)   skip connection, bf16
    u_ref    : (B*h*w, B*H*W)   block-diagonal bilinear interpolation matrix
    w{1,2,3} : (Cout_p, BIAS_ROWS + 9*Cin_p)  im2col weights, BN scale+bias folded
    mask_ref : (9, 1, B*H*W)    per-tap zero-padding masks, tiled per image
    out_ref  : (Cout_p, B*H*W)  f32
    stack_ref: (BIAS_ROWS + 9*cin1, B*H*W) bf16 persistent im2col scratch
    """
    L = out_ref.shape[1]                       # folded batch*spatial lane extent

    # Ones row (row 0 of the scratch) pairs with the bias column packed at the
    # front of every conv weight matrix.  Scratch persists across grid steps,
    # so write it only once.
    @pl.when(pl.program_id(0) == 0)
    def _():
        row_idx = jax.lax.broadcasted_iota(jnp.int32, (BIAS_ROWS, L), 0)
        stack_ref[0:BIAS_ROWS, :] = jnp.where(
            row_idx == 0, 1.0, 0.0).astype(jnp.bfloat16)

    # Bilinear upsample: one bf16 MXU matmul, f32 accumulation.
    up = jax.lax.dot_general(
        xlow_ref[...], u_ref[...],
        (((1,), (0,)), ((), ())), preferred_element_type=jnp.float32)

    # torch.cat([upsampled, x_big], dim=1) == channel (sublane) concat.
    y = jnp.concatenate([up, xbig_ref[...].astype(jnp.float32)], axis=0)

    def conv3x3_bn_relu(a, w_ref_l, cin):
        # im2col: 9 lane-rolls + per-tap boundary masks written straight into
        # the persistent VMEM scratch, then ONE
        # (Cout_p, BIAS_ROWS + 9*Cin_p) x (BIAS_ROWS + 9*Cin_p, L) MXU matmul
        # whose leading column realises the folded BN bias.
        for t, (di, dj) in enumerate(_TAPS):
            off = di * img_w + dj
            if off == 0:
                piece = a                           # centre tap: mask is all-ones
            else:
                # Roll over the whole folded lane axis; taps that would cross
                # an image boundary (and hence an image seam) are zeroed by the
                # per-image-tiled mask, so no cross-batch leakage.
                piece = pltpu.roll(a, shift=(-off) % L, axis=1) * mask_ref[t]
            r0 = BIAS_ROWS + t * cin
            stack_ref[r0:r0 + cin, :] = piece.astype(jnp.bfloat16)
        k = BIAS_ROWS + 9 * cin
        z = jax.lax.dot_general(
            w_ref_l[...], stack_ref[0:k, :],
            (((1,), (0,)), ((), ())), preferred_element_type=jnp.float32)
        return jnp.maximum(z, 0.0)                  # ReLU (BN already folded)

    y = conv3x3_bn_relu(y, w1_ref, cin1)
    y = conv3x3_bn_relu(y, w2_ref, cin23)
    y = conv3x3_bn_relu(y, w3_ref, cin23)
    out_ref[...] = y.astype(out_ref.dtype)


# --------------------------- host-side preparation ---------------------------
def _interp_matrix(out_size, in_size, align_corners=False):
    """1-D bilinear weights (out_size, in_size).

    align_corners=False matches modern F.upsample / F.interpolate defaults;
    flip to True to reproduce pre-0.4 PyTorch F.upsample(mode='bilinear')."""
    idx = jnp.arange(out_size, dtype=jnp.float32)
    if align_corners and out_size > 1:
        pos = idx * ((in_size - 1) / (out_size - 1))
    else:
        scale = in_size / out_size
        pos = jnp.maximum((idx + 0.5) * scale - 0.5, 0.0)
    i0 = jnp.clip(jnp.floor(pos).astype(jnp.int32), 0, in_size - 1)
    i1 = jnp.minimum(i0 + 1, in_size - 1)
    frac = pos - i0.astype(jnp.float32)
    return (jax.nn.one_hot(i0, in_size, dtype=jnp.float32) * (1.0 - frac)[:, None]
            + jax.nn.one_hot(i1, in_size, dtype=jnp.float32) * frac[:, None])


def _tap_masks(H, W, b_tile):
    """Per-tap validity masks (conv zero padding), tiled per image across the
    folded (batch, spatial) lane axis so in-kernel rolls never leak pixels
    between batch elements."""
    ii = jnp.arange(H)[:, None]
    jj = jnp.arange(W)[None, :]
    masks = []
    for di, dj in _TAPS:
        m = ((ii + di >= 0) & (ii + di < H) & (jj + dj >= 0) & (jj + dj < W))
        masks.append(m.reshape(1, H * W))
    m = jnp.stack(masks, axis=0).astype(jnp.float32)     # (9, 1, H*W)
    return jnp.tile(m, (1, 1, b_tile))                   # (9, 1, b_tile*H*W)


def _pack_conv_bn(w_hwio, scale, bias, in_sizes, in_padded, cout_p):
    """Fold BN scale into the conv weight and pack as a bf16 im2col matrix
    (cout_p, BIAS_ROWS + KH*KW*sum(in_padded)).  Input-channel segments are
    zero-padded to multiples of 16 (bf16 tile-aligned sublanes in-kernel);
    the BN bias rides in the matmul via the leading BIAS_ROWS columns."""
    KH, KW, _, Cout = w_hwio.shape
    segs, start = [], 0
    for size, psize in zip(in_sizes, in_padded):
        seg = w_hwio[:, :, start:start + size, :]
        segs.append(jnp.pad(seg, ((0, 0), (0, 0), (0, psize - size), (0, 0))))
        start += size
    wp = jnp.concatenate(segs, axis=2)                    # (KH,KW,Cin_p,Cout)
    wp = wp * scale[None, None, None, :]                  # fold BN scale
    wp = jnp.pad(wp, ((0, 0), (0, 0), (0, 0), (0, cout_p - Cout)))
    wm = jnp.transpose(wp, (3, 0, 1, 2)).reshape(cout_p, KH * KW * wp.shape[2])
    bias_cols = jnp.zeros((cout_p, BIAS_ROWS), jnp.float32)
    bias_cols = bias_cols.at[:, 0].set(jnp.pad(bias, (0, cout_p - Cout)))
    return jnp.concatenate([bias_cols, wm], axis=1).astype(jnp.bfloat16)


def init_conv_bn_params(key, cin, cout, k=3):
    """Deterministic synthetic params for one ConvBnRelu2d block (HWIO weight)."""
    kw_, kg, kb, km, kv = jax.random.split(key, 5)
    w = jax.random.normal(kw_, (k, k, cin, cout), jnp.float32) * 0.1
    gamma = 1.0 + 0.1 * jax.random.normal(kg, (cout,), jnp.float32)
    beta = 0.05 * jax.random.normal(kb, (cout,), jnp.float32)
    running_mean = 0.1 * jax.random.normal(km, (cout,), jnp.float32)
    running_var = jnp.abs(jax.random.normal(kv, (cout,), jnp.float32)) + 0.5
    scale = gamma / jnp.sqrt(running_var + BN_EPS)        # eval-mode BN fold
    bias = beta - running_mean * scale
    return w, scale, bias


def make_stack_decoder_params(key, x_big_channels, x_channels, y_channels):
    k1, k2, k3 = jax.random.split(key, 3)
    p1 = init_conv_bn_params(k1, x_big_channels + x_channels, y_channels)
    p2 = init_conv_bn_params(k2, y_channels, y_channels)
    p3 = init_conv_bn_params(k3, y_channels, y_channels)
    return (p1, p2, p3)


def _pick_batch_tile(N, hw_low, hw_big, target_lanes=2048):
    """Smallest batch tile whose folded lane extents are 128-aligned and give
    at least `target_lanes` lanes per step (more steps -> better pipelining /
    megacore split on v7x; bigger tiles -> less per-step overhead)."""
    valid = [b for b in range(1, N + 1)
             if N % b == 0
             and ((b * hw_low) % 128 == 0 or b == N)
             and ((b * hw_big) % 128 == 0 or b == N)]
    for b in valid:
        if b * hw_big >= target_lanes:
            return b
    return valid[-1] if valid else N


# ------------------------------- forward pass --------------------------------
@jax.jit
def stack_decoder_forward(x_big_nchw, x_nchw, params):
    """Matches StackDecoder.forward: upsample x to x_big's HxW, concat, 3x ConvBnRelu."""
    N, Cb, H, W = x_big_nchw.shape
    _, Cx, h, w = x_nchw.shape
    (w1, s1, b1), (w2, s2, b2), (w3, s3, b3) = params
    Cout = w1.shape[-1]

    # Channel counts padded to multiples of 16 -> bf16 packed-tile aligned
    # sublane writes / matmul operands.
    Cx_p, Cb_p, Cout_p = _roundup(Cx, 16), _roundup(Cb, 16), _roundup(Cout, 16)
    Cin1_p = Cx_p + Cb_p

    b_tile = _pick_batch_tile(N, h * w, H * W)
    grid = (N // b_tile,)
    lanes = b_tile * H * W

    # Channel-major layout, (batch, spatial) folded into lanes, stored bf16
    # (halves HBM traffic; native MXU dtype on v5e/v6e/v7x).
    x_low = jnp.transpose(x_nchw.reshape(N, Cx, h * w), (1, 0, 2)).reshape(Cx, N * h * w)
    x_low = jnp.pad(x_low, ((0, Cx_p - Cx), (0, 0))).astype(jnp.bfloat16)
    x_big = jnp.transpose(x_big_nchw.reshape(N, Cb, H * W), (1, 0, 2)).reshape(Cb, N * H * W)
    x_big = jnp.pad(x_big, ((0, Cb_p - Cb), (0, 0))).astype(jnp.bfloat16)

    # Bilinear upsample as a matmul: kron(Uy, Ux) per image, block-diagonal
    # over the images folded into one lane tile.  (Dense path: tiny-image only;
    # see TODO at the top of the file for production sizes.)
    Uy = _interp_matrix(H, h)                             # (H, h)
    Ux = _interp_matrix(W, w)                             # (W, w)
    U = jnp.einsum('ip,jq->pqij', Uy, Ux).reshape(h * w, H * W)
    U_bd = jnp.einsum('bc,pq->bpcq', jnp.eye(b_tile, dtype=U.dtype), U)
    U_bd = U_bd.reshape(b_tile * h * w, lanes).astype(jnp.bfloat16)

    masks = _tap_masks(H, W, b_tile)

    W1 = _pack_conv_bn(w1, s1, b1, (Cx, Cb), (Cx_p, Cb_p), Cout_p)
    W2 = _pack_conv_bn(w2, s2, b2, (Cout,), (Cout_p,), Cout_p)
    W3 = _pack_conv_bn(w3, s3, b3, (Cout,), (Cout_p,), Cout_p)

    kernel = functools.partial(_stack_decoder_kernel, img_w=W,
                               cin1=Cin1_p, cin23=Cout_p)
    # Constant operands (U_bd, W1-W3, masks) use constant index_maps so they
    # are only DMA'd once; at production sizes additionally single-buffer them
    # (pipeline_mode=pl.Buffered(1)) or stage them once into scratch.
    out = pl.pallas_call(
        kernel,
        out_shape=jax.ShapeDtypeStruct((Cout_p, N * H * W), jnp.float32),
        grid=grid,
        in_specs=[
            pl.BlockSpec((Cx_p, b_tile * h * w), lambda n: (0, n)),
            pl.BlockSpec((Cb_p, lanes), lambda n: (0, n)),
            pl.BlockSpec(U_bd.shape, lambda n: (0, 0)),
            pl.BlockSpec(W1.shape, lambda n: (0, 0)),
            pl.BlockSpec(W2.shape, lambda n: (0, 0)),
            pl.BlockSpec(W3.shape, lambda n: (0, 0)),
            pl.BlockSpec(masks.shape, lambda n: (0, 0, 0)),
        ],
        out_specs=pl.BlockSpec((Cout_p, lanes), lambda n: (0, n)),
        scratch_shapes=[pltpu.VMEM((BIAS_ROWS + 9 * Cin1_p, lanes), jnp.bfloat16)],
        compiler_params=pltpu.CompilerParams(
            dimension_semantics=("parallel",)),
    )(x_low, x_big, U_bd, W1, W2, W3, masks)

    # Unfold lanes back to NCHW; drop channel padding.
    out = out.reshape(Cout_p, N, H, W)
    return jnp.transpose(out, (1, 0, 2, 3))[:, :Cout]


if __name__ == "__main__":
    key = jax.random.PRNGKey(0)
    k_big, k_x, k_p = jax.random.split(key, 3)

    # StackDecoder(x_big_channels=4, x_channels=8, y_channels=8)
    x_big_channels, x_channels, y_channels = 4, 8, 8
    N, H, W = 2, 16, 16
    h, w = 8, 8  # low-res feature map to be upsampled

    x_big = jax.random.normal(k_big, (N, x_big_channels, H, W), jnp.float32)
    x = jax.random.normal(k_x, (N, x_channels, h, w), jnp.float32)

    params = make_stack_decoder_params(k_p, x_big_channels, x_channels, y_channels)

    out = stack_decoder_forward(x_big, x, params)
    out = jax.block_until_ready(out)

    assert out.shape == (N, y_channels, H, W), out.shape
    assert bool(jnp.all(jnp.isfinite(out)))
    assert bool(jnp.all(out >= 0.0))  # ReLU output
    print("KERNEL_OK")
</pallas_src>

<mosaic_0001>
module attributes {stable_mosaic.version = 11 : i64} {
  func.func @_stack_decoder_kernel(%arg0: i32, %arg1: memref<16x128xbf16, #tpu.memory_space<vmem>>, %arg2: memref<16x512xbf16, #tpu.memory_space<vmem>>, %arg3: memref<128x512xbf16, #tpu.memory_space<vmem>>, %arg4: memref<16x304xbf16, #tpu.memory_space<vmem>>, %arg5: memref<16x160xbf16, #tpu.memory_space<vmem>>, %arg6: memref<16x160xbf16, #tpu.memory_space<vmem>>, %arg7: memref<9x1x512xf32, #tpu.memory_space<vmem>>, %arg8: memref<16x512xf32, #tpu.memory_space<vmem>>, %arg9: memref<304x512xbf16, #tpu.memory_space<vmem>>) attributes {dimension_semantics = [#tpu.dimension_semantics<parallel>], iteration_bounds = array<i64: 1>, scalar_prefetch = 0 : i64, scratch_operands = 1 : i64, tpu.core_type = #tpu.core_type<tc>, window_params = [{transform_indices = @transform_0, window_bounds = array<i64: 16, 128>}, {transform_indices = @transform_1, window_bounds = array<i64: 16, 512>}, {pipeline_mode = #tpu.pipeline_mode<synchronous>, transform_indices = @transform_2, window_bounds = array<i64: 128, 512>}, {pipeline_mode = #tpu.pipeline_mode<synchronous>, transform_indices = @transform_3, window_bounds = array<i64: 16, 304>}, {pipeline_mode = #tpu.pipeline_mode<synchronous>, transform_indices = @transform_4, window_bounds = array<i64: 16, 160>}, {pipeline_mode = #tpu.pipeline_mode<synchronous>, transform_indices = @transform_5, window_bounds = array<i64: 16, 160>}, {pipeline_mode = #tpu.pipeline_mode<synchronous>, transform_indices = @transform_6, window_bounds = array<i64: 9, 1, 512>}, {transform_indices = @transform_7, window_bounds = array<i64: 16, 512>}]} {
    %c0_i32 = arith.constant 0 : i32
    %0 = arith.cmpi eq, %arg0, %c0_i32 : i32
    %1 = arith.extui %0 : i1 to i32
    %c0_i32_0 = arith.constant 0 : i32
    %2 = arith.cmpi ne, %1, %c0_i32_0 : i32
    scf.if %2 {
      %199 = tpu.iota {dimensions = array<i32: 0>} : vector<16x512xi32>
      %c0_i32_148 = arith.constant 0 : i32
      %200 = vector.broadcast %c0_i32_148 : i32 to vector<16x512xi32>
      %201 = arith.cmpi eq, %199, %200 : vector<16x512xi32>
      %cst_149 = arith.constant 1.000000e+00 : f32
      %cst_150 = arith.constant 0.000000e+00 : f32
      %202 = vector.broadcast %cst_149 : f32 to vector<16x512xf32>
      %203 = vector.broadcast %cst_150 : f32 to vector<16x512xf32>
      %204 = arith.select %201, %202, %203 : vector<16x512xi1>, vector<16x512xf32>
      %205 = arith.truncf %204 : vector<16x512xf32> to vector<16x512xbf16>
      %c0_151 = arith.constant 0 : index
      %c0_152 = arith.constant 0 : index
      %206 = vector.load %arg9[%c0_151, %c0_152] : memref<304x512xbf16, #tpu.memory_space<vmem>>, vector<16x512xbf16>
      tpu.vector_store %arg9[%c0_151, %c0_152], %205 {strides = array<i32>} : memref<304x512xbf16, #tpu.memory_space<vmem>>, vector<16x512xbf16>,
    } else {
    }
    %c0 = arith.constant 0 : index
    %c0_1 = arith.constant 0 : index
    %3 = vector.load %arg1[%c0, %c0_1] : memref<16x128xbf16, #tpu.memory_space<vmem>>, vector<16x128xbf16>
    %c0_2 = arith.constant 0 : index
    %c0_3 = arith.constant 0 : index
    %4 = vector.load %arg3[%c0_2, %c0_3] : memref<128x512xbf16, #tpu.memory_space<vmem>>, vector<128x512xbf16>
    %cst = arith.constant dense<0.000000e+00> : vector<16x512xf32>
    %5 = tpu.matmul %3, %4, %cst {dimension_numbers = #tpu.dot_dimension_numbers<[1], [0], [0], [1], [0, 0, 1, 1], [], []>} : vector<16x128xbf16>, vector<128x512xbf16>, vector<16x512xf32> -> vector<16x512xf32>
    %c0_4 = arith.constant 0 : index
    %c0_5 = arith.constant 0 : index
    %6 = vector.load %arg2[%c0_4, %c0_5] : memref<16x512xbf16, #tpu.memory_space<vmem>>, vector<16x512xbf16>
    %7 = arith.extf %6 : vector<16x512xbf16> to vector<16x512xf32>
    %8 = tpu.concatenate %5, %7 in 0 : vector<16x512xf32>, vector<16x512xf32> -> vector<32x512xf32>
    %c17_i32 = arith.constant 17 : i32
    %9 = tpu.dynamic_rotate %8 by %c17_i32 dim 1 : vector<32x512xf32>, i32 -> vector<32x512xf32>
    %c0_6 = arith.constant 0 : index
    %c0_7 = arith.constant 0 : index
    %c0_8 = arith.constant 0 : index
    %10 = vector.load %arg7[%c0_6, %c0_7, %c0_8] : memref<9x1x512xf32, #tpu.memory_space<vmem>>, vector<1x1x512xf32>
    %11 = vector.shape_cast %10 : vector<1x1x512xf32> to vector<1x512xf32>
    %12 = vector.broadcast %11 : vector<1x512xf32> to vector<32x512xf32>
    %13 = arith.mulf %9, %12 : vector<32x512xf32>
    %14 = arith.truncf %13 : vector<32x512xf32> to vector<32x512xbf16>
    %c16 = arith.constant 16 : index
    %c0_9 = arith.constant 0 : index
    %15 = vector.load %arg9[%c16, %c0_9] : memref<304x512xbf16, #tpu.memory_space<vmem>>, vector<32x512xbf16>
    tpu.vector_store %arg9[%c16, %c0_9], %14 {strides = array<i32>} : memref<304x512xbf16, #tpu.memory_space<vmem>>, vector<32x512xbf16>,
    %c16_i32 = arith.constant 16 : i32
    %16 = tpu.dynamic_rotate %8 by %c16_i32 dim 1 : vector<32x512xf32>, i32 -> vector<32x512xf32>
    %c1 = arith.constant 1 : index
    %c0_10 = arith.constant 0 : index
    %c0_11 = arith.constant 0 : index
    %17 = vector.load %arg7[%c1, %c0_10, %c0_11] : memref<9x1x512xf32, #tpu.memory_space<vmem>>, vector<1x1x512xf32>
    %18 = vector.shape_cast %17 : vector<1x1x512xf32> to vector<1x512xf32>
    %19 = vector.broadcast %18 : vector<1x512xf32> to vector<32x512xf32>
    %20 = arith.mulf %16, %19 : vector<32x512xf32>
    %21 = arith.truncf %20 : vector<32x512xf32> to vector<32x512xbf16>
    %c48 = arith.constant 48 : index
    %c0_12 = arith.constant 0 : index
    %22 = vector.load %arg9[%c48, %c0_12] : memref<304x512xbf16, #tpu.memory_space<vmem>>, vector<32x512xbf16>
    tpu.vector_store %arg9[%c48, %c0_12], %21 {strides = array<i32>} : memref<304x512xbf16, #tpu.memory_space<vmem>>, vector<32x512xbf16>,
    %c15_i32 = arith.constant 15 : i32
    %23 = tpu.dynamic_rotate %8 by %c15_i32 dim 1 : vector<32x512xf32>, i32 -> vector<32x512xf32>
    %c2 = arith.constant 2 : index
    %c0_13 = arith.constant 0 : index
    %c0_14 = arith.constant 0 : index
    %24 = vector.load %arg7[%c2, %c0_13, %c0_14] : memref<9x1x512xf32, #tpu.memory_space<vmem>>, vector<1x1x512xf32>
    %25 = vector.shape_cast %24 : vector<1x1x512xf32> to vector<1x512xf32>
    %26 = vector.broadcast %25 : vector<1x512xf32> to vector<32x512xf32>
    %27 = arith.mulf %23, %26 : vector<32x512xf32>
    %28 = arith.truncf %27 : vector<32x512xf32> to vector<32x512xbf16>
    %c80 = arith.constant 80 : index
    %c0_15 = arith.constant 0 : index
    %29 = vector.load %arg9[%c80, %c0_15] : memref<304x512xbf16, #tpu.memory_space<vmem>>, vector<32x512xbf16>
    tpu.vector_store %arg9[%c80, %c0_15], %28 {strides = array<i32>} : memref<304x512xbf16, #tpu.memory_space<vmem>>, vector<32x512xbf16>,
    %c1_i32 = arith.constant 1 : i32
    %30 = tpu.dynamic_rotate %8 by %c1_i32 dim 1 : vector<32x512xf32>, i32 -> vector<32x512xf32>
    %c3 = arith.constant 3 : index
    %c0_16 = arith.constant 0 : index
    %c0_17 = arith.constant 0 : index
    %31 = vector.load %arg7[%c3, %c0_16, %c0_17] : memref<9x1x512xf32, #tpu.memory_space<vmem>>, vector<1x1x512xf32>
    %32 = vector.shape_cast %31 : vector<1x1x512xf32> to vector<1x512xf32>
    %33 = vector.broadcast %32 : vector<1x512xf32> to vector<32x512xf32>
    %34 = arith.mulf %30, %33 : vector<32x512xf32>
    %35 = arith.truncf %34 : vector<32x512xf32> to vector<32x512xbf16>
    %c112 = arith.constant 112 : index
    %c0_18 = arith.constant 0 : index
    %36 = vector.load %arg9[%c112, %c0_18] : memref<304x512xbf16, #tpu.memory_space<vmem>>, vector<32x512xbf16>
    tpu.vector_store %arg9[%c112, %c0_18], %35 {strides = array<i32>} : memref<304x512xbf16, #tpu.memory_space<vmem>>, vector<32x512xbf16>,
    %37 = arith.truncf %8 : vector<32x512xf32> to vector<32x512xbf16>
    %c144 = arith.constant 144 : index
    %c0_19 = arith.constant 0 : index
    %38 = vector.load %arg9[%c144, %c0_19] : memref<304x512xbf16, #tpu.memory_space<vmem>>, vector<32x512xbf16>
    tpu.vector_store %arg9[%c144, %c0_19], %37 {strides = array<i32>} : memref<304x512xbf16, #tpu.memory_space<vmem>>, vector<32x512xbf16>,
    %c511_i32 = arith.constant 511 : i32
    %39 = tpu.dynamic_rotate %8 by %c511_i32 dim 1 : vector<32x512xf32>, i32 -> vector<32x512xf32>
    %c5 = arith.constant 5 : index
    %c0_20 = arith.constant 0 : index
    %c0_21 = arith.constant 0 : index
    %40 = vector.load %arg7[%c5, %c0_20, %c0_21] : memref<9x1x512xf32, #tpu.memory_space<vmem>>, vector<1x1x512xf32>
    %41 = vector.shape_cast %40 : vector<1x1x512xf32> to vector<1x512xf32>
    %42 = vector.broadcast %41 : vector<1x512xf32> to vector<32x512xf32>
    %43 = arith.mulf %39, %42 : vector<32x512xf32>
    %44 = arith.truncf %43 : vector<32x512xf32> to vector<32x512xbf16>
    %c176 = arith.constant 176 : index
    %c0_22 = arith.constant 0 : index
    %45 = vector.load %arg9[%c176, %c0_22] : memref<304x512xbf16, #tpu.memory_space<vmem>>, vector<32x512xbf16>
    tpu.vector_store %arg9[%c176, %c0_22], %44 {strides = array<i32>} : memref<304x512xbf16, #tpu.memory_space<vmem>>, vector<32x512xbf16>,
    %c497_i32 = arith.constant 497 : i32
    %46 = tpu.dynamic_rotate %8 by %c497_i32 dim 1 : vector<32x512xf32>, i32 -> vector<32x512xf32>
    %c6 = arith.constant 6 : index
    %c0_23 = arith.constant 0 : index
    %c0_24 = arith.constant 0 : index
    %47 = vector.load %arg7[%c6, %c0_23, %c0_24] : memref<9x1x512xf32, #tpu.memory_space<vmem>>, vector<1x1x512xf32>
    %48 = vector.shape_cast %47 : vector<1x1x512xf32> to vector<1x512xf32>
    %49 = vector.broadcast %48 : vector<1x512xf32> to vector<32x512xf32>
    %50 = arith.mulf %46, %49 : vector<32x512xf32>
    %51 = arith.truncf %50 : vector<32x512xf32> to vector<32x512xbf16>
    %c208 = arith.constant 208 : index
    %c0_25 = arith.constant 0 : index
    %52 = vector.load %arg9[%c208, %c0_25] : memref<304x512xbf16, #tpu.memory_space<vmem>>, vector<32x512xbf16>
    tpu.vector_store %arg9[%c208, %c0_25], %51 {strides = array<i32>} : memref<304x512xbf16, #tpu.memory_space<vmem>>, vector<32x512xbf16>,
    %c496_i32 = arith.constant 496 : i32
    %53 = tpu.dynamic_rotate %8 by %c496_i32 dim 1 : vector<32x512xf32>, i32 -> vector<32x512xf32>
    %c7 = arith.constant 7 : index
    %c0_26 = arith.constant 0 : index
    %c0_27 = arith.constant 0 : index
    %54 = vector.load %arg7[%c7, %c0_26, %c0_27] : memref<9x1x512xf32, #tpu.memory_space<vmem>>, vector<1x1x512xf32>
    %55 = vector.shape_cast %54 : vector<1x1x512xf32> to vector<1x512xf32>
    %56 = vector.broadcast %55 : vector<1x512xf32> to vector<32x512xf32>
    %57 = arith.mulf %53, %56 : vector<32x512xf32>
    %58 = arith.truncf %57 : vector<32x512xf32> to vector<32x512xbf16>
    %c240 = arith.constant 240 : index
    %c0_28 = arith.constant 0 : index
    %59 = vector.load %arg9[%c240, %c0_28] : memref<304x512xbf16, #tpu.memory_space<vmem>>, vector<32x512xbf16>
    tpu.vector_store %arg9[%c240, %c0_28], %58 {strides = array<i32>} : memref<304x512xbf16, #tpu.memory_space<vmem>>, vector<32x512xbf16>,
    %c495_i32 = arith.constant 495 : i32
    %60 = tpu.dynamic_rotate %8 by %c495_i32 dim 1 : vector<32x512xf32>, i32 -> vector<32x512xf32>
    %c8 = arith.constant 8 : index
    %c0_29 = arith.constant 0 : index
    %c0_30 = arith.constant 0 : index
    %61 = vector.load %arg7[%c8, %c0_29, %c0_30] : memref<9x1x512xf32, #tpu.memory_space<vmem>>, vector<1x1x512xf32>
    %62 = vector.shape_cast %61 : vector<1x1x512xf32> to vector<1x512xf32>
    %63 = vector.broadcast %62 : vector<1x512xf32> to vector<32x512xf32>
    %64 = arith.mulf %60, %63 : vector<32x512xf32>
    %65 = arith.truncf %64 : vector<32x512xf32> to vector<32x512xbf16>
    %c272 = arith.constant 272 : index
    %c0_31 = arith.constant 0 : index
    %66 = vector.load %arg9[%c272, %c0_31] : memref<304x512xbf16, #tpu.memory_space<vmem>>, vector<32x512xbf16>
    tpu.vector_store %arg9[%c272, %c0_31], %65 {strides = array<i32>} : memref<304x512xbf16, #tpu.memory_space<vmem>>, vector<32x512xbf16>,
    %c0_32 = arith.constant 0 : index
    %c0_33 = arith.constant 0 : index
    %67 = vector.load %arg4[%c0_32, %c0_33] : memref<16x304xbf16, #tpu.memory_space<vmem>>, vector<16x304xbf16>
    %c0_34 = arith.constant 0 : index
    %c0_35 = arith.constant 0 : index
    %68 = vector.load %arg9[%c0_34, %c0_35] : memref<304x512xbf16, #tpu.memory_space<vmem>>, vector<304x512xbf16>
    %cst_36 = arith.constant dense<0.000000e+00> : vector<16x512xf32>
    %69 = tpu.matmul %67, %68, %cst_36 {dimension_numbers = #tpu.dot_dimension_numbers<[1], [0], [0], [1], [0, 0, 1, 1], [], []>} : vector<16x304xbf16>, vector<304x512xbf16>, vector<16x512xf32> -> vector<16x512xf32>
    %cst_37 = arith.constant 0.000000e+00 : f32
    %70 = vector.broadcast %cst_37 : f32 to vector<16x512xf32>
    %71 = arith.maximumf %69, %70 : vector<16x512xf32>
    %c17_i32_38 = arith.constant 17 : i32
    %72 = tpu.dynamic_rotate %71 by %c17_i32_38 dim 1 : vector<16x512xf32>, i32 -> vector<16x512xf32>
    %c0_39 = arith.constant 0 : index
    %c0_40 = arith.constant 0 : index
    %c0_41 = arith.constant 0 : index
    %73 = vector.load %arg7[%c0_39, %c0_40, %c0_41] : memref<9x1x512xf32, #tpu.memory_space<vmem>>, vector<1x1x512xf32>
    %74 = vector.shape_cast %73 : vector<1x1x512xf32> to vector<1x512xf32>
    %75 = vector.broadcast %74 : vector<1x512xf32> to vector<16x512xf32>
    %76 = arith.mulf %72, %75 : vector<16x512xf32>
    %77 = arith.truncf %76 : vector<16x512xf32> to vector<16x512xbf16>
    %c16_42 = arith.constant 16 : index
    %c0_43 = arith.constant 0 : index
    %78 = vector.load %arg9[%c16_42, %c0_43] : memref<304x512xbf16, #tpu.memory_space<vmem>>, vector<16x512xbf16>
    tpu.vector_store %arg9[%c16_42, %c0_43], %77 {strides = array<i32>} : memref<304x512xbf16, #tpu.memory_space<vmem>>, vector<16x512xbf16>,
    %c16_i32_44 = arith.constant 16 : i32
    %79 = tpu.dynamic_rotate %71 by %c16_i32_44 dim 1 : vector<16x512xf32>, i32 -> vector<16x512xf32>
    %c1_45 = arith.constant 1 : index
    %c0_46 = arith.constant 0 : index
    %c0_47 = arith.constant 0 : index
    %80 = vector.load %arg7[%c1_45, %c0_46, %c0_47] : memref<9x1x512xf32, #tpu.memory_space<vmem>>, vector<1x1x512xf32>
    %81 = vector.shape_cast %80 : vector<1x1x512xf32> to vector<1x512xf32>
    %82 = vector.broadcast %81 : vector<1x512xf32> to vector<16x512xf32>
    %83 = arith.mulf %79, %82 : vector<16x512xf32>
    %84 = arith.truncf %83 : vector<16x512xf32> to vector<16x512xbf16>
    %c32 = arith.constant 32 : index
    %c0_48 = arith.constant 0 : index
    %85 = vector.load %arg9[%c32, %c0_48] : memref<304x512xbf16, #tpu.memory_space<vmem>>, vector<16x512xbf16>
    tpu.vector_store %arg9[%c32, %c0_48], %84 {strides = array<i32>} : memref<304x512xbf16, #tpu.memory_space<vmem>>, vector<16x512xbf16>,
    %c15_i32_49 = arith.constant 15 : i32
    %86 = tpu.dynamic_rotate %71 by %c15_i32_49 dim 1 : vector<16x512xf32>, i32 -> vector<16x512xf32>
    %c2_50 = arith.constant 2 : index
    %c0_51 = arith.constant 0 : index
    %c0_52 = arith.constant 0 : index
    %87 = vector.load %arg7[%c2_50, %c0_51, %c0_52] : memref<9x1x512xf32, #tpu.memory_space<vmem>>, vector<1x1x512xf32>
    %88 = vector.shape_cast %87 : vector<1x1x512xf32> to vector<1x512xf32>
    %89 = vector.broadcast %88 : vector<1x512xf32> to vector<16x512xf32>
    %90 = arith.mulf %86, %89 : vector<16x512xf32>
    %91 = arith.truncf %90 : vector<16x512xf32> to vector<16x512xbf16>
    %c48_53 = arith.constant 48 : index
    %c0_54 = arith.constant 0 : index
    %92 = vector.load %arg9[%c48_53, %c0_54] : memref<304x512xbf16, #tpu.memory_space<vmem>>, vector<16x512xbf16>
    tpu.vector_store %arg9[%c48_53, %c0_54], %91 {strides = array<i32>} : memref<304x512xbf16, #tpu.memory_space<vmem>>, vector<16x512xbf16>,
    %c1_i32_55 = arith.constant 1 : i32
    %93 = tpu.dynamic_rotate %71 by %c1_i32_55 dim 1 : vector<16x512xf32>, i32 -> vector<16x512xf32>
    %c3_56 = arith.constant 3 : index
    %c0_57 = arith.constant 0 : index
    %c0_58 = arith.constant 0 : index
    %94 = vector.load %arg7[%c3_56, %c0_57, %c0_58] : memref<9x1x512xf32, #tpu.memory_space<vmem>>, vector<1x1x512xf32>
    %95 = vector.shape_cast %94 : vector<1x1x512xf32> to vector<1x512xf32>
    %96 = vector.broadcast %95 : vector<1x512xf32> to vector<16x512xf32>
    %97 = arith.mulf %93, %96 : vector<16x512xf32>
    %98 = arith.truncf %97 : vector<16x512xf32> to vector<16x512xbf16>
    %c64 = arith.constant 64 : index
    %c0_59 = arith.constant 0 : index
    %99 = vector.load %arg9[%c64, %c0_59] : memref<304x512xbf16, #tpu.memory_space<vmem>>, vector<16x512xbf16>
    tpu.vector_store %arg9[%c64, %c0_59], %98 {strides = array<i32>} : memref<304x512xbf16, #tpu.memory_space<vmem>>, vector<16x512xbf16>,
    %100 = arith.truncf %71 : vector<16x512xf32> to vector<16x512xbf16>
    %c80_60 = arith.constant 80 : index
    %c0_61 = arith.constant 0 : index
    %101 = vector.load %arg9[%c80_60, %c0_61] : memref<304x512xbf16, #tpu.memory_space<vmem>>, vector<16x512xbf16>
    tpu.vector_store %arg9[%c80_60, %c0_61], %100 {strides = array<i32>} : memref<304x512xbf16, #tpu.memory_space<vmem>>, vector<16x512xbf16>,
    %c511_i32_62 = arith.constant 511 : i32
    %102 = tpu.dynamic_rotate %71 by %c511_i32_62 dim 1 : vector<16x512xf32>, i32 -> vector<16x512xf32>
    %c5_63 = arith.constant 5 : index
    %c0_64 = arith.constant 0 : index
    %c0_65 = arith.constant 0 : index
    %103 = vector.load %arg7[%c5_63, %c0_64, %c0_65] : memref<9x1x512xf32, #tpu.memory_space<vmem>>, vector<1x1x512xf32>
    %104 = vector.shape_cast %103 : vector<1x1x512xf32> to vector<1x512xf32>
    %105 = vector.broadcast %104 : vector<1x512xf32> to vector<16x512xf32>
    %106 = arith.mulf %102, %105 : vector<16x512xf32>
    %107 = arith.truncf %106 : vector<16x512xf32> to vector<16x512xbf16>
    %c96 = arith.constant 96 : index
    %c0_66 = arith.constant 0 : index
    %108 = vector.load %arg9[%c96, %c0_66] : memref<304x512xbf16, #tpu.memory_space<vmem>>, vector<16x512xbf16>
    tpu.vector_store %arg9[%c96, %c0_66], %107 {strides = array<i32>} : memref<304x512xbf16, #tpu.memory_space<vmem>>, vector<16x512xbf16>,
    %c497_i32_67 = arith.constant 497 : i32
    %109 = tpu.dynamic_rotate %71 by %c497_i32_67 dim 1 : vector<16x512xf32>, i32 -> vector<16x512xf32>
    %c6_68 = arith.constant 6 : index
    %c0_69 = arith.constant 0 : index
    %c0_70 = arith.constant 0 : index
    %110 = vector.load %arg7[%c6_68, %c0_69, %c0_70] : memref<9x1x512xf32, #tpu.memory_space<vmem>>, vector<1x1x512xf32>
    %111 = vector.shape_cast %110 : vector<1x1x512xf32> to vector<1x512xf32>
    %112 = vector.broadcast %111 : vector<1x512xf32> to vector<16x512xf32>
    %113 = arith.mulf %109, %112 : vector<16x512xf32>
    %114 = arith.truncf %113 : vector<16x512xf32> to vector<16x512xbf16>
    %c112_71 = arith.constant 112 : index
    %c0_72 = arith.constant 0 : index
    %115 = vector.load %arg9[%c112_71, %c0_72] : memref<304x512xbf16, #tpu.memory_space<vmem>>, vector<16x512xbf16>
    tpu.vector_store %arg9[%c112_71, %c0_72], %114 {strides = array<i32>} : memref<304x512xbf16, #tpu.memory_space<vmem>>, vector<16x512xbf16>,
    %c496_i32_73 = arith.constant 496 : i32
    %116 = tpu.dynamic_rotate %71 by %c496_i32_73 dim 1 : vector<16x512xf32>, i32 -> vector<16x512xf32>
    %c7_74 = arith.constant 7 : index
    %c0_75 = arith.constant 0 : index
    %c0_76 = arith.constant 0 : index
    %117 = vector.load %arg7[%c7_74, %c0_75, %c0_76] : memref<9x1x512xf32, #tpu.memory_space<vmem>>, vector<1x1x512xf32>
    %118 = vector.shape_cast %117 : vector<1x1x512xf32> to vector<1x512xf32>
    %119 = vector.broadcast %118 : vector<1x512xf32> to vector<16x512xf32>
    %120 = arith.mulf %116, %119 : vector<16x512xf32>
    %121 = arith.truncf %120 : vector<16x512xf32> to vector<16x512xbf16>
    %c128 = arith.constant 128 : index
    %c0_77 = arith.constant 0 : index
    %122 = vector.load %arg9[%c128, %c0_77] : memref<304x512xbf16, #tpu.memory_space<vmem>>, vector<16x512xbf16>
    tpu.vector_store %arg9[%c128, %c0_77], %121 {strides = array<i32>} : memref<304x512xbf16, #tpu.memory_space<vmem>>, vector<16x512xbf16>,
    %c495_i32_78 = arith.constant 495 : i32
    %123 = tpu.dynamic_rotate %71 by %c495_i32_78 dim 1 : vector<16x512xf32>, i32 -> vector<16x512xf32>
    %c8_79 = arith.constant 8 : index
    %c0_80 = arith.constant 0 : index
    %c0_81 = arith.constant 0 : index
    %124 = vector.load %arg7[%c8_79, %c0_80, %c0_81] : memref<9x1x512xf32, #tpu.memory_space<vmem>>, vector<1x1x512xf32>
    %125 = vector.shape_cast %124 : vector<1x1x512xf32> to vector<1x512xf32>
    %126 = vector.broadcast %125 : vector<1x512xf32> to vector<16x512xf32>
    %127 = arith.mulf %123, %126 : vector<16x512xf32>
    %128 = arith.truncf %127 : vector<16x512xf32> to vector<16x512xbf16>
    %c144_82 = arith.constant 144 : index
    %c0_83 = arith.constant 0 : index
    %129 = vector.load %arg9[%c144_82, %c0_83] : memref<304x512xbf16, #tpu.memory_space<vmem>>, vector<16x512xbf16>
    tpu.vector_store %arg9[%c144_82, %c0_83], %128 {strides = array<i32>} : memref<304x512xbf16, #tpu.memory_space<vmem>>, vector<16x512xbf16>,
    %c0_84 = arith.constant 0 : index
    %c0_85 = arith.constant 0 : index
    %130 = vector.load %arg5[%c0_84, %c0_85] : memref<16x160xbf16, #tpu.memory_space<vmem>>, vector<16x160xbf16>
    %c0_86 = arith.constant 0 : index
    %c0_87 = arith.constant 0 : index
    %131 = vector.load %arg9[%c0_86, %c0_87] : memref<304x512xbf16, #tpu.memory_space<vmem>>, vector<160x512xbf16>
    %cst_88 = arith.constant dense<0.000000e+00> : vector<16x512xf32>
    %132 = tpu.matmul %130, %131, %cst_88 {dimension_numbers = #tpu.dot_dimension_numbers<[1], [0], [0], [1], [0, 0, 1, 1], [], []>} : vector<16x160xbf16>, vector<160x512xbf16>, vector<16x512xf32> -> vector<16x512xf32>
    %cst_89 = arith.constant 0.000000e+00 : f32
    %133 = vector.broadcast %cst_89 : f32 to vector<16x512xf32>
    %134 = arith.maximumf %132, %133 : vector<16x512xf32>
    %c17_i32_90 = arith.constant 17 : i32
    %135 = tpu.dynamic_rotate %134 by %c17_i32_90 dim 1 : vector<16x512xf32>, i32 -> vector<16x512xf32>
    %c0_91 = arith.constant 0 : index
    %c0_92 = arith.constant 0 : index
    %c0_93 = arith.constant 0 : index
    %136 = vector.load %arg7[%c0_91, %c0_92, %c0_93] : memref<9x1x512xf32, #tpu.memory_space<vmem>>, vector<1x1x512xf32>
    %137 = vector.shape_cast %136 : vector<1x1x512xf32> to vector<1x512xf32>
    %138 = vector.broadcast %137 : vector<1x512xf32> to vector<16x512xf32>
    %139 = arith.mulf %135, %138 : vector<16x512xf32>
    %140 = arith.truncf %139 : vector<16x512xf32> to vector<16x512xbf16>
    %c16_94 = arith.constant 16 : index
    %c0_95 = arith.constant 0 : index
    %141 = vector.load %arg9[%c16_94, %c0_95] : memref<304x512xbf16, #tpu.memory_space<vmem>>, vector<16x512xbf16>
    tpu.vector_store %arg9[%c16_94, %c0_95], %140 {strides = array<i32>} : memref<304x512xbf16, #tpu.memory_space<vmem>>, vector<16x512xbf16>,
    %c16_i32_96 = arith.constant 16 : i32
    %142 = tpu.dynamic_rotate %134 by %c16_i32_96 dim 1 : vector<16x512xf32>, i32 -> vector<16x512xf32>
    %c1_97 = arith.constant 1 : index
    %c0_98 = arith.constant 0 : index
    %c0_99 = arith.constant 0 : index
    %143 = vector.load %arg7[%c1_97, %c0_98, %c0_99] : memref<9x1x512xf32, #tpu.memory_space<vmem>>, vector<1x1x512xf32>
    %144 = vector.shape_cast %143 : vector<1x1x512xf32> to vector<1x512xf32>
    %145 = vector.broadcast %144 : vector<1x512xf32> to vector<16x512xf32>
    %146 = arith.mulf %142, %145 : vector<16x512xf32>
    %147 = arith.truncf %146 : vector<16x512xf32> to vector<16x512xbf16>
    %c32_100 = arith.constant 32 : index
    %c0_101 = arith.constant 0 : index
    %148 = vector.load %arg9[%c32_100, %c0_101] : memref<304x512xbf16, #tpu.memory_space<vmem>>, vector<16x512xbf16>
    tpu.vector_store %arg9[%c32_100, %c0_101], %147 {strides = array<i32>} : memref<304x512xbf16, #tpu.memory_space<vmem>>, vector<16x512xbf16>,
    %c15_i32_102 = arith.constant 15 : i32
    %149 = tpu.dynamic_rotate %134 by %c15_i32_102 dim 1 : vector<16x512xf32>, i32 -> vector<16x512xf32>
    %c2_103 = arith.constant 2 : index
    %c0_104 = arith.constant 0 : index
    %c0_105 = arith.constant 0 : index
    %150 = vector.load %arg7[%c2_103, %c0_104, %c0_105] : memref<9x1x512xf32, #tpu.memory_space<vmem>>, vector<1x1x512xf32>
    %151 = vector.shape_cast %150 : vector<1x1x512xf32> to vector<1x512xf32>
    %152 = vector.broadcast %151 : vector<1x512xf32> to vector<16x512xf32>
    %153 = arith.mulf %149, %152 : vector<16x512xf32>
    %154 = arith.truncf %153 : vector<16x512xf32> to vector<16x512xbf16>
    %c48_106 = arith.constant 48 : index
    %c0_107 = arith.constant 0 : index
    %155 = vector.load %arg9[%c48_106, %c0_107] : memref<304x512xbf16, #tpu.memory_space<vmem>>, vector<16x512xbf16>
    tpu.vector_store %arg9[%c48_106, %c0_107], %154 {strides = array<i32>} : memref<304x512xbf16, #tpu.memory_space<vmem>>, vector<16x512xbf16>,
    %c1_i32_108 = arith.constant 1 : i32
    %156 = tpu.dynamic_rotate %134 by %c1_i32_108 dim 1 : vector<16x512xf32>, i32 -> vector<16x512xf32>
    %c3_109 = arith.constant 3 : index
    %c0_110 = arith.constant 0 : index
    %c0_111 = arith.constant 0 : index
    %157 = vector.load %arg7[%c3_109, %c0_110, %c0_111] : memref<9x1x512xf32, #tpu.memory_space<vmem>>, vector<1x1x512xf32>
    %158 = vector.shape_cast %157 : vector<1x1x512xf32> to vector<1x512xf32>
    %159 = vector.broadcast %158 : vector<1x512xf32> to vector<16x512xf32>
    %160 = arith.mulf %156, %159 : vector<16x512xf32>
    %161 = arith.truncf %160 : vector<16x512xf32> to vector<16x512xbf16>
    %c64_112 = arith.constant 64 : index
    %c0_113 = arith.constant 0 : index
    %162 = vector.load %arg9[%c64_112, %c0_113] : memref<304x512xbf16, #tpu.memory_space<vmem>>, vector<16x512xbf16>
    tpu.vector_store %arg9[%c64_112, %c0_113], %161 {strides = array<i32>} : memref<304x512xbf16, #tpu.memory_space<vmem>>, vector<16x512xbf16>,
    %163 = arith.truncf %134 : vector<16x512xf32> to vector<16x512xbf16>
    %c80_114 = arith.constant 80 : index
    %c0_115 = arith.constant 0 : index
    %164 = vector.load %arg9[%c80_114, %c0_115] : memref<304x512xbf16, #tpu.memory_space<vmem>>, vector<16x512xbf16>
    tpu.vector_store %arg9[%c80_114, %c0_115], %163 {strides = array<i32>} : memref<304x512xbf16, #tpu.memory_space<vmem>>, vector<16x512xbf16>,
    %c511_i32_116 = arith.constant 511 : i32
    %165 = tpu.dynamic_rotate %134 by %c511_i32_116 dim 1 : vector<16x512xf32>, i32 -> vector<16x512xf32>
    %c5_117 = arith.constant 5 : index
    %c0_118 = arith.constant 0 : index
    %c0_119 = arith.constant 0 : index
    %166 = vector.load %arg7[%c5_117, %c0_118, %c0_119] : memref<9x1x512xf32, #tpu.memory_space<vmem>>, vector<1x1x512xf32>
    %167 = vector.shape_cast %166 : vector<1x1x512xf32> to vector<1x512xf32>
    %168 = vector.broadcast %167 : vector<1x512xf32> to vector<16x512xf32>
    %169 = arith.mulf %165, %168 : vector<16x512xf32>
    %170 = arith.truncf %169 : vector<16x512xf32> to vector<16x512xbf16>
    %c96_120 = arith.constant 96 : index
    %c0_121 = arith.constant 0 : index
    %171 = vector.load %arg9[%c96_120, %c0_121] : memref<304x512xbf16, #tpu.memory_space<vmem>>, vector<16x512xbf16>
    tpu.vector_store %arg9[%c96_120, %c0_121], %170 {strides = array<i32>} : memref<304x512xbf16, #tpu.memory_space<vmem>>, vector<16x512xbf16>,
    %c497_i32_122 = arith.constant 497 : i32
    %172 = tpu.dynamic_rotate %134 by %c497_i32_122 dim 1 : vector<16x512xf32>, i32 -> vector<16x512xf32>
    %c6_123 = arith.constant 6 : index
    %c0_124 = arith.constant 0 : index
    %c0_125 = arith.constant 0 : index
    %173 = vector.load %arg7[%c6_123, %c0_124, %c0_125] : memref<9x1x512xf32, #tpu.memory_space<vmem>>, vector<1x1x512xf32>
    %174 = vector.shape_cast %173 : vector<1x1x512xf32> to vector<1x512xf32>
    %175 = vector.broadcast %174 : vector<1x512xf32> to vector<16x512xf32>
    %176 = arith.mulf %172, %175 : vector<16x512xf32>
    %177 = arith.truncf %176 : vector<16x512xf32> to vector<16x512xbf16>
    %c112_126 = arith.constant 112 : index
    %c0_127 = arith.constant 0 : index
    %178 = vector.load %arg9[%c112_126, %c0_127] : memref<304x512xbf16, #tpu.memory_space<vmem>>, vector<16x512xbf16>
    tpu.vector_store %arg9[%c112_126, %c0_127], %177 {strides = array<i32>} : memref<304x512xbf16, #tpu.memory_space<vmem>>, vector<16x512xbf16>,
    %c496_i32_128 = arith.constant 496 : i32
    %179 = tpu.dynamic_rotate %134 by %c496_i32_128 dim 1 : vector<16x512xf32>, i32 -> vector<16x512xf32>
    %c7_129 = arith.constant 7 : index
    %c0_130 = arith.constant 0 : index
    %c0_131 = arith.constant 0 : index
    %180 = vector.load %arg7[%c7_129, %c0_130, %c0_131] : memref<9x1x512xf32, #tpu.memory_space<vmem>>, vector<1x1x512xf32>
    %181 = vector.shape_cast %180 : vector<1x1x512xf32> to vector<1x512xf32>
    %182 = vector.broadcast %181 : vector<1x512xf32> to vector<16x512xf32>
    %183 = arith.mulf %179, %182 : vector<16x512xf32>
    %184 = arith.truncf %183 : vector<16x512xf32> to vector<16x512xbf16>
    %c128_132 = arith.constant 128 : index
    %c0_133 = arith.constant 0 : index
    %185 = vector.load %arg9[%c128_132, %c0_133] : memref<304x512xbf16, #tpu.memory_space<vmem>>, vector<16x512xbf16>
    tpu.vector_store %arg9[%c128_132, %c0_133], %184 {strides = array<i32>} : memref<304x512xbf16, #tpu.memory_space<vmem>>, vector<16x512xbf16>,
    %c495_i32_134 = arith.constant 495 : i32
    %186 = tpu.dynamic_rotate %134 by %c495_i32_134 dim 1 : vector<16x512xf32>, i32 -> vector<16x512xf32>
    %c8_135 = arith.constant 8 : index
    %c0_136 = arith.constant 0 : index
    %c0_137 = arith.constant 0 : index
    %187 = vector.load %arg7[%c8_135, %c0_136, %c0_137] : memref<9x1x512xf32, #tpu.memory_space<vmem>>, vector<1x1x512xf32>
    %188 = vector.shape_cast %187 : vector<1x1x512xf32> to vector<1x512xf32>
    %189 = vector.broadcast %188 : vector<1x512xf32> to vector<16x512xf32>
    %190 = arith.mulf %186, %189 : vector<16x512xf32>
    %191 = arith.truncf %190 : vector<16x512xf32> to vector<16x512xbf16>
    %c144_138 = arith.constant 144 : index
    %c0_139 = arith.constant 0 : index
    %192 = vector.load %arg9[%c144_138, %c0_139] : memref<304x512xbf16, #tpu.memory_space<vmem>>, vector<16x512xbf16>
    tpu.vector_store %arg9[%c144_138, %c0_139], %191 {strides = array<i32>} : memref<304x512xbf16, #tpu.memory_space<vmem>>, vector<16x512xbf16>,
    %c0_140 = arith.constant 0 : index
    %c0_141 = arith.constant 0 : index
    %193 = vector.load %arg6[%c0_140, %c0_141] : memref<16x160xbf16, #tpu.memory_space<vmem>>, vector<16x160xbf16>
    %c0_142 = arith.constant 0 : index
    %c0_143 = arith.constant 0 : index
    %194 = vector.load %arg9[%c0_142, %c0_143] : memref<304x512xbf16, #tpu.memory_space<vmem>>, vector<160x512xbf16>
    %cst_144 = arith.constant dense<0.000000e+00> : vector<16x512xf32>
    %195 = tpu.matmul %193, %194, %cst_144 {dimension_numbers = #tpu.dot_dimension_numbers<[1], [0], [0], [1], [0, 0, 1, 1], [], []>} : vector<16x160xbf16>, vector<160x512xbf16>, vector<16x512xf32> -> vector<16x512xf32>
    %cst_145 = arith.constant 0.000000e+00 : f32
    %196 = vector.broadcast %cst_145 : f32 to vector<16x512xf32>
    %197 = arith.maximumf %195, %196 : vector<16x512xf32>
    %c0_146 = arith.constant 0 : index
    %c0_147 = arith.constant 0 : index
    %198 = vector.load %arg8[%c0_146, %c0_147] : memref<16x512xf32, #tpu.memory_space<vmem>>, vector<16x512xf32>
    tpu.vector_store %arg8[%c0_146, %c0_147], %197 {strides = array<i32>} : memref<16x512xf32, #tpu.memory_space<vmem>>, vector<16x512xf32>,
    return
  }
  func.func @transform_0(%arg0: i32) -> (i32, i32) {
    %c0_i32 = arith.constant 0 : i32
    %c0_i32_0 = arith.constant 0 : i32
    return %c0_i32, %arg0 : i32, i32
  }
  func.func @transform_1(%arg0: i32) -> (i32, i32) {
    %c0_i32 = arith.constant 0 : i32
    %c0_i32_0 = arith.constant 0 : i32
    return %c0_i32, %arg0 : i32, i32
  }
  func.func @transform_2(%arg0: i32) -> (i32, i32) {
    %c0_i32 = arith.constant 0 : i32
    %c0_i32_0 = arith.constant 0 : i32
    %c0_i32_1 = arith.constant 0 : i32
    return %c0_i32, %c0_i32_0 : i32, i32
  }
  func.func @transform_3(%arg0: i32) -> (i32, i32) {
    %c0_i32 = arith.constant 0 : i32
    %c0_i32_0 = arith.constant 0 : i32
    %c0_i32_1 = arith.constant 0 : i32
    return %c0_i32, %c0_i32_0 : i32, i32
  }
  func.func @transform_4(%arg0: i32) -> (i32, i32) {
    %c0_i32 = arith.constant 0 : i32
    %c0_i32_0 = arith.constant 0 : i32
    %c0_i32_1 = arith.constant 0 : i32
    return %c0_i32, %c0_i32_0 : i32, i32
  }
  func.func @transform_5(%arg0: i32) -> (i32, i32) {
    %c0_i32 = arith.constant 0 : i32
    %c0_i32_0 = arith.constant 0 : i32
    %c0_i32_1 = arith.constant 0 : i32
    return %c0_i32, %c0_i32_0 : i32, i32
  }
  func.func @transform_6(%arg0: i32) -> (i32, i32, i32) {
    %c0_i32 = arith.constant 0 : i32
    %c0_i32_0 = arith.constant 0 : i32
    %c0_i32_1 = arith.constant 0 : i32
    %c0_i32_2 = arith.constant 0 : i32
    return %c0_i32, %c0_i32_0, %c0_i32_1 : i32, i32, i32
  }
  func.func @transform_7(%arg0: i32) -> (i32, i32) {
    %c0_i32 = arith.constant 0 : i32
    %c0_i32_0 = arith.constant 0 : i32
    return %c0_i32, %arg0 : i32, i32
  }
}

</mosaic_0001>

<bundles_post_ra>
// kernel: stack_decoder_forward.1
= control target key start
LH: loop header
LB: loop body
LE: loop exit
PB: predicated region body
PF: predicated region fallthrough
CT: control target
= control target key end

     0   :  { %v8042_v1 = vmov 0   ;;  %s5195_s23 = smov 111   ;;  %s5196_s30 = smov 15   ;;  %v31_v50 = vlaneseq  ;;  %vm2042_vm8 = vcmask 392192   ;;  %vm3161_vm10 = vcmask 261120   ;;  %s8034_s2 = inlined_call_operand.vmem [shape: bf16[128,512], index: 2, kind: input, shape index: {}]   ;;  %s8035_s1 = inlined_call_operand.vmem [shape: bf16[16,512], index: 1, kind: input, shape index: {}]   ;;  %s8036_s0 = inlined_call_operand.vmem [shape: bf16[16,128], index: 0, kind: input, shape index: {}]   ;;  %s8037_s6 = inlined_call_operand.vmem [shape: f32[9,1,512], index: 6, kind: input, shape index: {}]   ;;  %s8038_s3 = inlined_call_operand.vmem [shape: bf16[16,304], index: 3, kind: input, shape index: {}]   ;;  %s8039_s4 = inlined_call_operand.vmem [shape: bf16[16,160], index: 4, kind: input, shape index: {}]   ;;  %s8040_s5 = inlined_call_operand.vmem [shape: bf16[16,160], index: 5, kind: input, shape index: {}]   ;;  %s8041_s7 = inlined_call_operand.vmem [shape: f32[16,512], index: 7, kind: output, shape index: {}]  }
   0x1   :  { %v5126_v0 = vld [vmem:[%s8034_s2 + $0xe4] ss:$16 sps:$4 sm:$0xff]   ;;  %292 = vmatprep.mubr.bf16.mxu0 %v8042_v1  ;;  %335 = vmatprep.mubr.bf16.mxu1 %v8042_v1  ;;  %v5128_v2 = vld [vmem:[%s8034_s2 + $0xec] ss:$16 sps:$4 sm:$0xff]   ;;  %v5130_v3 = vld [vmem:[%s8034_s2 + $0xe0] ss:$16 sps:$4 sm:$0xff]  }
   0x2   :  { %260 = vmatprep.subr.bf16.mxu0 %v5126_v0  ;;  %v5131_v4 = vld [vmem:[%s8034_s2 + $0xe8] ss:$16 sps:$4 sm:$0xff]   ;;  %303 = vmatprep.subr.bf16.mxu1 %v5128_v2  ;;  %v5132_v5 = vld [vmem:[%s8034_s2 + $0xc4] ss:$16 sps:$4 sm:$0xff]   ;;  %v5134_v6 = vld [vmem:[%s8034_s2 + $0xcc] ss:$16 sps:$4 sm:$0xff]  }
   0x3   :  { %261 = vmatpush1.bf16.msra.mxu0 %v5130_v3  ;;  %304 = vmatpush1.bf16.msra.mxu1 %v5131_v4  ;;  %v5136_v7 = vld [vmem:[%s8034_s2 + $0xc0] ss:$16 sps:$4 sm:$0xff]   ;;  %v5137_v8 = vld [vmem:[%s8034_s2 + $0xc8] ss:$16 sps:$4 sm:$0xff]   ;;  %v5138_v9 = vld [vmem:[%s8034_s2 + $0xa4] ss:$16 sps:$4 sm:$0xff]  }
   0x4   :  { %262 = vmatprep.subr.bf16.mxu0 %v5132_v5  ;;  %305 = vmatprep.subr.bf16.mxu1 %v5134_v6  ;;  %v5140_v10 = vld [vmem:[%s8034_s2 + $0xac] ss:$16 sps:$4 sm:$0xff]   ;;  %v5142_v11 = vld [vmem:[%s8034_s2 + $0xa0] ss:$16 sps:$4 sm:$0xff]   ;;  %v5143_v12 = vld [vmem:[%s8034_s2 + $0xa8] ss:$16 sps:$4 sm:$0xff]  }
   0x5   :  { %v5144_v13 = vld [vmem:[%s8034_s2 + $0x84] ss:$16 sps:$4 sm:$0xff]   ;;  %v5146_v14 = vld [vmem:[%s8034_s2 + $0x8c] ss:$16 sps:$4 sm:$0xff]   ;;  %v5148_v15 = vld [vmem:[%s8034_s2 + $0x80] ss:$16 sps:$4 sm:$0xff]  }
   0x6   :  { %v5149_v16 = vld [vmem:[%s8034_s2 + $0x88] ss:$16 sps:$4 sm:$0xff]   ;;  %v5150_v17 = vld [vmem:[%s8034_s2 + $0x64] ss:$16 sps:$4 sm:$0xff]   ;;  %v5152_v18 = vld [vmem:[%s8034_s2 + $0x6c] ss:$16 sps:$4 sm:$0xff]  }
   0x7   :  { %263 = vmatpush1.bf16.msra.mxu0 %v5136_v7  ;;  %306 = vmatpush1.bf16.msra.mxu1 %v5137_v8  ;;  %v5154_v19 = vld [vmem:[%s8034_s2 + $0x60] ss:$16 sps:$4 sm:$0xff]   ;;  %v5155_v20 = vld [vmem:[%s8034_s2 + $0x68] ss:$16 sps:$4 sm:$0xff]   ;;  %v5156_v21 = vld [vmem:[%s8034_s2 + $0x44] ss:$16 sps:$4 sm:$0xff]  }
   0x8   :  { %264 = vmatprep.subr.bf16.mxu0 %v5138_v9  ;;  %307 = vmatprep.subr.bf16.mxu1 %v5140_v10  ;;  %v5158_v22 = vld [vmem:[%s8034_s2 + $0x4c] ss:$16 sps:$4 sm:$0xff]   ;;  %v5160_v23 = vld [vmem:[%s8034_s2 + $0x40] ss:$16 sps:$4 sm:$0xff]   ;;  %v5161_v24 = vld [vmem:[%s8034_s2 + $0x48] ss:$16 sps:$4 sm:$0xff]  }
   0x9   :  { %v5162_v25 = vld [vmem:[%s8034_s2 + $0x24] ss:$16 sps:$4 sm:$0xff]   ;;  %v5164_v26 = vld [vmem:[%s8034_s2 + $0x2c] ss:$16 sps:$4 sm:$0xff]   ;;  %v5166_v35 = vld [vmem:[%s8034_s2 + $0x20] ss:$16 sps:$4 sm:$0xff]  }
   0xa   :  { %v346_v27 = vld [vmem:[%s8035_s1] sm:$0xff]  ;;  %v348_v28 = vld [vmem:[%s8035_s1 + $0x10] sm:$0xff]  ;;  %v347_v33 = vld [vmem:[%s8035_s1 + $0x8] sm:$0xff]  ;;  %s5199_s8 = smov 17   ;;  %s5200_s9 = smov 113   ;;  %v5410_v52 = vshrl.u32 %v31_v50, 7 }
   0xb   :  { %265 = vmatpush1.bf16.msra.mxu0 %v5142_v11  ;;  %308 = vmatpush1.bf16.msra.mxu1 %v5143_v12  ;;  %v351_v29 = vunpack.c.h.bf16 %v346_v27  ;;  %v355_v30 = vunpack.c.h.bf16 %v348_v28  ;;  %v350_v31 = vunpack.c.l.bf16 %v346_v27  ;;  %v354_v32 = vunpack.c.l.bf16 %v348_v28  ;;  %v349_v34 = vld [vmem:[%s8035_s1 + $0x18] sm:$0xff]  ;;  %v5168_v39 = vld [vmem:[%s8034_s2 + $0x4] ss:$16 sps:$4 sm:$0xff]   ;;  %v5172_v44 = vld [vmem:[%s8034_s2] ss:$16 sps:$4 sm:$0xff]   ;;  %s5201_s12 = smov 1  }
   0xc   :  { %266 = vmatprep.subr.bf16.mxu0 %v5144_v13  ;;  %309 = vmatprep.subr.bf16.mxu1 %v5146_v14  ;;  %v5167_v36 = vld [vmem:[%s8034_s2 + $0x28] ss:$16 sps:$4 sm:$0xff]   ;;  %v352_v37 = vunpack.c.l.bf16 %v347_v33  ;;  %v356_v38 = vunpack.c.l.bf16 %v349_v34  ;;  %v5170_v40 = vld [vmem:[%s8034_s2 + $0xc] ss:$16 sps:$4 sm:$0xff]   ;;  %v353_v46 = vunpack.c.h.bf16 %v347_v33  ;;  %v357_v47 = vunpack.c.h.bf16 %v349_v34  ;;  %v5174_v48 = vld [vmem:[%s8036_s0] sm:$0xff]   ;;  %s5197_s0 = smov 112  }
   0xd   :  { %v5350_v41 = vpack.i.bf16 %v355_v30, %v351_v29  ;;  %v5356_v43 = vpack.i.bf16 %v354_v32, %v350_v31  ;;  %v5173_v45 = vld [vmem:[%s8034_s2 + $0x8] ss:$16 sps:$4 sm:$0xff]   ;;  %s5198_s2 = smov 16   ;;  %v5412_v53 = vand.u32 127, %v31_v50  ;;  %v5415_v54 = vsub.s32 0, %v5410_v52  ;;  %s5202_s13 = smov 127  }
   0xe   :  { %v5352_v42 = vpack.i.bf16 %v356_v38, %v352_v37  ;;  %v5373_v49 = vpack.i.bf16 %v357_v47, %v353_v46  ;;  %v4410_v58 = vld [vmem:[%s8037_s6 + $0x20] sm:$0xf]  ;;  %v5433_v2 = vsub.s32 1, %v5410_v52  ;;  %vm34_vm7 = vcmp.eq.s32.totalorder %v5410_v52, 0 }
   0xf   :  { %267 = vmatpush1.bf16.msra.mxu0 %v5148_v15  ;;  %310 = vmatpush1.bf16.msra.mxu1 %v5149_v16  ;;  %8180 = vst [vmem:[#allocation3_spill] sm:$0xff] %v5415_v54  ;;  %vm1455_vm0 = vcmp.lt.s32.totalorder %v5412_v53, 111  ;;  %v5429_v63 = vrot.slane %v4410_v58, %v5415_v54  ;;  %vm1311_vm1 = vcmp.lt.s32.totalorder %v5412_v53, 112  ;;  %vm679_vm2 = vcmp.lt.s32.totalorder %v5412_v53, 15 }
  0x10   :  { %268 = vmatprep.subr.bf16.mxu0 %v5150_v17  ;;  %311 = vmatprep.subr.bf16.mxu1 %v5152_v18  ;;  %8183 = vst [vmem:[#allocation6_spill] sm:$0xff] %v5433_v2  ;;  %v5454_v9 = vrot.slane %v4410_v58, %v5433_v2  ;;  %v5669_v58 = vld [vmem:[%s8038_s3 + $0x4] ss:$12 sps:$4 sm:$0xff]   ;;  %vm535_vm3 = vcmp.lt.s32.totalorder %v5412_v53, 16  ;;  %vm392_vm4 = vcmp.lt.s32.totalorder %v5412_v53, 17  ;;  %vm823_vm5 = vcmp.lt.s32.totalorder %v5412_v53, 1 }
  0x11   :  { %4967 = vrot.lane.b32.xlu0 %v5350_v41, %s5195_s23  ;;  %4972 = vrot.lane.b32.xlu1 %v5352_v42, %s5195_s23  ;;  %8202 = vst [vmem:[#allocation25_spill] sm:$0xff] %v5669_v58  ;;  %vm1167_vm6 = vcmp.lt.s32.totalorder %v5412_v53, 113  ;;  %vm1023_vm9 = vcmp.lt.s32.totalorder %v5412_v53, 127 }
  0x13   :  { %269 = vmatpush1.bf16.msra.mxu0 %v5154_v19  ;;  %312 = vmatpush1.bf16.msra.mxu1 %v5155_v20 }
  0x14   :  { %270 = vmatprep.subr.bf16.mxu0 %v5156_v21  ;;  %313 = vmatprep.subr.bf16.mxu1 %v5158_v22 }
  0x15   :  { %4977 = vrot.lane.b32.xlu0 %v5356_v43, %s5195_s23  ;;  %4982 = vrot.lane.b32.xlu1 %v5356_v43, %s5196_s30 }
  0x17   :  { %271 = vmatpush1.bf16.msra.mxu0 %v5160_v23  ;;  %314 = vmatpush1.bf16.msra.mxu1 %v5161_v24 }
  0x18   :  { %272 = vmatprep.subr.bf16.mxu0 %v5162_v25  ;;  %315 = vmatprep.subr.bf16.mxu1 %v5164_v26 }
  0x19   :  { %4987 = vrot.lane.b32.xlu0 %v5350_v41, %s5196_s30  ;;  %4992 = vrot.lane.b32.xlu1 %v5373_v49, %s5196_s30 }
  0x1b   :  { %273 = vmatpush1.bf16.msra.mxu0 %v5166_v35  ;;  %316 = vmatpush1.bf16.msra.mxu1 %v5167_v36 }
  0x1c   :  { %274 = vmatprep.subr.bf16.mxu0 %v5168_v39  ;;  %317 = vmatprep.subr.bf16.mxu1 %v5170_v40 }
  0x1d   :  { %4997 = vrot.lane.b32.xlu0 %v5350_v41, %s5197_s0  ;;  %5002 = vrot.lane.b32.xlu1 %v5352_v42, %s5197_s0 }
  0x1f   :  { %275 = vmatpush1.bf16.msra.mxu0 %v5172_v44  ;;  %318 = vmatpush1.bf16.msra.mxu1 %v5173_v45 }
  0x21   :  { %5007 = vrot.lane.b32.xlu0 %v5356_v43, %s5197_s0  ;;  %5012 = vrot.lane.b32.xlu1 %v5356_v43, %s5198_s2 }
  0x22   :  { %293 = vmatmul.mubr.bf16.vlgmr.msra.gmra.mxu0 %v5174_v48  ;;  %336 = vmatmul.mubr.bf16.vlgmr.msra.gmra.mxu1 %v5174_v48 }
  0x23   :  { %2121 = vmatprep.mubr.bf16.mxu1 %v8042_v1  ;;  %2078 = vmatprep.mubr.bf16.mxu0 %v5669_v58 }
  0x25   :  { %5017 = vrot.lane.b32.xlu0 %v5350_v41, %s5198_s2  ;;  %5022 = vrot.lane.b32.xlu1 %v5373_v49, %s5198_s2 }
  0x29   :  { %5027 = vrot.lane.b32.xlu0 %v5352_v42, %s5196_s30  ;;  %5032 = vrot.lane.b32.xlu1 %v5356_v43, %s5199_s8 }
  0x2d   :  { %5037 = vrot.lane.b32.xlu0 %v5350_v41, %s5199_s8  ;;  %5042 = vrot.lane.b32.xlu1 %v5373_v49, %s5199_s8 }
  0x31   :  { %5047 = vrot.lane.b32.xlu0 %v5352_v42, %s5198_s2  ;;  %5052 = vrot.lane.b32.xlu1 %v5352_v42, %s5199_s8 }
  0x35   :  { %5057 = vrot.lane.b32.xlu0 %v5350_v41, %s5200_s9  ;;  %5062 = vrot.lane.b32.xlu1 %v5352_v42, %s5200_s9 }
  0x39   :  { %5067 = vrot.lane.b32.xlu0 %v5356_v43, %s5200_s9 }
  0x83   :  { %v4968_v51 = vpop.permute.xlu0 %4967  ;;  %v5425_v61 = vpop.permute.xlu1 %4972 }
  0x84   :  { %v4970_v56 = vunpack.i.h.bf16 %v4968_v51  ;;  %v4969_v57 = vunpack.i.l.bf16 %v4968_v51  ;;  %8182 = vst [vmem:[#allocation5_spill] sm:$0xff] %v5425_v61  ;;  %v8045_v62 = vunpack.i.l.bf16 %v5425_v61  ;;  %v8046_v0 = vunpack.i.h.bf16 %v5425_v61 }
  0x86   :  { %v1462_v5 = vsel %vm1455_vm0, %v4969_v57, %v8045_v62  ;;  %v1463_v8 = vsel %vm1455_vm0, %v4970_v56, %v8046_v0  ;;  %v4353_v62 = vld [vmem:[%s8037_s6 + $0x8] sm:$0xf] }
  0x87   :  { %v5417_v55 = vpop.permute.xlu0 %4977  ;;  %v1504_v10 = vmul.f32 %v5454_v9, %v1462_v5  ;;  %v1508_v11 = vmul.f32 %v5454_v9, %v1463_v8  ;;  %v5538_v20 = vpop.permute.xlu1 %4982 }
  0x88   :  { %8181 = vst [vmem:[#allocation4_spill] sm:$0xff] %v5417_v55  ;;  %v8043_v59 = vunpack.i.h.bf16 %v5417_v55  ;;  %v8044_v60 = vunpack.i.l.bf16 %v5417_v55  ;;  %v4984_v1 = vunpack.i.l.bf16 %v5538_v20 }
  0x89   :  { %v4879_v12 = vpack.c.bf16 %v1508_v11, %v1504_v10 }
  0x8a   :  { %v1467_v3 = vsel %vm1455_vm0, %v8043_v59, %v4970_v56  ;;  %v1466_v4 = vsel %vm1455_vm0, %v8044_v60, %v4969_v57  ;;  %v5711_v59 = vsub.s32 2, %v5410_v52  ;;  %v5716_v60 = vld [vmem:[%s8037_s6 + $0x1c] sm:$0xf] }
  0x8b   :  { %v1507_v6 = vmul.f32 %v5429_v63, %v1467_v3  ;;  %v1503_v7 = vmul.f32 %v5429_v63, %v1466_v4  ;;  %2099 = vmatprep.subr.bf16.mxu1 %v4879_v12  ;;  %v5540_v21 = vpop.permute.xlu0 %4987  ;;  %v5548_v23 = vpop.permute.xlu1 %4992  ;;  %8209 = vst [vmem:[#allocation32_spill] sm:$0xff] %v5716_v60  ;;  %v5737_v0 = vrot.slane %v5716_v60, %v5415_v54 }
  0x8c   :  { %v4990_v12 = vunpack.i.h.bf16 %v5540_v21 }
  0x8d   :  { %v4878_v13 = vpack.c.bf16 %v1507_v6, %v1503_v7  ;;  %8212 = vst [vmem:[#allocation35_spill] sm:$0xff] %v5737_v0 }
  0x8f   :  { %2100 = vmatpush1.bf16.msra.mxu1 %v4878_v13  ;;  %v5552_v25 = vpop.permute.xlu0 %4997  ;;  %v5562_v26 = vpop.permute.xlu1 %5002  ;;  %v4989_v13 = vunpack.i.l.bf16 %v5540_v21 }
  0x90   :  { %8192 = vst [vmem:[#allocation15_spill] sm:$0xff] %v5562_v26 }
  0x93   :  { %v5564_v27 = vpop.permute.xlu0 %5007  ;;  %v5570_v28 = vpop.permute.xlu1 %5012 }
  0x94   :  { %8193 = vst [vmem:[#allocation16_spill] sm:$0xff] %v5564_v27 }
  0x97   :  { %v5572_v29 = vpop.permute.xlu0 %5017  ;;  %v5578_v30 = vpop.permute.xlu1 %5022 }
  0x9b   :  { %v5584_v31 = vpop.permute.xlu0 %5027  ;;  %v5592_v33 = vpop.permute.xlu1 %5032 }
  0x9f   :  { %v5590_v32 = vpop.permute.xlu0 %5037  ;;  %v5600_v35 = vpop.permute.xlu1 %5042 }
  0xa3   :  { %v5598_v34 = vpop.permute.xlu0 %5047  ;;  %v5612_v37 = vpop.permute.xlu1 %5052 }
  0xa7   :  { %v5606_v36 = vpop.permute.xlu0 %5057  ;;  %v5618_v38 = vpop.permute.xlu1 %5062 }
  0xab   :  { %v5620_v39 = vpop.permute.xlu0 %5067 }
  0xac   :  { %8194 = vst [vmem:[#allocation17_spill] sm:$0xff] %v5620_v39 }
  0xe2   :  { %v5458_v14 = vpop.f32.mrf.mxu0  ;;  %v5460_v15 = vpop.f32.mrf.mxu1 }
  0xe3   :  { %8184 = vst [vmem:[#allocation7_spill] sm:$0xff] %v5458_v14  ;;  %8185 = vst [vmem:[#allocation8_spill] sm:$0xff] %v5460_v15  ;;  %1439 = vrot.lane.b32.xlu1 %v5460_v15, %s5195_s23  ;;  %791 = vrot.lane.b32.xlu0 %v5458_v14, %s5201_s12 }
  0xe4   :  { %v5482_v16 = vpop.f32.mrf.mxu0  ;;  %v5492_v17 = vpop.f32.mrf.mxu1 }
  0xe5   :  { %8186 = vst [vmem:[#allocation9_spill] sm:$0xff] %v5482_v16  ;;  %8187 = vst [vmem:[#allocation10_spill] sm:$0xff] %v5492_v17 }
  0xe6   :  { %v5506_v18 = vpop.f32.mrf.mxu0  ;;  %v5524_v19 = vpop.f32.mrf.mxu1 }
  0xe7   :  { %807 = vrot.lane.b32.xlu1 %v5460_v15, %s5201_s12  ;;  %1423 = vrot.lane.b32.xlu0 %v5458_v14, %s5195_s23  ;;  %8188 = vst [vmem:[#allocation11_spill] sm:$0xff] %v5506_v18  ;;  %8189 = vst [vmem:[#allocation12_spill] sm:$0xff] %v5524_v19 }
  0xe8   :  { %v5542_v22 = vpop.f32.mrf.mxu0  ;;  %v5550_v24 = vpop.f32.mrf.mxu1 }
  0xe9   :  { %8190 = vst [vmem:[#allocation13_spill] sm:$0xff] %v5542_v22  ;;  %8191 = vst [vmem:[#allocation14_spill] sm:$0xff] %v5550_v24 }
  0xeb   :  { %663 = vrot.lane.b32.xlu1 %v5460_v15, %s5196_s30  ;;  %647 = vrot.lane.b32.xlu0 %v5458_v14, %s5196_s30 }
  0xef   :  { %519 = vrot.lane.b32.xlu1 %v5460_v15, %s5198_s2  ;;  %503 = vrot.lane.b32.xlu0 %v5458_v14, %s5198_s2 }
  0xf3   :  { %1151 = vrot.lane.b32.xlu1 %v5460_v15, %s5200_s9  ;;  %358 = vrot.lane.b32.xlu0 %v5458_v14, %s5199_s8 }
  0xf7   :  { %1295 = vrot.lane.b32.xlu0 %v5460_v15, %s5197_s0  ;;  %799 = vrot.lane.b32.xlu1 %v5482_v16, %s5201_s12 }
  0xfb   :  { %1279 = vrot.lane.b32.xlu0 %v5458_v14, %s5197_s0  ;;  %1431 = vrot.lane.b32.xlu1 %v5482_v16, %s5195_s23 }
  0xff   :  { %374 = vrot.lane.b32.xlu0 %v5460_v15, %s5199_s8  ;;  %527 = vrot.lane.b32.xlu1 %v5492_v17, %s5198_s2 }
 0x103   :  { %815 = vrot.lane.b32.xlu0 %v5492_v17, %s5201_s12  ;;  %382 = vrot.lane.b32.xlu1 %v5492_v17, %s5199_s8 }
 0x107   :  { %655 = vrot.lane.b32.xlu0 %v5482_v16, %s5196_s30  ;;  %1143 = vrot.lane.b32.xlu1 %v5482_v16, %s5200_s9 }
 0x10b   :  { %671 = vrot.lane.b32.xlu0 %v5492_v17, %s5196_s30  ;;  %1425 = vrot.lane.b32.xlu1 %v5506_v18, %s5195_s23 }
 0x10f   :  { %511 = vrot.lane.b32.xlu0 %v5482_v16, %s5198_s2  ;;  %649 = vrot.lane.b32.xlu1 %v5506_v18, %s5196_s30 }
 0x113   :  { %366 = vrot.lane.b32.xlu0 %v5482_v16, %s5199_s8  ;;  %505 = vrot.lane.b32.xlu1 %v5506_v18, %s5198_s2 }
 0x117   :  { %1287 = vrot.lane.b32.xlu0 %v5482_v16, %s5197_s0  ;;  %360 = vrot.lane.b32.xlu1 %v5506_v18, %s5199_s8 }
 0x11b   :  { %1297 = vrot.lane.b32.xlu1 %v5524_v19, %s5197_s0  ;;  %793 = vrot.lane.b32.xlu0 %v5506_v18, %s5201_s12 }
 0x11f   :  { %1281 = vrot.lane.b32.xlu1 %v5506_v18, %s5197_s0  ;;  %1441 = vrot.lane.b32.xlu0 %v5524_v19, %s5195_s23 }
 0x123   :  { %376 = vrot.lane.b32.xlu1 %v5524_v19, %s5199_s8  ;;  %809 = vrot.lane.b32.xlu0 %v5524_v19, %s5201_s12 }
 0x127   :  { %665 = vrot.lane.b32.xlu0 %v5524_v19, %s5196_s30  ;;  %801 = vrot.lane.b32.xlu1 %v5542_v22, %s5201_s12 }
 0x12b   :  { %521 = vrot.lane.b32.xlu0 %v5524_v19, %s5198_s2  ;;  %817 = vrot.lane.b32.xlu1 %v5550_v24, %s5201_s12 }
 0x12f   :  { %1433 = vrot.lane.b32.xlu0 %v5542_v22, %s5195_s23  ;;  %1135 = vrot.lane.b32.xlu1 %v5458_v14, %s5200_s9 }
 0x133   :  { %1153 = vrot.lane.b32.xlu0 %v5524_v19, %s5200_s9  ;;  %657 = vrot.lane.b32.xlu1 %v5542_v22, %s5196_s30 }
 0x137   :  { %1137 = vrot.lane.b32.xlu0 %v5506_v18, %s5200_s9  ;;  %673 = vrot.lane.b32.xlu1 %v5550_v24, %s5196_s30 }
 0x13b   :  { %5077 = vrot.lane.b32.xlu0 %v5352_v42, %s5202_s13  ;;  %5072 = vrot.lane.b32.xlu1 %v5350_v41, %s5202_s13 }
 0x13f   :  { %529 = vrot.lane.b32.xlu0 %v5550_v24, %s5198_s2  ;;  %513 = vrot.lane.b32.xlu1 %v5542_v22, %s5198_s2 }
 0x143   :  { %999 = vrot.lane.b32.xlu0 %v5482_v16, %s5202_s13  ;;  %1303 = vrot.lane.b32.xlu1 %v5492_v17, %s5197_s0  ;;  %v8218_v16 = vunpack.i.l.bf16 %v5584_v31 }
 0x147   :  { %384 = vrot.lane.b32.xlu0 %v5550_v24, %s5199_s8  ;;  %368 = vrot.lane.b32.xlu1 %v5542_v22, %s5199_s8 }
 0x14b   :  { %1007 = vrot.lane.b32.xlu0 %v5460_v15, %s5202_s13  ;;  %5082 = vrot.lane.b32.xlu1 %v5356_v43, %s5202_s13  ;;  %v4999_v15 = vunpack.i.l.bf16 %v5552_v25 }
 0x14f   :  { %5087 = vrot.lane.b32.xlu0 %v5373_v49, %s5200_s9  ;;  %1289 = vrot.lane.b32.xlu1 %v5542_v22, %s5197_s0 }
 0x153   :  { %1145 = vrot.lane.b32.xlu0 %v5542_v22, %s5200_s9  ;;  %1009 = vrot.lane.b32.xlu1 %v5524_v19, %s5202_s13  ;;  %v4985_v19 = vunpack.i.h.bf16 %v5538_v20  ;;  %v8215_v20 = vunpack.i.h.bf16 %v5552_v25 }
 0x155   :  { %v5626_v40 = vpop.permute.xlu1 %1439  ;;  %v5628_v44 = vpop.permute.xlu0 %791 }
 0x156   :  { %8195 = vst [vmem:[#allocation18_spill] sm:$0xff] %v5626_v40 }
 0x157   :  { %1305 = vrot.lane.b32.xlu0 %v5550_v24, %s5197_s0  ;;  %991 = vrot.lane.b32.xlu1 %v5458_v14, %s5202_s13  ;;  %v8219_v14 = vunpack.i.h.bf16 %v5584_v31 }
 0x159   :  { %v5634_v45 = vpop.permute.xlu1 %807  ;;  %v5636_v46 = vpop.permute.xlu0 %1423 }
 0x15a   :  { %8196 = vst [vmem:[#allocation19_spill] sm:$0xff] %v5636_v46 }
 0x15b   :  { %993 = vrot.lane.b32.xlu0 %v5506_v18, %s5202_s13  ;;  %1159 = vrot.lane.b32.xlu1 %v5492_v17, %s5200_s9  ;;  %v686_v18 = vsel %vm679_vm2, %v4989_v13, %v8218_v16 }
 0x15d   :  { %v5642_v47 = vpop.permute.xlu1 %663  ;;  %v5644_v48 = vpop.permute.xlu0 %647 }
 0x15e   :  { %8197 = vst [vmem:[#allocation20_spill] sm:$0xff] %v5642_v47 }
 0x15f   :  { %1161 = vrot.lane.b32.xlu0 %v5550_v24, %s5200_s9  ;;  %1001 = vrot.lane.b32.xlu1 %v5542_v22, %s5202_s13  ;;  %v8217_v22 = vunpack.i.l.bf16 %v5548_v23 }
 0x161   :  { %v5650_v50 = vpop.permute.xlu1 %519  ;;  %v5652_v51 = vpop.permute.xlu0 %503  ;;  %v694_v21 = vsel %vm679_vm2, %v8217_v22, %v4984_v1  ;;  %v5772_v22 = vrot.slane %v4353_v62, %v5433_v2 }
 0x162   :  { %8198 = vst [vmem:[#allocation21_spill] sm:$0xff] %v5650_v50  ;;  %8199 = vst [vmem:[#allocation22_spill] sm:$0xff] %v5652_v51 }
 0x163   :  { %5097 = vrot.lane.b32.xlu0 %v5356_v43, %s5201_s12  ;;  %5092 = vrot.lane.b32.xlu1 %v5373_v49, %s5202_s13 }
 0x165   :  { %v5658_v56 = vpop.permute.xlu1 %1151  ;;  %v5660_v57 = vpop.permute.xlu0 %358 }
 0x166   :  { %8200 = vst [vmem:[#allocation23_spill] sm:$0xff] %v5658_v56  ;;  %8201 = vst [vmem:[#allocation24_spill] sm:$0xff] %v5660_v57  ;;  %v8222_v56 = vunpack.i.l.bf16 %v5564_v27 }
 0x167   :  { %1015 = vrot.lane.b32.xlu0 %v5492_v17, %s5202_s13  ;;  %5102 = vrot.lane.b32.xlu1 %v5350_v41, %s5201_s12 }
 0x168   :  { %v1322_v16 = vsel %vm1311_vm1, %v8222_v56, %v4999_v15 }
 0x169   :  { %v5671_v3 = vpop.permute.xlu0 %1295  ;;  %v5673_v43 = vpop.permute.xlu1 %799  ;;  %v5818_v50 = vmul.f32 %v5737_v0, %v1322_v16 }
 0x16a   :  { %8203 = vst [vmem:[#allocation26_spill] sm:$0xff] %v5671_v3 }
 0x16b   :  { %5107 = vrot.lane.b32.xlu0 %v5373_v49, %s5201_s12  ;;  %1017 = vrot.lane.b32.xlu1 %v5550_v24, %s5202_s13 }
 0x16d   :  { %v5680_v4 = vpop.permute.xlu0 %1279  ;;  %v5682_v41 = vpop.permute.xlu1 %1431 }
 0x16e   :  { %8204 = vst [vmem:[#allocation27_spill] sm:$0xff] %v5680_v4  ;;  %v687_v4 = vsel %vm679_vm2, %v4990_v12, %v8219_v14  ;;  %v690_v14 = vsel %vm679_vm2, %v4984_v1, %v4989_v13  ;;  %v5015_v1 = vunpack.i.h.bf16 %v5570_v28  ;;  %v5014_v13 = vunpack.i.l.bf16 %v5570_v28 }
 0x16f   :  { %1447 = vrot.lane.b32.xlu0 %v5492_v17, %s5195_s23  ;;  %5112 = vrot.lane.b32.xlu1 %v5373_v49, %s5195_s23  ;;  %v8216_v17 = vunpack.i.h.bf16 %v5564_v27 }
 0x171   :  { %v5688_v5 = vpop.permute.xlu0 %374  ;;  %v5690_v6 = vpop.permute.xlu1 %527 }
 0x172   :  { %8205 = vst [vmem:[#allocation28_spill] sm:$0xff] %v5688_v5  ;;  %8206 = vst [vmem:[#allocation29_spill] sm:$0xff] %v5690_v6  ;;  %v691_v5 = vsel %vm679_vm2, %v4985_v19, %v4990_v12  ;;  %v8237_v6 = vunpack.i.h.bf16 %v5562_v26 }
 0x173   :  { %5117 = vrot.lane.b32.xlu0 %v5352_v42, %s5201_s12  ;;  %1449 = vrot.lane.b32.xlu1 %v5550_v24, %s5195_s23  ;;  %v5740_v42 = vrot.slane %v4353_v62, %v5415_v54  ;;  %v5743_v24 = vrot.slane %v4353_v62, %v5711_v59  ;;  %v5815_v28 = vmul.f32 %v5772_v22, %v691_v5  ;;  %v8234_v5 = vunpack.i.h.bf16 %v5578_v30 }
 0x175   :  { %v5696_v7 = vpop.permute.xlu0 %815  ;;  %v5698_v8 = vpop.permute.xlu1 %382  ;;  %8213 = vst [vmem:[#allocation36_spill] sm:$0xff] %v5740_v42  ;;  %8214 = vst [vmem:[#allocation37_spill] sm:$0xff] %v5743_v24  ;;  %v5786_v57 = vmul.f32 %v5740_v42, %v694_v21  ;;  %v5792_v27 = vmul.f32 %v5743_v24, %v687_v4  ;;  %v8241_v21 = vunpack.i.l.bf16 %v5548_v23 }
 0x176   :  { %8207 = vst [vmem:[#allocation30_spill] sm:$0xff] %v5698_v8 }
 0x177   :  { %5122 = vrot.lane.b32.xlu1 %v5373_v49, %s5197_s0  ;;  %v1323_v49 = vsel %vm1311_vm1, %v8216_v17, %v8215_v20  ;;  %v8221_v17 = vunpack.i.h.bf16 %v5548_v23  ;;  %8223 = vst [vmem:[#allocation39_spill] sm:$0xff] %v5786_v57  ;;  %8225 = vst [vmem:[#allocation41_spill] sm:$0xff] %v5792_v27 }
 0x178   :  { %v5783_v8 = vmul.f32 %v5737_v0, %v1323_v49 }
 0x179   :  { %v5702_v10 = vpop.permute.xlu0 %655  ;;  %v5704_v11 = vpop.permute.xlu1 %1143  ;;  %v695_v20 = vsel %vm679_vm2, %v8221_v17, %v4985_v19  ;;  %v5789_v17 = vmul.f32 %v5743_v24, %v686_v18  ;;  %v5800_v19 = vsub.s32 3, %v5410_v52  ;;  %v4344_v18 = vld [vmem:[%s8037_s6 + $0x4] sm:$0xf]  ;;  %v5019_v24 = vunpack.i.l.bf16 %v5572_v29 }
 0x17a   :  { %8208 = vst [vmem:[#allocation31_spill] sm:$0xff] %v5704_v11  ;;  %v5795_v56 = vmul.f32 %v5740_v42, %v695_v20  ;;  %v5812_v20 = vmul.f32 %v5772_v22, %v690_v14  ;;  %v5827_v14 = vrot.slane %v5716_v60, %v5433_v2  ;;  %v5832_v16 = vrot.slane %v4344_v18, %v5415_v54 }
 0x17b   :  { %8224 = vst [vmem:[#allocation40_spill] sm:$0xff] %v5789_v17  ;;  %v5837_v0 = vrot.slane %v4353_v62, %v5800_v19  ;;  %v8233_v60 = vunpack.i.l.bf16 %v5578_v30  ;;  %v551_v17 = vsel %vm535_vm3, %v8234_v5, %v5015_v1  ;;  %v5035_v5 = vunpack.i.h.bf16 %v5592_v33  ;;  %v5869_v62 = vld [vmem:[%s8037_s6] sm:$0xf] }
 0x17c   :  { %8228 = vst [vmem:[#allocation44_spill] sm:$0xff] %v5827_v14  ;;  %8229 = vst [vmem:[#allocation45_spill] sm:$0xff] %v5832_v16  ;;  %v8244_v42 = vunpack.i.h.bf16 %v5584_v31 }
 0x17d   :  { %v5725_v55 = vpop.permute.xlu0 %671  ;;  %v5727_v61 = vpop.permute.xlu1 %1425  ;;  %8230 = vst [vmem:[#allocation46_spill] sm:$0xff] %v5837_v0  ;;  %v550_v58 = vsel %vm535_vm3, %v8233_v60, %v5014_v13  ;;  %v8236_v60 = vunpack.i.l.bf16 %v5562_v26  ;;  %v8242_v26 = vunpack.i.l.bf16 %v5584_v31  ;;  %v5921_v31 = vmul.f32 %v5832_v16, %v551_v17 }
 0x17e   :  { %8210 = vst [vmem:[#allocation33_spill] sm:$0xff] %v5725_v55  ;;  %8211 = vst [vmem:[#allocation34_spill] sm:$0xff] %v5727_v61 }
 0x17f   :  { %v1318_v27 = vsel %vm1311_vm1, %v4999_v15, %v8236_v60  ;;  %8247 = vst [vmem:[#allocation54_spill] sm:$0xff] %v5921_v31 }
 0x181   :  { %v5763_v3 = vpop.permute.xlu0 %511  ;;  %v5765_v11 = vpop.permute.xlu1 %649 }
 0x182   :  { %8220 = vst [vmem:[#allocation38_spill] sm:$0xff] %v5763_v3  ;;  %v5034_v3 = vunpack.i.l.bf16 %v5592_v33  ;;  %v5881_v33 = vrot.slane %v4344_v18, %v5433_v2 }
 0x184   :  { %8239 = vst [vmem:[#allocation50_spill] sm:$0xff] %v5881_v33 }
 0x185   :  { %v5802_v12 = vpop.permute.xlu0 %366  ;;  %v5804_v49 = vpop.permute.xlu1 %505 }
 0x186   :  { %8226 = vst [vmem:[#allocation42_spill] sm:$0xff] %v5802_v12  ;;  %8227 = vst [vmem:[#allocation43_spill] sm:$0xff] %v5804_v49  ;;  %v5020_v12 = vunpack.i.h.bf16 %v5572_v29  ;;  %v5856_v49 = vrot.slane %v4344_v18, %v5711_v59 }
 0x188   :  { %8235 = vst [vmem:[#allocation49_spill] sm:$0xff] %v5856_v49  ;;  %v547_v15 = vsel %vm535_vm3, %v5015_v1, %v5020_v12 }
 0x189   :  { %v5839_v29 = vpop.permute.xlu0 %1287  ;;  %v5841_v4 = vpop.permute.xlu1 %360 }
 0x18a   :  { %8231 = vst [vmem:[#allocation47_spill] sm:$0xff] %v5839_v29  ;;  %8232 = vst [vmem:[#allocation48_spill] sm:$0xff] %v5841_v4  ;;  %v5050_v29 = vunpack.i.h.bf16 %v5598_v34  ;;  %v5049_v4 = vunpack.i.l.bf16 %v5598_v34  ;;  %v8238_v34 = vunpack.i.h.bf16 %v5552_v25  ;;  %v682_v25 = vsel %vm679_vm2, %v8242_v26, %v8241_v21 }
 0x18b   :  { %v5928_v1 = vmul.f32 %v5837_v0, %v682_v25 }
 0x18c   :  { %v1319_v51 = vsel %vm1311_vm1, %v8238_v34, %v8237_v6  ;;  %v5894_v6 = vmul.f32 %v5827_v14, %v1318_v27  ;;  %v546_v34 = vsel %vm535_vm3, %v5014_v13, %v5019_v24  ;;  %v542_v57 = vsel %vm535_vm3, %v5019_v24, %v5049_v4 }
 0x18d   :  { %v5883_v60 = vpop.permute.xlu1 %1297  ;;  %v5885_v47 = vpop.permute.xlu0 %793  ;;  %v543_v26 = vsel %vm535_vm3, %v5020_v12, %v5050_v29  ;;  %v5912_v27 = vrot.slane %v5869_v62, %v5415_v54  ;;  %v5915_v13 = vmul.f32 %v5827_v14, %v1319_v51  ;;  %8249 = vst [vmem:[#allocation55_spill] sm:$0xff] %v5928_v1  ;;  %v8250_v12 = vunpack.i.h.bf16 %v5600_v35 }
 0x18e   :  { %8240 = vst [vmem:[#allocation51_spill] sm:$0xff] %v5883_v60  ;;  %v8243_v60 = vunpack.i.h.bf16 %v5548_v23  ;;  %v5918_v23 = vmul.f32 %v5832_v16, %v550_v58  ;;  %v5939_v17 = vmul.f32 %v5881_v33, %v546_v34  ;;  %v5948_v25 = vmul.f32 %v5856_v49, %v542_v57 }
 0x18f   :  { %8245 = vst [vmem:[#allocation52_spill] sm:$0xff] %v5912_v27  ;;  %v408_v51 = vsel %vm392_vm4, %v8250_v12, %v5035_v5  ;;  %v5951_v14 = vmul.f32 %v5856_v49, %v543_v26  ;;  %v5054_v12 = vunpack.i.l.bf16 %v5612_v37  ;;  %v5970_v26 = vrot.slane %v5869_v62, %v5711_v59 }
 0x190   :  { %v683_v55 = vsel %vm679_vm2, %v8244_v42, %v8243_v60  ;;  %8246 = vst [vmem:[#allocation53_spill] sm:$0xff] %v5918_v23  ;;  %v8248_v42 = vunpack.i.l.bf16 %v5600_v35  ;;  %8253 = vst [vmem:[#allocation58_spill] sm:$0xff] %v5939_v17  ;;  %v5942_v60 = vmul.f32 %v5881_v33, %v547_v15  ;;  %v5055_v15 = vunpack.i.h.bf16 %v5612_v37 }
 0x191   :  { %v5934_v21 = vpop.permute.xlu1 %1281  ;;  %v5936_v58 = vpop.permute.xlu0 %1441  ;;  %8256 = vst [vmem:[#allocation61_spill] sm:$0xff] %v5948_v25  ;;  %8257 = vst [vmem:[#allocation62_spill] sm:$0xff] %v5951_v14  ;;  %v5961_v33 = vrot.slane %v4344_v18, %v5800_v19  ;;  %v5966_v57 = vmul.f32 %v5912_v27, %v408_v51  ;;  %v8260_v37 = vunpack.i.l.bf16 %v5578_v30  ;;  %v6082_v25 = vrot.slane %v5869_v62, %v5800_v19 }
 0x192   :  { %v407_v24 = vsel %vm392_vm4, %v8248_v42, %v5034_v3  ;;  %8251 = vst [vmem:[#allocation56_spill] sm:$0xff] %v5934_v21  ;;  %8252 = vst [vmem:[#allocation57_spill] sm:$0xff] %v5936_v58  ;;  %v5945_v42 = vmul.f32 %v5837_v0, %v683_v55  ;;  %v8261_v21 = vunpack.i.h.bf16 %v5578_v30  ;;  %v5988_v55 = vrot.slane %v5869_v62, %v5433_v2 }
 0x193   :  { %8254 = vst [vmem:[#allocation59_spill] sm:$0xff] %v5942_v60  ;;  %v5957_v34 = vmul.f32 %v5912_v27, %v407_v24  ;;  %8258 = vst [vmem:[#allocation63_spill] sm:$0xff] %v5961_v33  ;;  %v5975_v24 = vld [vmem:[%s8037_s6 + $0xc] sm:$0xf]  ;;  %v538_v18 = vsel %vm535_vm3, %v5049_v4, %v8260_v37  ;;  %v8264_v30 = vunpack.i.l.bf16 %v5590_v32  ;;  %v8266_v0 = vunpack.i.h.bf16 %v5590_v32 }
 0x194   :  { %8255 = vst [vmem:[#allocation60_spill] sm:$0xff] %v5945_v42  ;;  %8259 = vst [vmem:[#allocation64_spill] sm:$0xff] %v5970_v26  ;;  %v539_v51 = vsel %vm535_vm3, %v5050_v29, %v8261_v21  ;;  %v6021_v21 = vmul.f32 %v5961_v33, %v538_v18  ;;  %v836_v42 = vsel %vm823_vm5, %v5696_v7, %v5628_v44  ;;  %v8270_v14 = vunpack.i.l.bf16 %v5620_v39 }
 0x195   :  { %8262 = vst [vmem:[#allocation65_spill] sm:$0xff] %v5988_v55  ;;  %v5990_v49 = vpop.permute.xlu1 %376  ;;  %v5992_v27 = vpop.permute.xlu0 %809  ;;  %v399_v29 = vsel %vm392_vm4, %v8264_v30, %v5054_v12  ;;  %v8265_v37 = vmov %v8264_v30  ;;  %v404_v16 = vsel %vm392_vm4, %v5035_v5, %v8266_v0  ;;  %v8267_v4 = vmov %v8266_v0  ;;  %v6031_v0 = vld [vmem:[%s8037_s6 + $0x18] sm:$0xf] }
 0x196   :  { %8263 = vst [vmem:[#allocation66_spill] sm:$0xff] %v5990_v49  ;;  %v403_v49 = vsel %vm392_vm4, %v5034_v3, %v8265_v37  ;;  %v400_v1 = vsel %vm392_vm4, %v8267_v4, %v5055_v15  ;;  %v6018_v30 = vrot.slane %v5975_v24, %v5433_v2  ;;  %v6024_v23 = vmul.f32 %v5961_v33, %v539_v51 }
 0x197   :  { %v5060_v3 = vunpack.i.h.bf16 %v5606_v36  ;;  %v5059_v37 = vunpack.i.l.bf16 %v5606_v36  ;;  %v832_v5 = vsel %vm823_vm5, %v5628_v44, %v5673_v43  ;;  %v6045_v36 = vmul.f32 %v5988_v55, %v403_v49 }
 0x198   :  { %8268 = vst [vmem:[#allocation67_spill] sm:$0xff] %v6018_v30  ;;  %v6048_v33 = vmul.f32 %v5988_v55, %v404_v16  ;;  %v6051_v32 = vmul.f32 %v5970_v26, %v399_v29  ;;  %v6054_v31 = vmul.f32 %v5970_v26, %v400_v1  ;;  %v6064_v49 = vrot.slane %v6031_v0, %v5415_v54 }
 0x199   :  { %v6040_v51 = vpop.permute.xlu0 %665  ;;  %v6042_v4 = vpop.permute.xlu1 %801  ;;  %v864_v16 = vmul.f32 %v6018_v30, %v832_v5  ;;  %v6069_v29 = vrot.slane %v5975_v24, %v5415_v54  ;;  %v8269_v26 = vunpack.i.h.bf16 %v5620_v39  ;;  %v8271_v44 = vunpack.i.l.bf16 %v5600_v35 }
 0x19a   :  { %v833_v18 = vsel %vm823_vm5, %v5885_v47, %v6042_v4  ;;  %v8132_v5 = vunpack.i.l.bf16 %v5618_v38  ;;  %v8272_v39 = vunpack.i.h.bf16 %v5600_v35  ;;  %v1460_v35 = vsel %vm1455_vm0, %v5682_v41, %v5626_v40 }
 0x19b   :  { %v868_v1 = vmul.f32 %v6018_v30, %v833_v18  ;;  %v1179_v55 = vsel %vm1167_vm6, %v8269_v26, %v5060_v3  ;;  %v1178_v18 = vsel %vm1167_vm6, %v8270_v14, %v5059_v37  ;;  %v395_v62 = vsel %vm392_vm4, %v5054_v12, %v8271_v44 }
 0x19c   :  { %v1464_v12 = vsel %vm1455_vm0, %v5636_v46, %v5682_v41  ;;  %v863_v44 = vmul.f32 %v6069_v29, %v836_v42  ;;  %v8274_v46 = vunpack.i.h.bf16 %v5618_v38  ;;  %v8327_v40 = vpack.c.bf16 %v5966_v57, %v5957_v34 }
 0x19d   :  { %v6090_v30 = vpop.permute.xlu0 %521  ;;  %v818_v26 = vpop.permute.xlu1 %817  ;;  %v4839_v54 = vpack.c.bf16 %v868_v1, %v864_v16  ;;  %v396_v16 = vsel %vm392_vm4, %v5055_v15, %v8272_v39  ;;  %v6108_v1 = vmul.f32 %v6064_v49, %v1179_v55  ;;  %v6125_v39 = vrot.slane %v6031_v0, %v5433_v2 }
 0x19e   :  { %v837_v14 = vsel %vm823_vm5, %v818_v26, %v5885_v47  ;;  %v6117_v47 = vmul.f32 %v6064_v49, %v1178_v18  ;;  %v6128_v15 = vmul.f32 %v6082_v25, %v395_v62  ;;  %v1495_v18 = vmul.f32 %v5429_v63, %v1464_v12 }
 0x19f   :  { %v867_v17 = vmul.f32 %v6069_v29, %v837_v14  ;;  %2046 = vmatprep.subr.bf16.mxu0 %v4839_v54  ;;  %v6133_v54 = vmul.f32 %v6082_v25, %v396_v16  ;;  %v1496_v62 = vmul.f32 %v5454_v9, %v1460_v35  ;;  %v688_v16 = vsel %vm679_vm2, %v5644_v48, %v5702_v10 }
 0x1a0   :  { %v6410_v34 = vrot.slane %v6031_v0, %v5711_v59  ;;  %v6418_v57 = vrot.slane %v6031_v0, %v5800_v19 }
 0x1a1   :  { %v4838_v55 = vpack.c.bf16 %v867_v17, %v863_v44  ;;  %v1434_v42 = vpop.permute.xlu0 %1433  ;;  %v6130_v60 = vpop.permute.xlu1 %1135  ;;  %v1174_v17 = vsel %vm1167_vm6, %v5059_v37, %v8132_v5  ;;  %v5203_v37 = vmov 839922192   ;;  %v5204_v5 = vmov 1985246804  }
 0x1a2   :  { %v1461_v41 = vsel %vm1455_vm0, %v1434_v42, %v5936_v58  ;;  %v1465_v14 = vsel %vm1455_vm0, %v5727_v61, %v1434_v42  ;;  %v825_v42 = vsel %vm823_vm5, %v5992_v27, %v818_v26  ;;  %v8273_v61 = vpack.c.bf16 %v5815_v28, %v5812_v20 }
 0x1a3   :  { %v1499_v12 = vmul.f32 %v5429_v63, %v1465_v14  ;;  %v1500_v44 = vmul.f32 %v5454_v9, %v1461_v41  ;;  %2047 = vmatpush1.bf16.msra.mxu0 %v4838_v55  ;;  %v41_v35 = vunpack.c.l.s4 %v5203_v37  ;;  %v48_v58 = vunpack.c.l.s4 %v5204_v5 }
 0x1a4   :  { %2048 = vmatprep.subr.bf16.mxu0 %v8273_v61  ;;  %v1175_v63 = vsel %vm1167_vm6, %v5060_v3, %v8274_v46  ;;  %v6165_v9 = vrot.slane %v5975_v24, %v5800_v19  ;;  %v824_v61 = vsel %vm823_vm5, %v5634_v45, %v5696_v7  ;;  %v720_v20 = vmul.f32 %v5772_v22, %v688_v16  ;;  %v8279_v16 = vld [vmem:[#allocation33_spill] sm:$0xff] }
 0x1a5   :  { %v4874_v55 = vpack.c.bf16 %v1499_v12, %v1495_v18  ;;  %v6167_v41 = vpop.permute.xlu0 %1153  ;;  %v658_v26 = vpop.permute.xlu1 %657  ;;  %v4875_v14 = vpack.c.bf16 %v1500_v44, %v1496_v62  ;;  %v829_v28 = vsel %vm823_vm5, %v6042_v4, %v5992_v27  ;;  %v8276_v18 = vld [vmem:[#allocation39_spill] sm:$0xff]  ;;  %v6189_v7 = vrot.slane %v5975_v24, %v5711_v59 }
 0x1a6   :  { %8275 = vst [vmem:[#allocation68_spill] sm:$0xff] %v6165_v9  ;;  %v689_v46 = vsel %vm679_vm2, %v5765_v11, %v658_v26  ;;  %v870_v3 = vmul.f32 %v6165_v9, %v825_v42  ;;  %v8277_v62 = vpack.c.bf16 %v5795_v56, %v8276_v18  ;;  %v692_v12 = vsel %vm679_vm2, %v8279_v16, %v5644_v48 }
 0x1a7   :  { %v724_v5 = vmul.f32 %v5772_v22, %v689_v46  ;;  %2101 = vmatprep.subr.bf16.mxu1 %v4875_v14  ;;  %8278 = vst [vmem:[#allocation39_spill] sm:$0xff] %v6189_v7  ;;  %v42_v27 = vunpack.c.0.s8 %v41_v35  ;;  %v49_v4 = vunpack.c.0.s8 %v48_v58  ;;  %v828_v22 = vsel %vm823_vm5, %v5673_v43, %v5634_v45 }
 0x1a8   :  { %2049 = vmatpush1.bf16.msra.mxu0 %v8277_v62  ;;  %2102 = vmatpush1.bf16.msra.mxu1 %v4874_v55  ;;  %v866_v56 = vmul.f32 %v6165_v9, %v824_v61  ;;  %v8280_v44 = vpack.c.bf16 %v5915_v13, %v5894_v6  ;;  %v5205_v14 = vmov 0.0   ;;  %v869_v58 = vmul.f32 %v6189_v7, %v829_v28  ;;  %v8281_v13 = vld [vmem:[#allocation36_spill] sm:$0xff] }
 0x1a9   :  { %v6203_v24 = vpop.permute.xlu0 %1137  ;;  %v674_v42 = vpop.permute.xlu1 %673  ;;  %v4831_v37 = vpack.c.bf16 %v724_v5, %v720_v20  ;;  %v36_v48 = vsel %vm34_vm7, 1.0, %v5205_v14  ;;  %v6212_v43 = vmul.f32 %v6125_v39, %v1174_v17  ;;  %v6215_v6 = vmul.f32 %v6125_v39, %v1175_v63  ;;  %v6222_v20 = vld [vmem:[%s8038_s3 + $0x8] ss:$12 sps:$4 sm:$0xff]  }
 0x1aa   :  { %2103 = vmatprep.subr.bf16.mxu1 %v8280_v44  ;;  %v693_v45 = vsel %vm679_vm2, %v674_v42, %v5765_v11  ;;  %v719_v35 = vmul.f32 %v8281_v13, %v692_v12  ;;  %v4841_v61 = vpack.c.bf16 %v870_v3, %v866_v56  ;;  %8282 = vst [vmem:[#allocation33_spill] sm:$0xff] %v6222_v20  ;;  %v8303_v56 = vld [vmem:[#allocation41_spill] sm:$0xff]  ;;  %v8304_v62 = vld [vmem:[#allocation40_spill] sm:$0xff] }
 0x1ab   :  { %v723_v55 = vmul.f32 %v8281_v13, %v693_v45  ;;  %2050 = vmatprep.subr.bf16.mxu0 %v4831_v37  ;;  %v865_v11 = vmul.f32 %v6189_v7, %v828_v22  ;;  %v681_v17 = vsel %vm679_vm2, %v6040_v51, %v674_v42  ;;  %v8283_v63 = vpack.c.bf16 %v5783_v8, %v5818_v50  ;;  %v8284_v50 = vld [vmem:[#allocation20_spill] sm:$0xff]  ;;  %v8285_v42 = vld [vmem:[#allocation22_spill] sm:$0xff]  ;;  %v8286_v37 = vld [vmem:[#allocation29_spill] sm:$0xff] }
 0x1ac   :  { %v38_v46 = vpack.c.bf16 %v5205_v14, %v36_v48  ;;  %v45_v28 = vsub.s32 %v42_v27, %v5410_v52  ;;  %v52_v12 = vsub.s32 %v49_v4, %v5410_v52  ;;  %v680_v8 = vsel %vm679_vm2, %v8284_v50, %v8279_v16  ;;  %v8287_v14 = vld [vmem:[#allocation46_spill] sm:$0xff]  ;;  %v8289_v45 = vld [vmem:[#allocation59_spill] sm:$0xff] }
 0x1ad   :  { %2104 = vmatpush1.bf16.msra.mxu1 %v8283_v63  ;;  %v4830_v3 = vpack.c.bf16 %v723_v55, %v719_v35  ;;  %v6232_v5 = vpop.permute.xlu0 %5077  ;;  %v6234_v18 = vpop.permute.xlu1 %5072  ;;  %v4840_v27 = vpack.c.bf16 %v869_v58, %v865_v11  ;;  %v548_v52 = vsel %vm535_vm3, %v8286_v37, %v8285_v42  ;;  %v685_v4 = vsel %vm679_vm2, %v658_v26, %v6040_v51  ;;  %v8288_v16 = vld [vmem:[#allocation38_spill] sm:$0xff]  ;;  %v8293_v63 = vld [vmem:[#allocation55_spill] sm:$0xff] }
 0x1ae   :  { %2132 = vmatprep.subr.bf16.mxu1 %v4841_v61  ;;  %v726_v48 = vmul.f32 %v8287_v14, %v681_v17  ;;  %v544_v58 = vsel %vm535_vm3, %v8285_v42, %v8288_v16  ;;  %v8290_v13 = vld [vmem:[#allocation58_spill] sm:$0xff]  ;;  %v6266_v55 = vrot.slane %v38_v46, %v45_v28  ;;  %v684_v26 = vsel %vm679_vm2, %v5702_v10, %v8284_v50  ;;  %v8292_v17 = vld [vmem:[#allocation60_spill] sm:$0xff]  ;;  %v6281_v28 = vld [vmem:[%s8037_s6 + $0x14] sm:$0xf] }
 0x1af   :  { %2051 = vmatpush1.bf16.msra.mxu0 %v4830_v3  ;;  %v8291_v35 = vpack.c.bf16 %v8289_v45, %v8290_v13  ;;  %v722_v61 = vmul.f32 %v8287_v14, %v680_v8  ;;  %v8294_v3 = vpack.c.bf16 %v8292_v17, %v8293_v63  ;;  %v8295_v45 = vld [vmem:[#allocation25_spill] sm:$0xff]  ;;  %v8298_v8 = vld [vmem:[#allocation43_spill] sm:$0xff]  ;;  %v8299_v63 = vld [vmem:[#allocation50_spill] sm:$0xff] }
 0x1b0   :  { %4498 = vmatmul.mubr.msk.bf16.vlgmr.msra.gmra.mxu1 %vm2042_vm8, %v6222_v20  ;;  %v8296_v13 = vld [vmem:[#allocation45_spill] sm:$0xff]  ;;  %v8322_v20 = vld [vmem:[#allocation48_spill] sm:$0xff] }
 0x1b1   :  { %2052 = vmatprep.subr.bf16.mxu0 %v8291_v35  ;;  %2133 = vmatpush1.bf16.msra.mxu1 %v4840_v27  ;;  %v530_v11 = vpop.permute.xlu0 %529  ;;  %v514_v42 = vpop.permute.xlu1 %513  ;;  %v6283_v27 = vrot.slane %v38_v46, %v52_v12  ;;  %v575_v35 = vmul.f32 %v8296_v13, %v548_v52  ;;  %v8297_v10 = vld [vmem:[#allocation37_spill] sm:$0xff]  ;;  %v8300_v12 = vld [vmem:[#allocation54_spill] sm:$0xff]  ;;  %v4833_v52 = vpack.c.bf16 %v726_v48, %v722_v61 }
 0x1b2   :  { %2134 = vmatprep.subr.bf16.mxu1 %v8294_v3  ;;  %2164 = vmatprep.mubr.bf16.mxu1 %v8295_v45  ;;  %v725_v50 = vmul.f32 %v8297_v10, %v685_v4  ;;  %v549_v14 = vsel %vm535_vm3, %v530_v11, %v8298_v8  ;;  %v545_v17 = vsel %vm535_vm3, %v8298_v8, %v514_v42  ;;  %v8301_v45 = vld [vmem:[#allocation53_spill] sm:$0xff]  ;;  %v8309_v61 = vld [vmem:[#allocation30_spill] sm:$0xff] }
 0x1b3   :  { %v576_v3 = vmul.f32 %v8299_v63, %v544_v58  ;;  %v579_v51 = vmul.f32 %v8296_v13, %v549_v14  ;;  %v580_v46 = vmul.f32 %v8299_v63, %v545_v17  ;;  %v8302_v44 = vpack.c.bf16 %v8300_v12, %v8301_v45  ;;  %v8306_v58 = vld [vmem:[#allocation32_spill] sm:$0xff]  ;;  %v8310_v45 = vld [vmem:[#allocation3_spill] sm:$0xff] }
 0x1b4   :  { %v721_v4 = vmul.f32 %v8297_v10, %v684_v26  ;;  %v537_v22 = vsel %vm535_vm3, %v6090_v30, %v530_v11  ;;  %v8305_v8 = vpack.c.bf16 %v8303_v56, %v8304_v62  ;;  %v6309_v13 = vrot.slane %v8306_v58, %v5711_v59  ;;  %v8308_v26 = vld [vmem:[#allocation24_spill] sm:$0xff] }
 0x1b5   :  { %2053 = vmatpush1.bf16.msra.mxu0 %v8302_v44  ;;  %v6313_v14 = vrot.slane %v6281_v28, %v5433_v2  ;;  %v8307_v44 = vld [vmem:[#allocation21_spill] sm:$0xff]  ;;  %v405_v11 = vsel %vm392_vm4, %v8309_v61, %v8308_v26  ;;  %v4822_v62 = vpack.c.bf16 %v579_v51, %v575_v35  ;;  %v6323_v56 = vpop.permute.xlu0 %999  ;;  %v6325_v10 = vpop.permute.xlu1 %1303  ;;  %v4823_v17 = vpack.c.bf16 %v580_v46, %v576_v3  ;;  %v8311_v51 = vld [vmem:[#allocation42_spill] sm:$0xff]  ;;  %v8312_v3 = vld [vmem:[#allocation63_spill] sm:$0xff] }
 0x1b6   :  { %2135 = vmatpush1.bf16.msra.mxu1 %v8305_v8  ;;  %v536_v48 = vsel %vm535_vm3, %v8307_v44, %v8286_v37  ;;  %v540_v63 = vsel %vm535_vm3, %v8288_v16, %v8307_v44  ;;  %v4832_v12 = vpack.c.bf16 %v725_v50, %v721_v4  ;;  %v6333_v37 = vrot.slane %v8306_v58, %v5800_v19  ;;  %v8314_v4 = vld [vmem:[#allocation28_spill] sm:$0xff] }
 0x1b7   :  { %2136 = vmatprep.subr.bf16.mxu1 %v4833_v52  ;;  %v6337_v8 = vrot.slane %v6281_v28, %v8310_v45  ;;  %v401_v35 = vsel %vm392_vm4, %v8308_v26, %v8311_v51  ;;  %v582_v46 = vmul.f32 %v8312_v3, %v537_v22  ;;  %v541_v16 = vsel %vm535_vm3, %v514_v42, %v6090_v30  ;;  %v8315_v44 = vld [vmem:[#allocation52_spill] sm:$0xff]  ;;  %v8316_v22 = vld [vmem:[#allocation23_spill] sm:$0xff]  ;;  %v8318_v42 = vld [vmem:[#allocation49_spill] sm:$0xff] }
 0x1b8   :  { %2054 = vmatprep.subr.bf16.mxu0 %v4823_v17  ;;  %v6349_v50 = vcombine.high %v6266_v55, %v6283_v27  ;;  %v578_v52 = vmul.f32 %v8312_v3, %v536_v48  ;;  %v393_v58 = vsel %vm392_vm4, %v8314_v4, %v8309_v61  ;;  %v431_v26 = vmul.f32 %v8315_v44, %v405_v11  ;;  %v8317_v45 = vld [vmem:[#allocation31_spill] sm:$0xff] }
 0x1b9   :  { %2055 = vmatpush1.bf16.msra.mxu0 %v4822_v62  ;;  %v1172_v30 = vsel %vm1167_vm6, %v8317_v45, %v8316_v22  ;;  %v577_v17 = vmul.f32 %v8318_v42, %v540_v63  ;;  %v397_v48 = vsel %vm392_vm4, %v8311_v51, %v8314_v4  ;;  %v385_v3 = vpop.permute.xlu0 %384  ;;  %v8319_v61 = vpack.c.bf16 %v6048_v33, %v6045_v36  ;;  %v369_v62 = vpop.permute.xlu1 %368  ;;  %v8323_v36 = vld [vmem:[#allocation26_spill] sm:$0xff]  ;;  %v8324_v4 = vld [vmem:[#allocation47_spill] sm:$0xff] }
 0x1ba   :  { %8313 = vst [vmem:[#allocation36_spill] sm:$0xff] %v6349_v50  ;;  %2137 = vmatpush1.bf16.msra.mxu1 %v4832_v12  ;;  %v8320_v11 = vpack.c.bf16 %v6024_v23, %v6021_v21  ;;  %v8321_v12 = vld [vmem:[#allocation65_spill] sm:$0xff]  ;;  %v581_v63 = vmul.f32 %v8318_v42, %v541_v16  ;;  %v406_v51 = vsel %vm392_vm4, %v385_v3, %v8322_v20  ;;  %v8325_v16 = vld [vmem:[#allocation27_spill] sm:$0xff] }
 0x1bb   :  { %2056 = vmatprep.subr.bf16.mxu0 %v8319_v61  ;;  %v432_v2 = vmul.f32 %v8321_v12, %v401_v35  ;;  %v402_v33 = vsel %vm392_vm4, %v8322_v20, %v369_v62  ;;  %v1316_v23 = vsel %vm1311_vm1, %v8324_v4, %v8323_v36  ;;  %v435_v21 = vmul.f32 %v8315_v44, %v406_v51  ;;  %v8326_v20 = vld [vmem:[#allocation66_spill] sm:$0xff] }
 0x1bc   :  { %2138 = vmatprep.subr.bf16.mxu1 %v8320_v11  ;;  %v436_v61 = vmul.f32 %v8321_v12, %v402_v33  ;;  %v4825_v35 = vpack.c.bf16 %v582_v46, %v578_v52  ;;  %v1320_v42 = vsel %vm1311_vm1, %v8325_v16, %v8324_v4  ;;  %v394_v7 = vsel %vm392_vm4, %v8326_v20, %v385_v3  ;;  %v8328_v44 = vld [vmem:[#allocation62_spill] sm:$0xff]  ;;  %v8329_v12 = vld [vmem:[#allocation61_spill] sm:$0xff] }
 0x1bd   :  { %2057 = vmatpush1.bf16.msra.mxu0 %v8327_v40  ;;  %v8330_v46 = vpack.c.bf16 %v8328_v44, %v8329_v12  ;;  %v5075_v52 = vunpack.i.h.bf16 %v6234_v18  ;;  %v5074_v51 = vunpack.i.l.bf16 %v6234_v18  ;;  %v4814_v33 = vpack.c.bf16 %v435_v21, %v431_v26  ;;  %v6404_v4 = vpop.permute.xlu0 %1007  ;;  %v6406_v11 = vpop.permute.xlu1 %5082 }
 0x1be   :  { %v4815_v9 = vpack.c.bf16 %v436_v61, %v432_v2  ;;  %v4824_v3 = vpack.c.bf16 %v581_v63, %v577_v17  ;;  %v6414_v40 = vcombine.low %v6266_v55, %v6283_v27  ;;  %v434_v18 = vmul.f32 %v6082_v25, %v393_v58  ;;  %v8332_v63 = vld [vmem:[#allocation64_spill] sm:$0xff]  ;;  %v8333_v55 = vld [vmem:[#allocation35_spill] sm:$0xff] }
 0x1bf   :  { %2139 = vmatpush1.bf16.msra.mxu1 %v8330_v46  ;;  %v6422_v26 = vmul.f32 %v6125_v39, %v1172_v30  ;;  %v438_v2 = vmul.f32 %v6082_v25, %v394_v7  ;;  %v398_v17 = vsel %vm392_vm4, %v369_v62, %v8326_v20  ;;  %v433_v21 = vmul.f32 %v8332_v63, %v397_v48  ;;  %v8334_v61 = vld [vmem:[#allocation44_spill] sm:$0xff] }
 0x1c0   :  { %2140 = vmatprep.subr.bf16.mxu1 %v4825_v35  ;;  %8331 = vst [vmem:[#allocation20_spill] sm:$0xff] %v6414_v40  ;;  %2058 = vmatprep.subr.bf16.mxu0 %v4815_v9  ;;  %v1351_v27 = vmul.f32 %v8333_v55, %v1320_v42  ;;  %v1352_v35 = vmul.f32 %v8334_v61, %v1316_v23  ;;  %v8336_v9 = vunpack.i.l.bf16 %v6232_v5  ;;  %v8337_v48 = vunpack.i.h.bf16 %v6232_v5  ;;  %v8338_v42 = vld [vmem:[#allocation51_spill] sm:$0xff] }
 0x1c1   :  { %2059 = vmatpush1.bf16.msra.mxu0 %v4814_v33  ;;  %v1176_v0 = vsel %vm1167_vm6, %v6130_v60, %v8317_v45  ;;  %v5088_v58 = vpop.permute.xlu0 %5087  ;;  %v8335_v25 = vpack.c.bf16 %v6133_v54, %v6128_v15  ;;  %v1290_v7 = vpop.permute.xlu1 %1289  ;;  %v437_v45 = vmul.f32 %v8332_v63, %v398_v17  ;;  %v5084_v23 = vunpack.i.l.bf16 %v6406_v11  ;;  %v8339_v54 = vld [vmem:[#allocation56_spill] sm:$0xff] }
 0x1c2   :  { %2060 = vmatprep.subr.bf16.mxu0 %v6349_v50  ;;  %v1030_v30 = vsel %vm1023_vm9, %v5074_v51, %v8336_v9  ;;  %v1031_v62 = vsel %vm1023_vm9, %v5075_v52, %v8337_v48  ;;  %v1317_v15 = vsel %vm1311_vm1, %v1290_v7, %v8338_v42  ;;  %v1321_v20 = vsel %vm1311_vm1, %v8339_v54, %v1290_v7 }
 0x1c3   :  { %2141 = vmatpush1.bf16.msra.mxu1 %v4824_v3  ;;  %v5089_v44 = vunpack.i.l.bf16 %v5088_v58  ;;  %v1355_v12 = vmul.f32 %v8333_v55, %v1321_v20  ;;  %v1356_v46 = vmul.f32 %v8334_v61, %v1317_v15  ;;  %v4817_v33 = vpack.c.bf16 %v438_v2, %v434_v18 }
 0x1c4   :  { %2142 = vmatprep.subr.bf16.mxu1 %v8335_v25  ;;  %v1207_v3 = vmul.f32 %v6064_v49, %v1176_v0  ;;  %v1312_v17 = vsel %vm1311_vm1, %v8323_v36, %v6325_v10  ;;  %v5085_v63 = vunpack.i.h.bf16 %v6406_v11  ;;  %v5090_v25 = vunpack.i.h.bf16 %v5088_v58 }
 0x1c5   :  { %2061 = vmatpush1.bf16.msra.mxu0 %v6414_v40  ;;  %v8340_v7 = vpack.c.bf16 %v6054_v31, %v6051_v32  ;;  %v1324_v18 = vsel %vm1311_vm1, %v6325_v10, %v8325_v16  ;;  %v4866_v2 = vpack.c.bf16 %v1355_v12, %v1351_v27  ;;  %v1146_v55 = vpop.permute.xlu0 %1145  ;;  %v6471_v61 = vpop.permute.xlu1 %1009  ;;  %v4867_v36 = vpack.c.bf16 %v1356_v46, %v1352_v35 }
 0x1c6   :  { %v1072_v0 = vmul.f32 %v6313_v14, %v1030_v30  ;;  %v4816_v58 = vpack.c.bf16 %v437_v45, %v433_v21  ;;  %v1034_v31 = vsel %vm1023_vm9, %v5084_v23, %v5074_v51  ;;  %v1173_v32 = vsel %vm1167_vm6, %v1146_v55, %v6167_v41  ;;  %v8341_v21 = vld [vmem:[#allocation17_spill] sm:$0xff] }
 0x1c7   :  { %2143 = vmatpush1.bf16.msra.mxu1 %v8340_v7  ;;  %v1076_v10 = vmul.f32 %v6313_v14, %v1031_v62  ;;  %v1353_v16 = vmul.f32 %v6309_v13, %v1312_v17  ;;  %v1177_v27 = vsel %vm1167_vm6, %v6203_v24, %v1146_v55  ;;  %v1212_v35 = vmul.f32 %v6125_v39, %v1173_v32 }
 0x1c8   :  { %2144 = vmatprep.subr.bf16.mxu1 %v4817_v33  ;;  %2062 = vmatprep.subr.bf16.mxu0 %v4867_v36  ;;  %v8342_v9 = vunpack.i.l.bf16 %v8341_v21  ;;  %v1354_v30 = vmul.f32 %v6333_v37, %v1324_v18  ;;  %v1035_v48 = vsel %vm1023_vm9, %v5085_v63, %v5075_v52  ;;  %v8343_v62 = vunpack.i.h.bf16 %v8341_v21 }
 0x1c9   :  { %2063 = vmatpush2.bf16.msra.mxu0 %v4866_v2  ;;  %v1071_v45 = vmul.f32 %v6337_v8, %v1034_v31  ;;  %v8344_v15 = vunpack.i.h.bf16 %v5618_v38  ;;  %v8345_v12 = vunpack.i.l.bf16 %v5618_v38  ;;  %v1306_v52 = vpop.permute.xlu0 %1305  ;;  %v8346_v33 = vpack.c.bf16 %v6215_v6, %v6212_v43  ;;  %v6512_v17 = vpop.permute.xlu1 %991 }
 0x1ca   :  { %v1182_v51 = vsel %vm1167_vm6, %v5089_v44, %v8342_v9  ;;  %v1183_v39 = vsel %vm1167_vm6, %v5090_v25, %v8343_v62  ;;  %v1211_v7 = vmul.f32 %v6064_v49, %v1177_v27  ;;  %v1325_v38 = vsel %vm1311_vm1, %v1306_v52, %v8339_v54 }
 0x1cb   :  { %2145 = vmatpush1.bf16.msra.mxu1 %v4816_v58  ;;  %v1171_v20 = vsel %vm1167_vm6, %v8344_v15, %v5090_v25  ;;  %v1170_v46 = vsel %vm1167_vm6, %v8345_v12, %v5089_v44  ;;  %2064 = vmatprep.subr.bf16.mxu0 %v8346_v33  ;;  %v1313_v25 = vsel %vm1311_vm1, %v8338_v42, %v1306_v52 }
 0x1cc   :  { %2146 = vmatprep.subr.bf16.mxu1 %v6349_v50  ;;  %v1218_v44 = vmul.f32 %v6418_v57, %v1182_v51  ;;  %v1357_v18 = vmul.f32 %v6309_v13, %v1313_v25  ;;  %v1358_v43 = vmul.f32 %v6333_v37, %v1325_v38  ;;  %v4859_v6 = vpack.c.bf16 %v1212_v35, %v6422_v26 }
 0x1cd   :  { %v1222_v2 = vmul.f32 %v6418_v57, %v1183_v39  ;;  %v1075_v49 = vmul.f32 %v6337_v8, %v1035_v48  ;;  %v1221_v55 = vmul.f32 %v6410_v34, %v1171_v20  ;;  %v1217_v42 = vmul.f32 %v6410_v34, %v1170_v46  ;;  %v6538_v58 = vpop.permute.xlu0 %993  ;;  %v1160_v31 = vpop.permute.xlu1 %1159  ;;  %v5189_v46 = vld [vmem:[%s8035_s1] sm:$0xff] }
 0x1ce   :  { %v8347_v36 = vpack.c.bf16 %v6108_v1, %v6117_v47  ;;  %v1028_v54 = vsel %vm1023_vm9, %v6323_v56, %v6404_v4  ;;  %v4868_v26 = vpack.c.bf16 %v1357_v18, %v1353_v16  ;;  %v4869_v32 = vpack.c.bf16 %v1358_v43, %v1354_v30  ;;  %v8348_v18 = vld [vmem:[#allocation7_spill] sm:$0xff] }
 0x1cf   :  { %2147 = vmatpush1.bf16.msra.mxu1 %v6414_v40  ;;  %v4858_v27 = vpack.c.bf16 %v1211_v7, %v1207_v3  ;;  %v1032_v1 = vsel %vm1023_vm9, %v6512_v17, %v6323_v56  ;;  %v1168_v47 = vsel %vm1167_vm6, %v8316_v22, %v1160_v31  ;;  %v1180_v35 = vsel %vm1167_vm6, %v1160_v31, %v6130_v60  ;;  %v8349_v43 = vld [vmem:[#allocation11_spill] sm:$0xff] }
 0x1d0   :  { %2065 = vmatpush2.bf16.msra.mxu0 %v8347_v36  ;;  %2148 = vmatprep.subr.bf16.mxu1 %v4869_v32  ;;  %v4865_v16 = vpack.c.bf16 %v1222_v2, %v1218_v44  ;;  %v4855_v21 = vpack.c.bf16 %v1076_v10, %v1072_v0  ;;  %v1064_v9 = vmul.f32 %v6313_v14, %v1028_v54 }
 0x1d1   :  { %2066 = vmatprep.subr.bf16.mxu0 %v4859_v6  ;;  %v4854_v3 = vpack.c.bf16 %v1075_v49, %v1071_v45  ;;  %v4864_v51 = vpack.c.bf16 %v1221_v55, %v1217_v42  ;;  %v1063_v30 = vmul.f32 %v6337_v8, %v1032_v1  ;;  %v1209_v56 = vmul.f32 %v6410_v34, %v1168_v47  ;;  %v1162_v22 = vpop.permute.xlu0 %1161  ;;  %v1002_v62 = vpop.permute.xlu1 %1001 }
 0x1d2   :  { %v1210_v48 = vmul.f32 %v6418_v57, %v1180_v35  ;;  %v1169_v60 = vsel %vm1167_vm6, %v6167_v41, %v1162_v22  ;;  %v1181_v0 = vsel %vm1167_vm6, %v1162_v22, %v6203_v24  ;;  %v1029_v10 = vsel %vm1023_vm9, %v1002_v62, %v6471_v61  ;;  %v8357_v22 = vld [vmem:[#allocation12_spill] sm:$0xff] }
 0x1d3   :  { %2149 = vmatpush2.bf16.msra.mxu1 %v4868_v26  ;;  %v1033_v39 = vsel %vm1023_vm9, %v6538_v58, %v1002_v62  ;;  %v1213_v45 = vmul.f32 %v6410_v34, %v1169_v60  ;;  %v1214_v15 = vmul.f32 %v6418_v57, %v1181_v0  ;;  %v1068_v41 = vmul.f32 %v6313_v14, %v1029_v10  ;;  %v5190_v34 = vld [vmem:[%s8035_s1 + $0x10] sm:$0xff] }
 0x1d4   :  { %2067 = vmatpush2.bf16.msra.mxu0 %v4858_v27  ;;  %2150 = vmatprep.subr.bf16.mxu1 %v4865_v16  ;;  %v1067_v20 = vmul.f32 %v6337_v8, %v1033_v39  ;;  %v1054_v24 = vrot.slane %v6281_v28, %v5711_v59  ;;  %v1058_v12 = vrot.slane %v6281_v28, %v5800_v19  ;;  %v8350_v49 = vunpack.i.h.bf16 %v6232_v5 }
 0x1d5   :  { %2068 = vmatprep.subr.bf16.mxu0 %v4855_v21  ;;  %v4463_v57 = vcombine.high %v5189_v46, %v5190_v34  ;;  %v4860_v8 = vpack.c.bf16 %v1213_v45, %v1209_v56  ;;  %v5098_v14 = vpop.permute.xlu0 %5097  ;;  %v5093_v33 = vpop.permute.xlu1 %5092  ;;  %v4851_v7 = vpack.c.bf16 %v1068_v41, %v1064_v9  ;;  %v4861_v25 = vpack.c.bf16 %v1214_v15, %v1210_v48  ;;  %v8352_v21 = vld [vmem:[#allocation9_spill] sm:$0xff]  ;;  %v8355_v56 = vld [vmem:[#allocation14_spill] sm:$0xff]  ;;  %v8356_v48 = vld [vmem:[#allocation8_spill] sm:$0xff] }
 0x1d6   :  { %v4850_v52 = vpack.c.bf16 %v1067_v20, %v1063_v30  ;;  %v5095_v38 = vunpack.i.h.bf16 %v5093_v33  ;;  %v5094_v44 = vunpack.i.l.bf16 %v5093_v33  ;;  %v4462_v28 = vcombine.low %v5189_v46, %v5190_v34  ;;  %v8353_v9 = vld [vmem:[#allocation13_spill] sm:$0xff]  ;;  %v8354_v30 = vld [vmem:[#allocation10_spill] sm:$0xff]  ;;  %v8358_v20 = vld [vmem:[#allocation67_spill] sm:$0xff] }
 0x1d7   :  { %2151 = vmatpush2.bf16.msra.mxu1 %v4864_v51  ;;  %v4846_v6 = vpack.c.bf16 %v8349_v43, %v8348_v18  ;;  %v5100_v2 = vunpack.i.h.bf16 %v5098_v14  ;;  %v8351_v42 = vunpack.i.l.bf16 %v6232_v5  ;;  %v5099_v47 = vunpack.i.l.bf16 %v5098_v14 }
 0x1d8   :  { %2069 = vmatpush2.bf16.msra.mxu0 %v4854_v3  ;;  %2152 = vmatprep.subr.bf16.mxu1 %v4861_v25  ;;  %v1027_v55 = vsel %vm1023_vm9, %v8350_v49, %v5095_v38  ;;  %v1038_v54 = vsel %vm1023_vm9, %v5094_v44, %v5084_v23  ;;  %v1039_v5 = vsel %vm1023_vm9, %v5095_v38, %v5085_v63 }
 0x1d9   :  { %2070 = vmatprep.subr.bf16.mxu0 %v4851_v7  ;;  %v1026_v36 = vsel %vm1023_vm9, %v8351_v42, %v5094_v44  ;;  %v1077_v26 = vmul.f32 %v1054_v24, %v1027_v55  ;;  %v1016_v32 = vpop.permute.xlu0 %1015  ;;  %v6594_v27 = vpop.permute.xlu1 %5102  ;;  %v1074_v1 = vmul.f32 %v1058_v12, %v1038_v54  ;;  %v4847_v3 = vpack.c.bf16 %v8353_v9, %v8352_v21  ;;  %v8359_v54 = vld [vmem:[#allocation18_spill] sm:$0xff] }
 0x1da   :  { %v1073_v31 = vmul.f32 %v1054_v24, %v1026_v36  ;;  %v1024_v35 = vsel %vm1023_vm9, %v6404_v4, %v1016_v32  ;;  %v5105_v16 = vunpack.i.h.bf16 %v6594_v27  ;;  %v5104_v23 = vunpack.i.l.bf16 %v6594_v27 }
 0x1db   :  { %2153 = vmatpush2.bf16.msra.mxu1 %v4860_v8  ;;  %v1078_v51 = vmul.f32 %v1058_v12, %v1039_v5  ;;  %v4849_v11 = vpack.c.bf16 %v8355_v56, %v8354_v30  ;;  %v4848_v63 = vpack.c.bf16 %v8357_v22, %v8356_v48  ;;  %v1036_v62 = vsel %vm1023_vm9, %v1016_v32, %v6512_v17 }
 0x1dc   :  { %2071 = vmatpush2.bf16.msra.mxu0 %v4850_v52  ;;  %v4856_v4 = vpack.c.bf16 %v1077_v26, %v1073_v31  ;;  %v834_v60 = vsel %vm823_vm5, %v5099_v47, %v5104_v23  ;;  %v835_v0 = vsel %vm823_vm5, %v5100_v2, %v5105_v16  ;;  %v1065_v10 = vmul.f32 %v1054_v24, %v1024_v35 }
 0x1dd   :  { %2072 = vmatprep.subr.bf16.mxu0 %v4463_v57  ;;  %v6622_v39 = vpop.permute.xlu0 %5107  ;;  %v1018_v45 = vpop.permute.xlu1 %1017  ;;  %v4857_v15 = vpack.c.bf16 %v1078_v51, %v1074_v1  ;;  %v872_v17 = vmul.f32 %v8358_v20, %v834_v60  ;;  %v876_v41 = vmul.f32 %v8358_v20, %v835_v0  ;;  %v1066_v52 = vmul.f32 %v1058_v12, %v1036_v62  ;;  %v8361_v1 = vld [vmem:[#allocation5_spill] sm:$0xff]  ;;  %v8364_v51 = vld [vmem:[#allocation4_spill] sm:$0xff] }
 0x1de   :  { %v5110_v46 = vunpack.i.h.bf16 %v6622_v39  ;;  %v5109_v34 = vunpack.i.l.bf16 %v6622_v39  ;;  %v1025_v57 = vsel %vm1023_vm9, %v6471_v61, %v1018_v45  ;;  %v1037_v8 = vsel %vm1023_vm9, %v1018_v45, %v6538_v58  ;;  %v5191_v61 = vld [vmem:[%s8035_s1 + $0x8] sm:$0xff]  ;;  %v5192_v58 = vld [vmem:[%s8035_s1 + $0x18] sm:$0xff] }
 0x1df   :  { %v1069_v14 = vmul.f32 %v1054_v24, %v1025_v57  ;;  %v1070_v33 = vmul.f32 %v1058_v12, %v1037_v8  ;;  %2154 = vmatprep.subr.bf16.mxu1 %v4857_v15  ;;  %v4843_v7 = vpack.c.bf16 %v876_v41, %v872_v17  ;;  %v4465_v24 = vcombine.high %v5191_v61, %v5192_v58  ;;  %v8367_v8 = vld [vmem:[#allocation57_spill] sm:$0xff] }
 0x1e0   :  { %2073 = vmatpush2.bf16.msra.mxu0 %v4462_v28  ;;  %v838_v25 = vsel %vm823_vm5, %v5109_v34, %v5099_v47  ;;  %v839_v38 = vsel %vm823_vm5, %v5110_v46, %v5100_v2  ;;  %2155 = vmatpush2.bf16.msra.mxu1 %v4856_v4  ;;  %v4464_v5 = vcombine.low %v5191_v61, %v5192_v58  ;;  %v8362_v47 = vunpack.i.h.bf16 %v8361_v1 }
 0x1e1   :  { %2074 = vmatprep.subr.bf16.mxu0 %v4847_v3  ;;  %v871_v12 = vmul.f32 %v6069_v29, %v838_v25  ;;  %v875_v44 = vmul.f32 %v6069_v29, %v839_v38  ;;  %v4852_v28 = vpack.c.bf16 %v1069_v14, %v1065_v10  ;;  %v1448_v18 = vpop.permute.xlu0 %1447  ;;  %v5113_v43 = vpop.permute.xlu1 %5112  ;;  %v4853_v2 = vpack.c.bf16 %v1070_v33, %v1066_v52  ;;  %v8360_v29 = vld [vmem:[#allocation19_spill] sm:$0xff]  ;;  %v8368_v14 = vld [vmem:[#allocation34_spill] sm:$0xff] }
 0x1e2   :  { %v5115_v42 = vunpack.i.h.bf16 %v5113_v43  ;;  %v5114_v36 = vunpack.i.l.bf16 %v5113_v43  ;;  %v1456_v26 = vsel %vm1455_vm0, %v8359_v54, %v1448_v18  ;;  %v1468_v31 = vsel %vm1455_vm0, %v1448_v18, %v8360_v29  ;;  %v5178_v3 = vld [vmem:[%s8038_s3] ss:$12 sps:$4 sm:$0xff]  }
 0x1e3   :  { %2156 = vmatprep.subr.bf16.mxu1 %v4853_v2  ;;  %v4842_v32 = vpack.c.bf16 %v875_v44, %v871_v12  ;;  %v8363_v21 = vunpack.i.l.bf16 %v8361_v1  ;;  %v8365_v62 = vunpack.i.l.bf16 %v8364_v51  ;;  %v8366_v60 = vunpack.i.h.bf16 %v8364_v51  ;;  %v8369_v44 = vld [vmem:[#allocation39_spill] sm:$0xff] }
 0x1e4   :  { %2075 = vmatpush2.bf16.msra.mxu0 %v4846_v6  ;;  %v5193_v6 = vld [vmem:[%s8037_s6 + $0x20] sm:$0xf]  ;;  %v1459_v35 = vsel %vm1455_vm0, %v8362_v47, %v5115_v42  ;;  %2157 = vmatpush2.bf16.msra.mxu1 %v4852_v28 }
 0x1e5   :  { %2076 = vmatprep.subr.bf16.mxu0 %v4843_v7  ;;  %v1486_v49 = vrot.slane %v5193_v6, %v5711_v59  ;;  %v1490_v55 = vrot.slane %v5193_v6, %v5800_v19  ;;  %v1458_v9 = vsel %vm1455_vm0, %v8363_v21, %v5114_v36  ;;  %v1470_v4 = vsel %vm1455_vm0, %v5114_v36, %v8365_v62  ;;  %v5118_v15 = vpop.permute.xlu0 %5117  ;;  %v1450_v20 = vpop.permute.xlu1 %1449  ;;  %v8371_v36 = vld [vmem:[#allocation68_spill] sm:$0xff] }
 0x1e6   :  { %v1471_v0 = vsel %vm1455_vm0, %v5115_v42, %v8366_v60  ;;  %2158 = vmatprep.subr.bf16.mxu1 %v4465_v24  ;;  %v5120_v41 = vunpack.i.h.bf16 %v5118_v15  ;;  %v5119_v57 = vunpack.i.l.bf16 %v5118_v15  ;;  %v1457_v52 = vsel %vm1455_vm0, %v8367_v8, %v1450_v20 }
 0x1e7   :  { %v1509_v10 = vmul.f32 %v1486_v49, %v1459_v35  ;;  %v1505_v45 = vmul.f32 %v1486_v49, %v1458_v9  ;;  %v1506_v17 = vmul.f32 %v1490_v55, %v1470_v4  ;;  %v1469_v33 = vsel %vm1455_vm0, %v1450_v20, %v8368_v14 }
 0x1e8   :  { %2077 = vmatpush2.bf16.msra.mxu0 %v4842_v32  ;;  %v1498_v7 = vmul.f32 %v1490_v55, %v1468_v31  ;;  %v1502_v25 = vmul.f32 %v1490_v55, %v1469_v33  ;;  %v1510_v38 = vmul.f32 %v1490_v55, %v1471_v0  ;;  %v830_v58 = vsel %vm823_vm5, %v5104_v23, %v5119_v57  ;;  %v8372_v31 = vld [vmem:[#allocation15_spill] sm:$0xff] }
 0x1e9   :  { %v4880_v61 = vpack.c.bf16 %v1509_v10, %v1505_v45  ;;  %v831_v24 = vsel %vm823_vm5, %v5105_v16, %v5120_v41  ;;  %2159 = vmatpush2.bf16.msra.mxu1 %v4464_v5  ;;  %v826_v12 = vsel %vm823_vm5, %v5119_v57, %v5109_v34  ;;  %v873_v28 = vmul.f32 %v8369_v44, %v830_v58  ;;  %v5123_v2 = vpop.permute.xlu1 %5122 }
 0x1ea   :  { %v877_v18 = vmul.f32 %v8369_v44, %v831_v24  ;;  %v1501_v43 = vmul.f32 %v1486_v49, %v1457_v52  ;;  %2160 = vmatprep.subr.bf16.mxu1 %v4849_v11  ;;  %v4881_v23 = vpack.c.bf16 %v1510_v38, %v1506_v17  ;;  %v5125_v27 = vunpack.i.h.bf16 %v5123_v2 }
 0x1eb   :  { %2079 = vmatmul.mubr.bf16.vlgmr.msra.gmra.mxu0 %v5178_v3  ;;  %v5124_v6 = vunpack.i.l.bf16 %v5123_v2  ;;  %v4877_v55 = vpack.c.bf16 %v1502_v25, %v1498_v7  ;;  %v827_v16 = vsel %vm823_vm5, %v5120_v41, %v5110_v46  ;;  %v8370_v34 = vmov 0   ;;  %v8375_v46 = vld [vmem:[#allocation16_spill] sm:$0xff] }
 0x1ec   :  { %2207 = vmatprep.mubr.bf16.mxu0 %v8370_v34  ;;  %v1497_v42 = vmul.f32 %v1486_v49, %v1456_v26  ;;  %2185 = vmatprep.subr.bf16.mxu0 %v4881_v23  ;;  %v874_v54 = vmul.f32 %v8371_v36, %v826_v12  ;;  %v878_v29 = vmul.f32 %v8371_v36, %v827_v16  ;;  %v8373_v30 = vunpack.i.h.bf16 %v8372_v31 }
 0x1ed   :  { %v8374_v11 = vunpack.i.l.bf16 %v8372_v31  ;;  %2186 = vmatpush1.bf16.msra.mxu0 %v4880_v61  ;;  %2161 = vmatpush2.bf16.msra.mxu1 %v4848_v63  ;;  %v8376_v49 = vunpack.i.l.bf16 %v8375_v46  ;;  %v8377_v47 = vunpack.i.h.bf16 %v8375_v46  ;;  %v4844_v9 = vpack.c.bf16 %v877_v18, %v873_v28 }
 0x1ee   :  { %v1315_v56 = vsel %vm1311_vm1, %v8373_v30, %v5125_v27  ;;  %2187 = vmatprep.subr.bf16.mxu0 %v4877_v55  ;;  %v4845_v1 = vpack.c.bf16 %v878_v29, %v874_v54  ;;  %v4876_v21 = vpack.c.bf16 %v1501_v43, %v1497_v42  ;;  %v5183_v29 = vld [vmem:[%s8039_s4 + $0x4] ss:$8 sps:$4 sm:$0xff]  }
 0x1ef   :  { %v1314_v39 = vsel %vm1311_vm1, %v8374_v11, %v5124_v6  ;;  %v1326_v26 = vsel %vm1311_vm1, %v5124_v6, %v8376_v49  ;;  %v1365_v32 = vmul.f32 %v6309_v13, %v1315_v56  ;;  %v1327_v35 = vsel %vm1311_vm1, %v5125_v27, %v8377_v47 }
 0x1f0   :  { %v1361_v5 = vmul.f32 %v6309_v13, %v1314_v39  ;;  %v1362_v48 = vmul.f32 %v6333_v37, %v1326_v26  ;;  %v1366_v22 = vmul.f32 %v6333_v37, %v1327_v35  ;;  %2162 = vmatprep.subr.bf16.mxu1 %v4845_v1  ;;  %v8378_v13 = vld [vmem:[#allocation33_spill] sm:$0xff] }
 0x1f1   :  { %2188 = vmatpush1.bf16.msra.mxu0 %v4876_v21  ;;  %2163 = vmatpush2.bf16.msra.mxu1 %v4844_v9 }
 0x1f2   :  { %v4873_v63 = vpack.c.bf16 %v1366_v22, %v1362_v48  ;;  %v4872_v51 = vpack.c.bf16 %v1365_v32, %v1361_v5 }
 0x1f4   :  { %2189 = vmatprep.subr.bf16.mxu0 %v4873_v63  ;;  %2165 = vmatmul.mubr.bf16.vlgmr.msra.gmra.mxu1 %v5178_v3 }
 0x1f5   :  { %2190 = vmatpush1.bf16.msra.mxu0 %v4872_v51  ;;  %4586 = vmatprep.mubr.msk.bf16.mxu1 %vm3161_vm10, %v5183_v29 }
 0x1f8   :  { %4499 = vmatmul.mubr.msk.bf16.vlgmr.msra.gmra.mxu0 %vm2042_vm8, %v8378_v13 }
 0x1f9   :  { %4585 = vmatprep.mubr.msk.bf16.mxu0 %vm3161_vm10, %v5183_v29 }
 0x270   :  { %v2123_v62 = vpop.f32.mrf.mxu1 }
 0x272   :  { %v2125_v4 = vpop.f32.mrf.mxu1 }
 0x274   :  { %v2127_v15 = vpop.f32.mrf.mxu1 }
 0x276   :  { %v2129_v8 = vpop.f32.mrf.mxu1 }
 0x2ab   :  { %v2080_v60 = vpop.f32.mrf.mxu0 }
 0x2ac   :  { %v2124_v0 = vadd.f32 %v2123_v62, %v2080_v60 }
 0x2ad   :  { %v2082_v10 = vpop.f32.mrf.mxu0 }
 0x2ae   :  { %v6731_v45 = vmax.f32 %v2124_v0, 0.0  ;;  %v2126_v41 = vadd.f32 %v2125_v4, %v2082_v10  ;;  %v6935_v10 = vld [vmem:[%s8037_s6 + $0x18] sm:$0xf] }
 0x2af   :  { %v2084_v37 = vpop.f32.mrf.mxu0 }
 0x2b0   :  { %v2128_v20 = vadd.f32 %v2127_v15, %v2084_v37  ;;  %2664 = vrot.lane.b32.xlu0 %v6731_v45, %s5200_s9  ;;  %v6767_v52 = vmax.f32 %v2126_v41, 0.0  ;;  %v8385_v41 = vld [vmem:[#allocation6_spill] sm:$0xff] }
 0x2b1   :  { %v2086_v57 = vpop.f32.mrf.mxu0 }
 0x2b2   :  { %v6735_v17 = vmax.f32 %v2128_v20, 0.0  ;;  %v2130_v14 = vadd.f32 %v2129_v8, %v2086_v57  ;;  %v2697_v57 = vrot.slane %v6935_v10, %v8385_v41  ;;  %v8386_v8 = vld [vmem:[#allocation3_spill] sm:$0xff] }
 0x2b4   :  { %2582 = vrot.lane.b32.xlu0 %v6731_v45, %s5202_s13  ;;  %2666 = vrot.lane.b32.xlu1 %v6735_v17, %s5200_s9  ;;  %v6773_v33 = vmax.f32 %v2130_v14, 0.0  ;;  %v2166_v7 = vpop.f32.mrf.mxu1  ;;  %v2693_v14 = vrot.slane %v6935_v10, %v8386_v8 }
 0x2b6   :  { %v2168_v61 = vpop.f32.mrf.mxu1 }
 0x2b8   :  { %2472 = vrot.lane.b32.xlu0 %v6731_v45, %s5201_s12  ;;  %2584 = vrot.lane.b32.xlu1 %v6735_v17, %s5202_s13  ;;  %v2209_v25 = vpop.f32.mrf.mxu0  ;;  %v2170_v12 = vpop.f32.mrf.mxu1 }
 0x2b9   :  { %v2210_v38 = vadd.f32 %v2209_v25, %v2166_v7 }
 0x2ba   :  { %v2211_v58 = vpop.f32.mrf.mxu0  ;;  %v2172_v2 = vpop.f32.mrf.mxu1 }
 0x2bb   :  { %v6795_v24 = vmax.f32 %v2210_v38, 0.0  ;;  %v2212_v43 = vadd.f32 %v2211_v58, %v2168_v61  ;;  %v6957_v38 = vld [vmem:[%s8037_s6 + $0x14] sm:$0xf] }
 0x2bc   :  { %2390 = vrot.lane.b32.xlu0 %v6731_v45, %s5196_s30  ;;  %2474 = vrot.lane.b32.xlu1 %v6735_v17, %s5201_s12  ;;  %v2213_v44 = vpop.f32.mrf.mxu0  ;;  %v2611_v29 = vrot.slane %v6957_v38, %v8386_v8 }
 0x2bd   :  { %v2214_v28 = vadd.f32 %v2213_v44, %v2170_v12  ;;  %v6831_v27 = vmax.f32 %v2212_v43, 0.0 }
 0x2be   :  { %v2215_v23 = vpop.f32.mrf.mxu0 }
 0x2bf   :  { %v6805_v18 = vmax.f32 %v2214_v28, 0.0  ;;  %v2216_v6 = vadd.f32 %v2215_v23, %v2172_v2  ;;  %v2615_v2 = vrot.slane %v6957_v38, %v8385_v41 }
 0x2c0   :  { %2308 = vrot.lane.b32.xlu0 %v6731_v45, %s5198_s2  ;;  %2392 = vrot.lane.b32.xlu1 %v6735_v17, %s5196_s30 }
 0x2c1   :  { %v6837_v55 = vmax.f32 %v2216_v6, 0.0 }
 0x2c4   :  { %2226 = vrot.lane.b32.xlu0 %v6731_v45, %s5199_s8  ;;  %2310 = vrot.lane.b32.xlu1 %v6735_v17, %s5198_s2 }
 0x2c8   :  { %2828 = vrot.lane.b32.xlu0 %v6731_v45, %s5195_s23  ;;  %2228 = vrot.lane.b32.xlu1 %v6735_v17, %s5199_s8 }
 0x2cc   :  { %2746 = vrot.lane.b32.xlu0 %v6731_v45, %s5197_s0  ;;  %2830 = vrot.lane.b32.xlu1 %v6735_v17, %s5195_s23 }
 0x2d0   :  { %2668 = vrot.lane.b32.xlu0 %v6767_v52, %s5200_s9  ;;  %2748 = vrot.lane.b32.xlu1 %v6735_v17, %s5197_s0 }
 0x2d4   :  { %2586 = vrot.lane.b32.xlu0 %v6767_v52, %s5202_s13  ;;  %2670 = vrot.lane.b32.xlu1 %v6773_v33, %s5200_s9 }
 0x2d8   :  { %2476 = vrot.lane.b32.xlu0 %v6767_v52, %s5201_s12  ;;  %2588 = vrot.lane.b32.xlu1 %v6773_v33, %s5202_s13 }
 0x2dc   :  { %2394 = vrot.lane.b32.xlu0 %v6767_v52, %s5196_s30  ;;  %2478 = vrot.lane.b32.xlu1 %v6773_v33, %s5201_s12 }
 0x2e0   :  { %2312 = vrot.lane.b32.xlu0 %v6767_v52, %s5198_s2  ;;  %2396 = vrot.lane.b32.xlu1 %v6773_v33, %s5196_s30 }
 0x2e4   :  { %2230 = vrot.lane.b32.xlu0 %v6767_v52, %s5199_s8  ;;  %2314 = vrot.lane.b32.xlu1 %v6773_v33, %s5198_s2 }
 0x2e8   :  { %2832 = vrot.lane.b32.xlu0 %v6767_v52, %s5195_s23  ;;  %2232 = vrot.lane.b32.xlu1 %v6773_v33, %s5199_s8 }
 0x2ec   :  { %2672 = vrot.lane.b32.xlu0 %v6795_v24, %s5200_s9  ;;  %2834 = vrot.lane.b32.xlu1 %v6773_v33, %s5195_s23 }
 0x2f0   :  { %2590 = vrot.lane.b32.xlu0 %v6795_v24, %s5202_s13  ;;  %2674 = vrot.lane.b32.xlu1 %v6805_v18, %s5200_s9 }
 0x2f4   :  { %2480 = vrot.lane.b32.xlu0 %v6795_v24, %s5201_s12  ;;  %2592 = vrot.lane.b32.xlu1 %v6805_v18, %s5202_s13 }
 0x2f8   :  { %2398 = vrot.lane.b32.xlu0 %v6795_v24, %s5196_s30  ;;  %2482 = vrot.lane.b32.xlu1 %v6805_v18, %s5201_s12 }
 0x2fc   :  { %2316 = vrot.lane.b32.xlu0 %v6795_v24, %s5198_s2  ;;  %2400 = vrot.lane.b32.xlu1 %v6805_v18, %s5196_s30 }
 0x300   :  { %2234 = vrot.lane.b32.xlu0 %v6795_v24, %s5199_s8  ;;  %2318 = vrot.lane.b32.xlu1 %v6805_v18, %s5198_s2 }
 0x304   :  { %2836 = vrot.lane.b32.xlu0 %v6795_v24, %s5195_s23  ;;  %2236 = vrot.lane.b32.xlu1 %v6805_v18, %s5199_s8 }
 0x308   :  { %2676 = vrot.lane.b32.xlu0 %v6831_v27, %s5200_s9  ;;  %2838 = vrot.lane.b32.xlu1 %v6805_v18, %s5195_s23 }
 0x30c   :  { %2594 = vrot.lane.b32.xlu0 %v6831_v27, %s5202_s13  ;;  %2678 = vrot.lane.b32.xlu1 %v6837_v55, %s5200_s9 }
 0x310   :  { %2750 = vrot.lane.b32.xlu0 %v6767_v52, %s5197_s0  ;;  %2596 = vrot.lane.b32.xlu1 %v6837_v55, %s5202_s13 }
 0x314   :  { %2484 = vrot.lane.b32.xlu0 %v6831_v27, %s5201_s12  ;;  %2752 = vrot.lane.b32.xlu1 %v6773_v33, %s5197_s0 }
 0x318   :  { %2402 = vrot.lane.b32.xlu0 %v6831_v27, %s5196_s30  ;;  %2486 = vrot.lane.b32.xlu1 %v6837_v55, %s5201_s12 }
 0x31c   :  { %2320 = vrot.lane.b32.xlu0 %v6831_v27, %s5198_s2  ;;  %2404 = vrot.lane.b32.xlu1 %v6837_v55, %s5196_s30 }
 0x320   :  { %2238 = vrot.lane.b32.xlu0 %v6831_v27, %s5199_s8  ;;  %2322 = vrot.lane.b32.xlu1 %v6837_v55, %s5198_s2 }
 0x322   :  { %v6863_v16 = vpop.permute.xlu0 %2664 }
 0x324   :  { %2840 = vrot.lane.b32.xlu0 %v6831_v27, %s5195_s23  ;;  %2240 = vrot.lane.b32.xlu1 %v6837_v55, %s5199_s8 }
 0x326   :  { %v6869_v34 = vpop.permute.xlu0 %2582  ;;  %v6871_v42 = vpop.permute.xlu1 %2666 }
 0x328   :  { %2754 = vrot.lane.b32.xlu0 %v6795_v24, %s5197_s0  ;;  %2756 = vrot.lane.b32.xlu1 %v6805_v18, %s5197_s0 }
 0x32a   :  { %v6877_v36 = vpop.permute.xlu0 %2472  ;;  %v6879_v54 = vpop.permute.xlu1 %2584 }
 0x32c   :  { %2758 = vrot.lane.b32.xlu0 %v6831_v27, %s5197_s0  ;;  %2842 = vrot.lane.b32.xlu1 %v6837_v55, %s5195_s23 }
 0x32e   :  { %v6890_v31 = vpop.permute.xlu0 %2390  ;;  %v6892_v30 = vpop.permute.xlu1 %2474 }
 0x330   :  { %2760 = vrot.lane.b32.xlu1 %v6837_v55, %s5197_s0 }
 0x332   :  { %v6896_v56 = vpop.permute.xlu0 %2308  ;;  %v6898_v11 = vpop.permute.xlu1 %2392 }
 0x336   :  { %v6900_v39 = vpop.permute.xlu0 %2226  ;;  %v6902_v46 = vpop.permute.xlu1 %2310 }
 0x33a   :  { %v6904_v49 = vpop.permute.xlu0 %2828  ;;  %v6906_v26 = vpop.permute.xlu1 %2228 }
 0x33b   :  { %8379 = vst [vmem:[#allocation22_spill] sm:$0xff] %v6904_v49 }
 0x33e   :  { %v6908_v32 = vpop.permute.xlu0 %2746  ;;  %v6910_v5 = vpop.permute.xlu1 %2830 }
 0x33f   :  { %8380 = vst [vmem:[#allocation29_spill] sm:$0xff] %v6908_v32  ;;  %8381 = vst [vmem:[#allocation46_spill] sm:$0xff] %v6910_v5  ;;  %v2705_v32 = vrot.slane %v6935_v10, %v5800_v19 }
 0x342   :  { %v2669_v1 = vpop.permute.xlu0 %2668  ;;  %v6912_v47 = vpop.permute.xlu1 %2748 }
 0x343   :  { %8382 = vst [vmem:[#allocation38_spill] sm:$0xff] %v6912_v47  ;;  %v2684_v25 = vsel %vm1167_vm6, %v6863_v16, %v2669_v1 }
 0x344   :  { %v2710_v6 = vmul.f32 %v2693_v14, %v2684_v25 }
 0x346   :  { %v2587_v35 = vpop.permute.xlu0 %2586  ;;  %v2671_v21 = vpop.permute.xlu1 %2670 }
 0x347   :  { %v2685_v20 = vsel %vm1167_vm6, %v6871_v42, %v2671_v21 }
 0x348   :  { %v2714_v12 = vmul.f32 %v2693_v14, %v2685_v20 }
 0x34a   :  { %v6914_v9 = vpop.permute.xlu0 %2476  ;;  %v2589_v48 = vpop.permute.xlu1 %2588  ;;  %v4906_v40 = vpack.c.bf16 %v2714_v12, %v2710_v6 }
 0x34b   :  { %v2603_v28 = vsel %vm1023_vm9, %v6879_v54, %v2589_v48 }
 0x34c   :  { %v2632_v14 = vmul.f32 %v2611_v29, %v2603_v28 }
 0x34e   :  { %v6916_v22 = vpop.permute.xlu0 %2394  ;;  %v6918_v63 = vpop.permute.xlu1 %2478 }
 0x352   :  { %v6920_v51 = vpop.permute.xlu0 %2312  ;;  %v6922_v13 = vpop.permute.xlu1 %2396 }
 0x356   :  { %v6924_v62 = vpop.permute.xlu0 %2230  ;;  %v6926_v4 = vpop.permute.xlu1 %2314 }
 0x35a   :  { %v6928_v60 = vpop.permute.xlu0 %2832  ;;  %v6930_v0 = vpop.permute.xlu1 %2232 }
 0x35b   :  { %8383 = vst [vmem:[#allocation59_spill] sm:$0xff] %v6928_v60 }
 0x35e   :  { %v6937_v15 = vpop.permute.xlu0 %2672  ;;  %v6939_v37 = vpop.permute.xlu1 %2834 }
 0x35f   :  { %8384 = vst [vmem:[#allocation58_spill] sm:$0xff] %v6939_v37  ;;  %v2682_v7 = vsel %vm1167_vm6, %v2669_v1, %v6937_v15 }
 0x360   :  { %v2711_v43 = vmul.f32 %v2697_v57, %v2682_v7 }
 0x362   :  { %v6959_v61 = vpop.permute.xlu0 %2590  ;;  %v6961_v58 = vpop.permute.xlu1 %2674 }
 0x363   :  { %v2683_v44 = vsel %vm1167_vm6, %v2671_v21, %v6961_v58  ;;  %v2600_v1 = vsel %vm1023_vm9, %v2587_v35, %v6959_v61  ;;  %v2602_v21 = vsel %vm1023_vm9, %v6869_v34, %v2587_v35 }
 0x364   :  { %v2715_v23 = vmul.f32 %v2697_v57, %v2683_v44  ;;  %v6986_v57 = vld [vmem:[%s8037_s6 + $0xc] sm:$0xf]  ;;  %v2629_v44 = vmul.f32 %v2615_v2, %v2600_v1  ;;  %v2628_v35 = vmul.f32 %v2611_v29, %v2602_v21  ;;  %v4899_v1 = vpack.c.bf16 %v6773_v33, %v6767_v52  ;;  %v4509_v33 = vld [vmem:[%s8037_s6 + $0x8] sm:$0xf] }
 0x365   :  { %v2505_v12 = vrot.slane %v6986_v57, %v8385_v41  ;;  %v7071_v50 = vrot.slane %v4509_v33, %v5711_v59 }
 0x366   :  { %v6979_v20 = vpop.permute.xlu0 %2480  ;;  %v6981_v3 = vpop.permute.xlu1 %2592  ;;  %v4907_v7 = vpack.c.bf16 %v2715_v23, %v2711_v43  ;;  %v2493_v43 = vsel %vm823_vm5, %v6892_v30, %v6918_v63 }
 0x367   :  { %v2601_v25 = vsel %vm1023_vm9, %v2589_v48, %v6981_v3  ;;  %v2492_v48 = vsel %vm823_vm5, %v6877_v36, %v6914_v9  ;;  %v2523_v29 = vmul.f32 %v2505_v12, %v2493_v43  ;;  %v7028_v43 = vld [vmem:[%s8037_s6 + $0x4] sm:$0xf] }
 0x368   :  { %v2633_v47 = vmul.f32 %v2615_v2, %v2601_v25  ;;  %3165 = vmatprep.subr.bf16.mxu0 %v4907_v7  ;;  %v4902_v2 = vpack.c.bf16 %v2632_v14, %v2628_v35  ;;  %v7081_v5 = vrot.slane %v7028_v43, %v5711_v59 }
 0x369   :  { %3166 = vmatpush1.bf16.msra.mxu0 %v4906_v40  ;;  %v2519_v40 = vmul.f32 %v2505_v12, %v2492_v48  ;;  %v2423_v48 = vrot.slane %v4509_v33, %v8385_v41 }
 0x36a   :  { %v6997_v23 = vpop.permute.xlu0 %2398  ;;  %v6999_v28 = vpop.permute.xlu1 %2482  ;;  %v4903_v6 = vpack.c.bf16 %v2633_v47, %v2629_v44  ;;  %v8387_v47 = vpack.c.bf16 %v6735_v17, %v6731_v45  ;;  %v7033_v45 = vld [vmem:[%s8037_s6] sm:$0xf]  ;;  %8393 = vst [vmem:[#allocation43_spill] sm:$0xff] %v7081_v5  ;;  %v2501_v5 = vrot.slane %v6986_v57, %v8386_v8 }
 0x36b   :  { %v4895_v25 = vpack.c.bf16 %v2523_v29, %v2519_v40  ;;  %v7038_v17 = vld [vmem:[%s8037_s6 + $0x20] sm:$0xf]  ;;  %v7051_v40 = vrot.slane %v7033_v45, %v8385_v41  ;;  %v7064_v29 = vld [vmem:[%s8037_s6 + $0x1c] sm:$0xf]  ;;  %v7085_v49 = vrot.slane %v7033_v45, %v5711_v59 }
 0x36c   :  { %3167 = vmatprep.subr.bf16.mxu0 %v4903_v6  ;;  %v7089_v37 = vrot.slane %v7038_v17, %v8385_v41 }
 0x36d   :  { %3168 = vmatpush1.bf16.msra.mxu0 %v4902_v2  ;;  %v2341_v2 = vrot.slane %v7028_v43, %v8385_v41  ;;  %8394 = vst [vmem:[#allocation50_spill] sm:$0xff] %v7085_v49  ;;  %v7103_v41 = vrot.slane %v7064_v29, %v8386_v8 }
 0x36e   :  { %v7007_v21 = vpop.permute.xlu0 %2316  ;;  %v7009_v7 = vpop.permute.xlu1 %2400  ;;  %3169 = vmatprep.subr.bf16.mxu0 %v4899_v1  ;;  %v7068_v1 = vrot.slane %v6986_v57, %v5711_v59  ;;  %8395 = vst [vmem:[#allocation54_spill] sm:$0xff] %v7089_v37 }
 0x36f   :  { %8396 = vst [vmem:[#allocation53_spill] sm:$0xff] %v7103_v41 }
 0x371   :  { %3170 = vmatpush1.bf16.msra.mxu0 %v8387_v47  ;;  %v2701_v47 = vrot.slane %v6935_v10, %v5711_v59 }
 0x372   :  { %v7014_v44 = vpop.permute.xlu0 %2234  ;;  %v7016_v14 = vpop.permute.xlu1 %2318  ;;  %3171 = vmatprep.subr.bf16.mxu0 %v4895_v25  ;;  %v7055_v25 = vrot.slane %v7038_v17, %v8386_v8 }
 0x373   :  { %8388 = vst [vmem:[#allocation60_spill] sm:$0xff] %v7014_v44 }
 0x374   :  { %8392 = vst [vmem:[#allocation37_spill] sm:$0xff] %v7055_v25 }
 0x376   :  { %v7018_v35 = vpop.permute.xlu0 %2836  ;;  %v7020_v52 = vpop.permute.xlu1 %2236 }
 0x377   :  { %8389 = vst [vmem:[#allocation55_spill] sm:$0xff] %v7018_v35  ;;  %8390 = vst [vmem:[#allocation25_spill] sm:$0xff] %v7020_v52 }
 0x37a   :  { %v2677_v12 = vpop.permute.xlu0 %2676  ;;  %v7040_v6 = vpop.permute.xlu1 %2838 }
 0x37b   :  { %8391 = vst [vmem:[#allocation45_spill] sm:$0xff] %v7040_v6  ;;  %v2680_v25 = vsel %vm1167_vm6, %v6937_v15, %v2677_v12  ;;  %v2686_v10 = vsel %vm1167_vm6, %v2677_v12, %v6863_v16  ;;  %v2619_v6 = vrot.slane %v6957_v38, %v5711_v59  ;;  %v2623_v16 = vrot.slane %v6957_v38, %v5800_v19 }
 0x37c   :  { %v2712_v37 = vmul.f32 %v2701_v47, %v2680_v25  ;;  %v2713_v35 = vmul.f32 %v2705_v32, %v2686_v10 }
 0x37e   :  { %v2595_v15 = vpop.permute.xlu0 %2594  ;;  %v2679_v60 = vpop.permute.xlu1 %2678 }
 0x37f   :  { %v2681_v12 = vsel %vm1167_vm6, %v6961_v58, %v2679_v60  ;;  %v2687_v49 = vsel %vm1167_vm6, %v2679_v60, %v6871_v42  ;;  %v2598_v38 = vsel %vm1023_vm9, %v6959_v61, %v2595_v15  ;;  %v2604_v58 = vsel %vm1023_vm9, %v2595_v15, %v6869_v34 }
 0x380   :  { %v2716_v44 = vmul.f32 %v2701_v47, %v2681_v12  ;;  %v2717_v52 = vmul.f32 %v2705_v32, %v2687_v49  ;;  %v2513_v42 = vrot.slane %v6986_v57, %v5800_v19  ;;  %v2411_v60 = vsel %vm679_vm2, %v6898_v11, %v6922_v13 }
 0x381   :  { %v7122_v47 = vrot.slane %v4509_v33, %v8386_v8  ;;  %v2329_v34 = vsel %vm535_vm3, %v6902_v46, %v6926_v4  ;;  %v2410_v12 = vsel %vm679_vm2, %v6890_v31, %v6916_v22  ;;  %v2441_v41 = vmul.f32 %v2423_v48, %v2411_v60 }
 0x382   :  { %v4908_v49 = vpack.c.bf16 %v2716_v44, %v2712_v37  ;;  %v7119_v32 = vpop.permute.xlu0 %2750  ;;  %v2597_v25 = vpop.permute.xlu1 %2596  ;;  %v4909_v61 = vpack.c.bf16 %v2717_v52, %v2713_v35  ;;  %v7135_v44 = vrot.slane %v4509_v33, %v5800_v19  ;;  %v2630_v35 = vmul.f32 %v2619_v6, %v2598_v38 }
 0x383   :  { %v2599_v57 = vsel %vm1023_vm9, %v6981_v3, %v2597_v25  ;;  %v2605_v37 = vsel %vm1023_vm9, %v2597_v25, %v6879_v54  ;;  %v2631_v52 = vmul.f32 %v2623_v16, %v2604_v58  ;;  %v2328_v3 = vsel %vm535_vm3, %v6896_v56, %v6920_v51 }
 0x384   :  { %v2634_v10 = vmul.f32 %v2619_v6, %v2599_v57  ;;  %v2635_v15 = vmul.f32 %v2623_v16, %v2605_v37  ;;  %3208 = vmatprep.subr.bf16.mxu1 %v4909_v61  ;;  %v7147_v54 = vrot.slane %v7028_v43, %v8386_v8  ;;  %v7149_v33 = vmul.f32 %v2341_v2, %v2329_v34 }
 0x385   :  { %3209 = vmatpush1.bf16.msra.mxu1 %v4908_v49  ;;  %v2247_v6 = vsel %vm392_vm4, %v6906_v26, %v6930_v0  ;;  %v2246_v60 = vsel %vm392_vm4, %v6900_v39, %v6924_v62  ;;  %v2491_v49 = vsel %vm823_vm5, %v6918_v63, %v6999_v28  ;;  %v7167_v61 = vrot.slane %v7028_v43, %v5800_v19 }
 0x386   :  { %v4904_v16 = vpack.c.bf16 %v2634_v10, %v2630_v35  ;;  %v2485_v38 = vpop.permute.xlu0 %2484  ;;  %v7155_v58 = vpop.permute.xlu1 %2752  ;;  %v4905_v25 = vpack.c.bf16 %v2635_v15, %v2631_v52  ;;  %v7171_v34 = vrot.slane %v7033_v45, %v8386_v8  ;;  %v2437_v57 = vmul.f32 %v2423_v48, %v2410_v12 }
 0x387   :  { %v7173_v37 = vmul.f32 %v2341_v2, %v2328_v3  ;;  %v2490_v35 = vsel %vm823_vm5, %v6914_v9, %v6979_v20  ;;  %v7181_v63 = vrot.slane %v7033_v45, %v5800_v19  ;;  %v7184_v43 = vmul.f32 %v7051_v40, %v2247_v6 }
 0x388   :  { %3210 = vmatprep.subr.bf16.mxu1 %v4905_v25  ;;  %v2488_v52 = vsel %vm823_vm5, %v6979_v20, %v2485_v38  ;;  %v2494_v48 = vsel %vm823_vm5, %v2485_v38, %v6877_v36  ;;  %v7194_v9 = vrot.slane %v7038_v17, %v5711_v59  ;;  %v7197_v2 = vmul.f32 %v7051_v40, %v2246_v60 }
 0x389   :  { %3211 = vmatpush1.bf16.msra.mxu1 %v4904_v16  ;;  %v2524_v45 = vmul.f32 %v7068_v1, %v2491_v49  ;;  %v8397_v15 = vpack.c.bf16 %v6837_v55, %v6831_v27  ;;  %v4891_v12 = vpack.c.bf16 %v2441_v41, %v2437_v57  ;;  %v4887_v36 = vpack.c.bf16 %v7149_v33, %v7173_v37 }
 0x38a   :  { %v2403_v10 = vpop.permute.xlu0 %2402  ;;  %v2487_v20 = vpop.permute.xlu1 %2486  ;;  %v2520_v3 = vmul.f32 %v7068_v1, %v2490_v35  ;;  %v2409_v40 = vsel %vm679_vm2, %v6922_v13, %v7009_v7  ;;  %v2518_v55 = vmul.f32 %v2501_v5, %v2494_v48  ;;  %v2521_v41 = vmul.f32 %v2513_v42, %v2488_v52 }
 0x38b   :  { %3212 = vmatprep.subr.bf16.mxu1 %v8397_v15  ;;  %v2489_v6 = vsel %vm823_vm5, %v6999_v28, %v2487_v20  ;;  %v2495_v27 = vsel %vm823_vm5, %v2487_v20, %v6892_v30  ;;  %v2408_v1 = vsel %vm679_vm2, %v6916_v22, %v6997_v23  ;;  %v2406_v13 = vsel %vm679_vm2, %v6997_v23, %v2403_v10 }
 0x38c   :  { %v2522_v16 = vmul.f32 %v2501_v5, %v2495_v27  ;;  %v2525_v38 = vmul.f32 %v2513_v42, %v2489_v6  ;;  %v2412_v28 = vsel %vm679_vm2, %v2403_v10, %v6890_v31  ;;  %v8398_v30 = vpack.c.bf16 %v6805_v18, %v6795_v24  ;;  %v8400_v10 = vld [vmem:[#allocation25_spill] sm:$0xff]  ;;  %v8401_v6 = vld [vmem:[#allocation60_spill] sm:$0xff] }
 0x38d   :  { %v4883_v5 = vpack.c.bf16 %v7184_v43, %v7197_v2  ;;  %v4896_v42 = vpack.c.bf16 %v2524_v45, %v2520_v3  ;;  %v2326_v22 = vsel %vm535_vm3, %v6920_v51, %v7007_v21  ;;  %v2442_v49 = vmul.f32 %v7071_v50, %v2409_v40 }
 0x38e   :  { %3213 = vmatpush1.bf16.msra.mxu1 %v8398_v30  ;;  %v4894_v33 = vpack.c.bf16 %v2522_v16, %v2518_v55  ;;  %v2321_v25 = vpop.permute.xlu0 %2320  ;;  %v2405_v23 = vpop.permute.xlu1 %2404  ;;  %v4897_v60 = vpack.c.bf16 %v2525_v38, %v2521_v41  ;;  %v2327_v24 = vsel %vm535_vm3, %v6926_v4, %v7016_v14  ;;  %v2436_v51 = vmul.f32 %v7122_v47, %v2412_v28  ;;  %v8403_v55 = vld [vmem:[#allocation59_spill] sm:$0xff]  ;;  %v8405_v28 = vld [vmem:[#allocation45_spill] sm:$0xff]  ;;  %v8406_v30 = vld [vmem:[#allocation58_spill] sm:$0xff] }
 0x38f   :  { %v2407_v18 = vsel %vm679_vm2, %v7009_v7, %v2405_v23  ;;  %v2413_v31 = vsel %vm679_vm2, %v2405_v23, %v6898_v11  ;;  %v2439_v57 = vmul.f32 %v7135_v44, %v2406_v13  ;;  %v2438_v43 = vmul.f32 %v7071_v50, %v2408_v1  ;;  %v8399_v11 = vld [vmem:[#allocation43_spill] sm:$0xff]  ;;  %v8404_v1 = vld [vmem:[#allocation50_spill] sm:$0xff] }
 0x390   :  { %v2440_v37 = vmul.f32 %v7122_v47, %v2413_v31  ;;  %v2443_v35 = vmul.f32 %v7135_v44, %v2407_v18  ;;  %3172 = vmatpush1.bf16.msra.mxu0 %v4894_v33  ;;  %v2324_v4 = vsel %vm535_vm3, %v7007_v21, %v2321_v25  ;;  %v2330_v7 = vsel %vm535_vm3, %v2321_v25, %v6896_v56  ;;  %v8409_v31 = vld [vmem:[#allocation54_spill] sm:$0xff] }
 0x391   :  { %3214 = vmatprep.subr.bf16.mxu1 %v4897_v60  ;;  %3173 = vmatprep.subr.bf16.mxu0 %v4891_v12  ;;  %v2356_v52 = vmul.f32 %v8399_v11, %v2326_v22  ;;  %v2360_v48 = vmul.f32 %v8399_v11, %v2327_v24  ;;  %v4892_v50 = vpack.c.bf16 %v2442_v49, %v2438_v43  ;;  %v8407_v60 = vld [vmem:[#allocation22_spill] sm:$0xff] }
 0x392   :  { %v4890_v47 = vpack.c.bf16 %v2440_v37, %v2436_v51  ;;  %3215 = vmatpush1.bf16.msra.mxu1 %v4896_v42  ;;  %v2239_v44 = vpop.permute.xlu0 %2238  ;;  %v2323_v2 = vpop.permute.xlu1 %2322  ;;  %v4893_v45 = vpack.c.bf16 %v2443_v35, %v2439_v57  ;;  %v2245_v21 = vsel %vm392_vm4, %v6930_v0, %v8400_v10  ;;  %v2354_v20 = vmul.f32 %v7147_v54, %v2330_v7  ;;  %v8408_v24 = vld [vmem:[#allocation46_spill] sm:$0xff] }
 0x393   :  { %v2325_v56 = vsel %vm535_vm3, %v7016_v14, %v2323_v2  ;;  %v2331_v15 = vsel %vm535_vm3, %v2323_v2, %v6902_v46  ;;  %v2357_v12 = vmul.f32 %v7167_v61, %v2324_v4  ;;  %v2244_v0 = vsel %vm392_vm4, %v6924_v62, %v8401_v6  ;;  %v8410_v7 = vld [vmem:[#allocation6_spill] sm:$0xff] }
 0x394   :  { %v2358_v3 = vmul.f32 %v7147_v54, %v2331_v15  ;;  %v2361_v40 = vmul.f32 %v7167_v61, %v2325_v56  ;;  %3174 = vmatpush1.bf16.msra.mxu0 %v4890_v47  ;;  %v2242_v14 = vsel %vm392_vm4, %v8401_v6, %v2239_v44  ;;  %v2248_v46 = vsel %vm392_vm4, %v2239_v44, %v6900_v39  ;;  %v8402_v54 = vld [vmem:[#allocation55_spill] sm:$0xff]  ;;  %v8411_v47 = vld [vmem:[#allocation37_spill] sm:$0xff]  ;;  %v8414_v15 = vld [vmem:[#allocation38_spill] sm:$0xff] }
 0x395   :  { %3216 = vmatprep.subr.bf16.mxu1 %v4893_v45  ;;  %3175 = vmatprep.subr.bf16.mxu0 %v4887_v36  ;;  %v4888_v27 = vpack.c.bf16 %v2360_v48, %v2356_v52  ;;  %v2846_v61 = vsel %vm1455_vm0, %v8403_v55, %v8402_v54  ;;  %v2278_v13 = vmul.f32 %v8404_v1, %v2245_v21  ;;  %v8413_v21 = vld [vmem:[#allocation29_spill] sm:$0xff] }
 0x396   :  { %v4886_v41 = vpack.c.bf16 %v2358_v3, %v2354_v20  ;;  %3217 = vmatpush1.bf16.msra.mxu1 %v4892_v50  ;;  %v2841_v16 = vpop.permute.xlu0 %2840  ;;  %v2241_v62 = vpop.permute.xlu1 %2240  ;;  %v4889_v38 = vpack.c.bf16 %v2361_v40, %v2357_v12  ;;  %v2847_v39 = vsel %vm1455_vm0, %v8406_v30, %v8405_v28  ;;  %v2272_v22 = vmul.f32 %v7171_v34, %v2248_v46 }
 0x397   :  { %v2243_v36 = vsel %vm392_vm4, %v8400_v10, %v2241_v62  ;;  %v2249_v42 = vsel %vm392_vm4, %v2241_v62, %v6906_v26  ;;  %v2275_v33 = vmul.f32 %v7181_v63, %v2242_v14  ;;  %v2848_v49 = vsel %vm1455_vm0, %v8407_v60, %v8403_v55  ;;  %v8412_v10 = vld [vmem:[#allocation36_spill] sm:$0xff] }
 0x398   :  { %v2276_v25 = vmul.f32 %v7171_v34, %v2249_v42  ;;  %v2279_v23 = vmul.f32 %v7181_v63, %v2243_v36  ;;  %3176 = vmatpush1.bf16.msra.mxu0 %v4886_v41  ;;  %v2849_v18 = vsel %vm1455_vm0, %v8408_v24, %v8406_v30  ;;  %v2869_v26 = vrot.slane %v7038_v17, %v5800_v19  ;;  %v8415_v55 = vld [vmem:[#allocation20_spill] sm:$0xff] }
 0x399   :  { %3218 = vmatprep.subr.bf16.mxu1 %v4889_v38  ;;  %3177 = vmatprep.subr.bf16.mxu0 %v4883_v5  ;;  %v2274_v34 = vmul.f32 %v8404_v1, %v2244_v0  ;;  %v2879_v63 = vmul.f32 %v8409_v31, %v2847_v39  ;;  %v2875_v43 = vmul.f32 %v8409_v31, %v2846_v61 }
 0x39a   :  { %v4882_v51 = vpack.c.bf16 %v2276_v25, %v2272_v22  ;;  %3219 = vmatpush1.bf16.msra.mxu1 %v4888_v27  ;;  %v2755_v57 = vpop.permute.xlu0 %2754  ;;  %v2757_v37 = vpop.permute.xlu1 %2756  ;;  %v4885_v35 = vpack.c.bf16 %v2279_v23, %v2275_v33  ;;  %v2844_v4 = vsel %vm1455_vm0, %v8402_v54, %v2841_v16  ;;  %v2779_v17 = vrot.slane %v7064_v29, %v8410_v7 }
 0x39b   :  { %v2783_v5 = vrot.slane %v7064_v29, %v5711_v59  ;;  %v4884_v11 = vpack.c.bf16 %v2278_v13, %v2274_v34  ;;  %v2764_v52 = vsel %vm1311_vm1, %v7119_v32, %v2755_v57  ;;  %v2765_v48 = vsel %vm1311_vm1, %v7155_v58, %v2757_v37 }
 0x39c   :  { %3178 = vmatpush1.bf16.msra.mxu0 %v4882_v51  ;;  %3220 = vmatprep.subr.bf16.mxu1 %v4885_v35  ;;  %v2874_v44 = vmul.f32 %v8411_v47, %v2848_v49  ;;  %v2878_v2 = vmul.f32 %v8411_v47, %v2849_v18  ;;  %v2850_v45 = vsel %vm1455_vm0, %v2841_v16, %v8407_v60  ;;  %v8416_v16 = vld [vmem:[#allocation53_spill] sm:$0xff]  ;;  %v5185_v49 = vld [vmem:[%s8039_s4] ss:$8 sps:$4 sm:$0xff]  }
 0x39d   :  { %v2787_v50 = vrot.slane %v7064_v29, %v5800_v19  ;;  %3179 = vmatprep.subr.bf16.mxu0 %v8412_v10  ;;  %v2766_v56 = vsel %vm1311_vm1, %v8413_v21, %v7119_v32  ;;  %v2767_v20 = vsel %vm1311_vm1, %v8414_v15, %v7155_v58  ;;  %v2876_v12 = vmul.f32 %v7194_v9, %v2844_v4 }
 0x39e   :  { %3221 = vmatpush1.bf16.msra.mxu1 %v4884_v11  ;;  %v2759_v3 = vpop.permute.xlu0 %2758  ;;  %v2843_v40 = vpop.permute.xlu1 %2842  ;;  %v4915_v6 = vpack.c.bf16 %v2879_v63, %v2875_v43  ;;  %v2793_v0 = vmul.f32 %v2779_v17, %v2764_v52  ;;  %v2797_v29 = vmul.f32 %v2779_v17, %v2765_v48  ;;  %v2877_v46 = vmul.f32 %v2869_v26, %v2850_v45 }
 0x39f   :  { %v2845_v14 = vsel %vm1455_vm0, %v8405_v28, %v2843_v40  ;;  %v2851_v32 = vsel %vm1455_vm0, %v2843_v40, %v8408_v24  ;;  %3222 = vmatprep.subr.bf16.mxu1 %v8412_v10  ;;  %v2762_v58 = vsel %vm1311_vm1, %v2755_v57, %v2759_v3  ;;  %v4914_v61 = vpack.c.bf16 %v2878_v2, %v2874_v44 }
 0x3a0   :  { %v2880_v27 = vmul.f32 %v7194_v9, %v2845_v14  ;;  %v2881_v54 = vmul.f32 %v2869_v26, %v2851_v32  ;;  %3180 = vmatpush1.bf16.msra.mxu0 %v8415_v55  ;;  %v2768_v41 = vsel %vm1311_vm1, %v2759_v3, %v8413_v21  ;;  %v2792_v62 = vmul.f32 %v8416_v16, %v2766_v56  ;;  %v5186_v21 = vld [vmem:[%s8040_s5 + $0x4] ss:$8 sps:$4 sm:$0xff]  }
 0x3a1   :  { %3193 = vmatprep.subr.bf16.mxu0 %v4915_v6  ;;  %v2796_v38 = vmul.f32 %v8416_v16, %v2767_v20  ;;  %v2794_v30 = vmul.f32 %v2783_v5, %v2762_v58  ;;  %v4911_v36 = vpack.c.bf16 %v2797_v29, %v2793_v0  ;;  %v2795_v42 = vmul.f32 %v2787_v50, %v2768_v41  ;;  %v7556_v58 = vld [vmem:[%s8037_s6 + $0x18] sm:$0xf] }
 0x3a2   :  { %v4916_v1 = vpack.c.bf16 %v2880_v27, %v2876_v12  ;;  %3223 = vmatpush1.bf16.msra.mxu1 %v8415_v55  ;;  %v2761_v13 = vpop.permute.xlu1 %2760  ;;  %v4917_v28 = vpack.c.bf16 %v2881_v54, %v2877_v46  ;;  %v3726_v16 = vrot.slane %v7556_v58, %v8386_v8 }
 0x3a3   :  { %v2763_v9 = vsel %vm1311_vm1, %v2757_v37, %v2761_v13  ;;  %v2769_v39 = vsel %vm1311_vm1, %v2761_v13, %v8414_v15  ;;  %v4910_v25 = vpack.c.bf16 %v2796_v38, %v2792_v62 }
 0x3a4   :  { %v2798_v22 = vmul.f32 %v2783_v5, %v2763_v9  ;;  %v2799_v33 = vmul.f32 %v2787_v50, %v2769_v39  ;;  %3194 = vmatpush2.bf16.msra.mxu0 %v4914_v61  ;;  %3236 = vmatprep.subr.bf16.mxu1 %v4917_v28  ;;  %v3730_v61 = vrot.slane %v7556_v58, %v8410_v7 }
 0x3a5   :  { %3195 = vmatprep.subr.bf16.mxu0 %v4911_v36 }
 0x3a6   :  { %v4912_v23 = vpack.c.bf16 %v2798_v22, %v2794_v30  ;;  %3237 = vmatpush2.bf16.msra.mxu1 %v4916_v1  ;;  %v4913_v60 = vpack.c.bf16 %v2799_v33, %v2795_v42  ;;  %v7581_v42 = vld [vmem:[%s8037_s6 + $0x14] sm:$0xf] }
 0x3a8   :  { %3196 = vmatpush2.bf16.msra.mxu0 %v4910_v25  ;;  %3238 = vmatprep.subr.bf16.mxu1 %v4913_v60  ;;  %v3648_v60 = vrot.slane %v7581_v42, %v8410_v7 }
 0x3aa   :  { %3239 = vmatpush2.bf16.msra.mxu1 %v4912_v23 }
 0x3ab   :  { %3198 = vmatmul.mubr.bf16.vlgmr.msra.gmra.mxu0 %v5185_v49 }
 0x3ac   :  { %4672 = vmatprep.mubr.msk.bf16.mxu0 %vm3161_vm10, %v5186_v21 }
 0x3ad   :  { %3241 = vmatmul.mubr.bf16.vlgmr.msra.gmra.mxu1 %v5185_v49 }
 0x3ae   :  { %4673 = vmatprep.mubr.msk.bf16.mxu1 %vm3161_vm10, %v5186_v21 }
 0x46b   :  { %v3199_v24 = vpop.f32.mrf.mxu0 }
 0x46c   :  { %v7370_v18 = vmax.f32 %v3199_v24, 0.0  ;;  %v3644_v24 = vrot.slane %v7581_v42, %v8386_v8 }
 0x46d   :  { %v3201_v26 = vpop.f32.mrf.mxu0  ;;  %v3242_v51 = vpop.f32.mrf.mxu1 }
 0x46e   :  { %3697 = vrot.lane.b32.xlu0 %v7370_v18, %s5200_s9  ;;  %v7406_v57 = vmax.f32 %v3201_v26, 0.0  ;;  %v7408_v35 = vmax.f32 %v3242_v51, 0.0 }
 0x46f   :  { %v3203_v34 = vpop.f32.mrf.mxu0  ;;  %v3244_v43 = vpop.f32.mrf.mxu1 }
 0x470   :  { %v7374_v31 = vmax.f32 %v3203_v34, 0.0  ;;  %v7470_v11 = vmax.f32 %v3244_v43, 0.0 }
 0x471   :  { %v3205_v37 = vpop.f32.mrf.mxu0  ;;  %v3246_v17 = vpop.f32.mrf.mxu1 }
 0x472   :  { %3615 = vrot.lane.b32.xlu0 %v7370_v18, %s5202_s13  ;;  %3699 = vrot.lane.b32.xlu1 %v7374_v31, %s5200_s9  ;;  %v4934_v63 = vpack.c.bf16 %v7374_v31, %v7370_v18  ;;  %v7414_v4 = vmax.f32 %v3205_v37, 0.0  ;;  %v7420_v5 = vmax.f32 %v3246_v17, 0.0  ;;  %v7605_v17 = vld [vmem:[%s8037_s6 + $0xc] sm:$0xf] }
 0x473   :  { %v3248_v52 = vpop.f32.mrf.mxu1 }
 0x474   :  { %v7476_v48 = vmax.f32 %v3248_v52, 0.0 }
 0x476   :  { %3505 = vrot.lane.b32.xlu0 %v7370_v18, %s5201_s12  ;;  %3617 = vrot.lane.b32.xlu1 %v7374_v31, %s5202_s13 }
 0x47a   :  { %3423 = vrot.lane.b32.xlu0 %v7370_v18, %s5196_s30  ;;  %3507 = vrot.lane.b32.xlu1 %v7374_v31, %s5201_s12 }
 0x47e   :  { %3341 = vrot.lane.b32.xlu0 %v7370_v18, %s5198_s2  ;;  %3425 = vrot.lane.b32.xlu1 %v7374_v31, %s5196_s30 }
 0x482   :  { %3259 = vrot.lane.b32.xlu0 %v7370_v18, %s5199_s8  ;;  %3343 = vrot.lane.b32.xlu1 %v7374_v31, %s5198_s2 }
 0x486   :  { %3861 = vrot.lane.b32.xlu0 %v7370_v18, %s5195_s23  ;;  %3261 = vrot.lane.b32.xlu1 %v7374_v31, %s5199_s8 }
 0x48a   :  { %3779 = vrot.lane.b32.xlu0 %v7370_v18, %s5197_s0  ;;  %3863 = vrot.lane.b32.xlu1 %v7374_v31, %s5195_s23 }
 0x48e   :  { %3701 = vrot.lane.b32.xlu0 %v7406_v57, %s5200_s9  ;;  %3781 = vrot.lane.b32.xlu1 %v7374_v31, %s5197_s0 }
 0x492   :  { %3705 = vrot.lane.b32.xlu0 %v7408_v35, %s5200_s9  ;;  %3703 = vrot.lane.b32.xlu1 %v7414_v4, %s5200_s9 }
 0x496   :  { %3619 = vrot.lane.b32.xlu0 %v7406_v57, %s5202_s13  ;;  %3707 = vrot.lane.b32.xlu1 %v7420_v5, %s5200_s9 }
 0x49a   :  { %3623 = vrot.lane.b32.xlu0 %v7408_v35, %s5202_s13  ;;  %3621 = vrot.lane.b32.xlu1 %v7414_v4, %s5202_s13 }
 0x49e   :  { %3509 = vrot.lane.b32.xlu0 %v7406_v57, %s5201_s12  ;;  %3625 = vrot.lane.b32.xlu1 %v7420_v5, %s5202_s13 }
 0x4a2   :  { %3513 = vrot.lane.b32.xlu0 %v7408_v35, %s5201_s12  ;;  %3511 = vrot.lane.b32.xlu1 %v7414_v4, %s5201_s12 }
 0x4a6   :  { %3427 = vrot.lane.b32.xlu0 %v7406_v57, %s5196_s30  ;;  %3515 = vrot.lane.b32.xlu1 %v7420_v5, %s5201_s12 }
 0x4aa   :  { %3431 = vrot.lane.b32.xlu0 %v7408_v35, %s5196_s30  ;;  %3429 = vrot.lane.b32.xlu1 %v7414_v4, %s5196_s30 }
 0x4ae   :  { %3345 = vrot.lane.b32.xlu0 %v7406_v57, %s5198_s2  ;;  %3433 = vrot.lane.b32.xlu1 %v7420_v5, %s5196_s30 }
 0x4b2   :  { %3349 = vrot.lane.b32.xlu0 %v7408_v35, %s5198_s2  ;;  %3347 = vrot.lane.b32.xlu1 %v7414_v4, %s5198_s2 }
 0x4b6   :  { %3263 = vrot.lane.b32.xlu0 %v7406_v57, %s5199_s8  ;;  %3351 = vrot.lane.b32.xlu1 %v7420_v5, %s5198_s2 }
 0x4ba   :  { %3267 = vrot.lane.b32.xlu0 %v7408_v35, %s5199_s8  ;;  %3265 = vrot.lane.b32.xlu1 %v7414_v4, %s5199_s8 }
 0x4be   :  { %3865 = vrot.lane.b32.xlu0 %v7406_v57, %s5195_s23  ;;  %3269 = vrot.lane.b32.xlu1 %v7420_v5, %s5199_s8 }
 0x4c2   :  { %3869 = vrot.lane.b32.xlu0 %v7408_v35, %s5195_s23  ;;  %3867 = vrot.lane.b32.xlu1 %v7414_v4, %s5195_s23 }
 0x4c6   :  { %3709 = vrot.lane.b32.xlu0 %v7470_v11, %s5200_s9  ;;  %3871 = vrot.lane.b32.xlu1 %v7420_v5, %s5195_s23 }
 0x4ca   :  { %3627 = vrot.lane.b32.xlu0 %v7470_v11, %s5202_s13  ;;  %3711 = vrot.lane.b32.xlu1 %v7476_v48, %s5200_s9 }
 0x4ce   :  { %3783 = vrot.lane.b32.xlu0 %v7406_v57, %s5197_s0  ;;  %3629 = vrot.lane.b32.xlu1 %v7476_v48, %s5202_s13 }
 0x4d2   :  { %3517 = vrot.lane.b32.xlu0 %v7470_v11, %s5201_s12  ;;  %3785 = vrot.lane.b32.xlu1 %v7414_v4, %s5197_s0 }
 0x4d6   :  { %3435 = vrot.lane.b32.xlu0 %v7470_v11, %s5196_s30  ;;  %3519 = vrot.lane.b32.xlu1 %v7476_v48, %s5201_s12 }
 0x4da   :  { %3353 = vrot.lane.b32.xlu0 %v7470_v11, %s5198_s2  ;;  %3437 = vrot.lane.b32.xlu1 %v7476_v48, %s5196_s30 }
 0x4de   :  { %3271 = vrot.lane.b32.xlu0 %v7470_v11, %s5199_s8  ;;  %3355 = vrot.lane.b32.xlu1 %v7476_v48, %s5198_s2 }
 0x4e0   :  { %v7502_v47 = vpop.permute.xlu0 %3697 }
 0x4e2   :  { %3873 = vrot.lane.b32.xlu0 %v7470_v11, %s5195_s23  ;;  %3273 = vrot.lane.b32.xlu1 %v7476_v48, %s5199_s8 }
 0x4e4   :  { %v7508_v44 = vpop.permute.xlu0 %3615  ;;  %v7510_v2 = vpop.permute.xlu1 %3699 }
 0x4e6   :  { %3787 = vrot.lane.b32.xlu0 %v7408_v35, %s5197_s0  ;;  %3789 = vrot.lane.b32.xlu1 %v7420_v5, %s5197_s0 }
 0x4e8   :  { %v7516_v45 = vpop.permute.xlu0 %3505  ;;  %v7518_v50 = vpop.permute.xlu1 %3617 }
 0x4ea   :  { %3791 = vrot.lane.b32.xlu0 %v7470_v11, %s5197_s0  ;;  %3875 = vrot.lane.b32.xlu1 %v7476_v48, %s5195_s23 }
 0x4ec   :  { %v7529_v56 = vpop.permute.xlu0 %3423  ;;  %v7531_v15 = vpop.permute.xlu1 %3507 }
 0x4ee   :  { %3793 = vrot.lane.b32.xlu1 %v7476_v48, %s5197_s0 }
 0x4f0   :  { %v7535_v20 = vpop.permute.xlu0 %3341  ;;  %v7537_v12 = vpop.permute.xlu1 %3425 }
 0x4f4   :  { %v7539_v3 = vpop.permute.xlu0 %3259  ;;  %v7541_v40 = vpop.permute.xlu1 %3343 }
 0x4f8   :  { %v7543_v6 = vpop.permute.xlu0 %3861  ;;  %v7545_v0 = vpop.permute.xlu1 %3261 }
 0x4f9   :  { %8417 = vst [vmem:[#allocation41_spill] sm:$0xff] %v7543_v6 }
 0x4fc   :  { %v7547_v29 = vpop.permute.xlu0 %3779  ;;  %v7549_v14 = vpop.permute.xlu1 %3863 }
 0x4fd   :  { %8418 = vst [vmem:[#allocation40_spill] sm:$0xff] %v7547_v29  ;;  %8419 = vst [vmem:[#allocation32_spill] sm:$0xff] %v7549_v14  ;;  %v3738_v29 = vrot.slane %v7556_v58, %v5800_v19 }
 0x500   :  { %v3702_v32 = vpop.permute.xlu0 %3701  ;;  %v7551_v46 = vpop.permute.xlu1 %3781 }
 0x501   :  { %8420 = vst [vmem:[#allocation21_spill] sm:$0xff] %v7551_v46  ;;  %v3717_v38 = vsel %vm1167_vm6, %v7502_v47, %v3702_v32  ;;  %v3734_v46 = vrot.slane %v7556_v58, %v5711_v59 }
 0x502   :  { %v3743_v36 = vmul.f32 %v3726_v16, %v3717_v38 }
 0x504   :  { %v7558_v27 = vpop.permute.xlu0 %3705  ;;  %v3704_v54 = vpop.permute.xlu1 %3703 }
 0x505   :  { %v3718_v41 = vsel %vm1167_vm6, %v7510_v2, %v3704_v54  ;;  %v3715_v62 = vsel %vm1167_vm6, %v3702_v32, %v7558_v27 }
 0x506   :  { %v3747_v28 = vmul.f32 %v3726_v16, %v3718_v41  ;;  %v3744_v9 = vmul.f32 %v3730_v61, %v3715_v62 }
 0x508   :  { %v3620_v1 = vpop.permute.xlu0 %3619  ;;  %v7573_v13 = vpop.permute.xlu1 %3707  ;;  %v4942_v23 = vpack.c.bf16 %v3747_v28, %v3743_v36 }
 0x509   :  { %v3716_v30 = vsel %vm1167_vm6, %v3704_v54, %v7573_v13  ;;  %v3635_v34 = vsel %vm1023_vm9, %v7508_v44, %v3620_v1 }
 0x50a   :  { %v3748_v39 = vmul.f32 %v3730_v61, %v3716_v30  ;;  %v3661_v54 = vmul.f32 %v3644_v24, %v3635_v34  ;;  %v3538_v61 = vrot.slane %v7605_v17, %v8410_v7 }
 0x50c   :  { %v7583_v22 = vpop.permute.xlu0 %3623  ;;  %v3622_v33 = vpop.permute.xlu1 %3621  ;;  %v4943_v25 = vpack.c.bf16 %v3748_v39, %v3744_v9  ;;  %v4935_v9 = vpack.c.bf16 %v7414_v4, %v7406_v57 }
 0x50d   :  { %v3636_v49 = vsel %vm1023_vm9, %v7518_v50, %v3622_v33  ;;  %v3633_v26 = vsel %vm1023_vm9, %v3620_v1, %v7583_v22 }
 0x50e   :  { %4197 = vmatprep.subr.bf16.mxu0 %v4943_v25  ;;  %v3665_v43 = vmul.f32 %v3644_v24, %v3636_v49  ;;  %v3662_v21 = vmul.f32 %v3648_v60, %v3633_v26 }
 0x50f   :  { %4198 = vmatpush1.bf16.msra.mxu0 %v4942_v23 }
 0x510   :  { %v7598_v51 = vpop.permute.xlu0 %3509  ;;  %v7600_v37 = vpop.permute.xlu1 %3625  ;;  %v4938_v38 = vpack.c.bf16 %v3665_v43, %v3661_v54  ;;  %v7667_v54 = vld [vmem:[%s8037_s6 + $0x4] sm:$0xf] }
 0x511   :  { %v3634_v52 = vsel %vm1023_vm9, %v3622_v33, %v7600_v37  ;;  %v3525_v1 = vsel %vm823_vm5, %v7516_v45, %v7598_v51  ;;  %v7693_v55 = vrot.slane %v7667_v54, %v8410_v7 }
 0x512   :  { %v3666_v32 = vmul.f32 %v3648_v60, %v3634_v52  ;;  %v3552_v39 = vmul.f32 %v3538_v61, %v3525_v1  ;;  %v3542_v1 = vrot.slane %v7605_v17, %v5711_v59 }
 0x514   :  { %v7612_v41 = vpop.permute.xlu0 %3513  ;;  %v7614_v16 = vpop.permute.xlu1 %3511  ;;  %v4939_v62 = vpack.c.bf16 %v3666_v32, %v3662_v21  ;;  %v4596_v32 = vld [vmem:[%s8037_s6 + $0x8] sm:$0xf] }
 0x515   :  { %v3526_v28 = vsel %vm823_vm5, %v7531_v15, %v7614_v16 }
 0x516   :  { %v3556_v30 = vmul.f32 %v3538_v61, %v3526_v28  ;;  %4199 = vmatprep.subr.bf16.mxu0 %v4939_v62  ;;  %v7672_v61 = vld [vmem:[%s8037_s6] sm:$0xf]  ;;  %v3456_v28 = vrot.slane %v4596_v32, %v8410_v7 }
 0x517   :  { %4200 = vmatpush1.bf16.msra.mxu0 %v4938_v38  ;;  %v7710_v10 = vrot.slane %v7672_v61, %v8410_v7 }
 0x518   :  { %v7626_v36 = vpop.permute.xlu0 %3427  ;;  %v7628_v33 = vpop.permute.xlu1 %3515  ;;  %4201 = vmatprep.subr.bf16.mxu0 %v4935_v9  ;;  %v4931_v25 = vpack.c.bf16 %v3556_v30, %v3552_v39  ;;  %v7682_v30 = vld [vmem:[%s8037_s6 + $0x20] sm:$0xf]  ;;  %v7702_v9 = vld [vmem:[%s8037_s6 + $0x1c] sm:$0xf]  ;;  %v7706_v39 = vrot.slane %v7667_v54, %v5711_v59 }
 0x519   :  { %8427 = vst [vmem:[#allocation23_spill] sm:$0xff] %v7710_v10  ;;  %v7724_v6 = vrot.slane %v7682_v30, %v8386_v8  ;;  %v3534_v10 = vrot.slane %v7605_v17, %v8386_v8 }
 0x51b   :  { %4202 = vmatpush1.bf16.msra.mxu0 %v4934_v63  ;;  %8429 = vst [vmem:[#allocation49_spill] sm:$0xff] %v7724_v6 }
 0x51c   :  { %v7633_v23 = vpop.permute.xlu0 %3431  ;;  %v7635_v60 = vpop.permute.xlu1 %3429  ;;  %4203 = vmatprep.subr.bf16.mxu0 %v4931_v25  ;;  %v7689_v25 = vrot.slane %v4596_v32, %v5711_v59 }
 0x520   :  { %v7637_v49 = vpop.permute.xlu0 %3345  ;;  %v7639_v57 = vpop.permute.xlu1 %3433 }
 0x524   :  { %v7641_v4 = vpop.permute.xlu0 %3349  ;;  %v7643_v24 = vpop.permute.xlu1 %3347 }
 0x528   :  { %v7645_v26 = vpop.permute.xlu0 %3263  ;;  %v7647_v34 = vpop.permute.xlu1 %3351 }
 0x52c   :  { %v7649_v43 = vpop.permute.xlu0 %3267  ;;  %v7651_v18 = vpop.permute.xlu1 %3265 }
 0x52d   :  { %8421 = vst [vmem:[#allocation24_spill] sm:$0xff] %v7649_v43 }
 0x530   :  { %v7653_v31 = vpop.permute.xlu0 %3865  ;;  %v7655_v63 = vpop.permute.xlu1 %3269 }
 0x531   :  { %8422 = vst [vmem:[#allocation30_spill] sm:$0xff] %v7653_v31  ;;  %8423 = vst [vmem:[#allocation42_spill] sm:$0xff] %v7655_v63  ;;  %v7728_v31 = vrot.slane %v7682_v30, %v8410_v7  ;;  %v7742_v7 = vrot.slane %v7702_v9, %v8386_v8 }
 0x533   :  { %8430 = vst [vmem:[#allocation65_spill] sm:$0xff] %v7728_v31 }
 0x534   :  { %v7657_v52 = vpop.permute.xlu0 %3869  ;;  %v7659_v21 = vpop.permute.xlu1 %3867 }
 0x535   :  { %8424 = vst [vmem:[#allocation63_spill] sm:$0xff] %v7657_v52  ;;  %8425 = vst [vmem:[#allocation28_spill] sm:$0xff] %v7659_v21  ;;  %v7720_v52 = vrot.slane %v7672_v61, %v5711_v59  ;;  %v3652_v21 = vrot.slane %v7581_v42, %v5711_v59 }
 0x537   :  { %8428 = vst [vmem:[#allocation31_spill] sm:$0xff] %v7720_v52 }
 0x538   :  { %v3710_v62 = vpop.permute.xlu0 %3709  ;;  %v7674_v38 = vpop.permute.xlu1 %3871 }
 0x539   :  { %8426 = vst [vmem:[#allocation52_spill] sm:$0xff] %v7674_v38  ;;  %v3713_v14 = vsel %vm1167_vm6, %v7558_v27, %v3710_v62  ;;  %v3719_v58 = vsel %vm1167_vm6, %v3710_v62, %v7502_v47  ;;  %v3656_v47 = vrot.slane %v7581_v42, %v5800_v19 }
 0x53a   :  { %v3745_v31 = vmul.f32 %v3734_v46, %v3713_v14  ;;  %v3746_v52 = vmul.f32 %v3738_v29, %v3719_v58  ;;  %v3524_v14 = vsel %vm823_vm5, %v7614_v16, %v7628_v33 }
 0x53c   :  { %v3628_v27 = vpop.permute.xlu0 %3627  ;;  %v3712_v38 = vpop.permute.xlu1 %3711 }
 0x53d   :  { %v3714_v62 = vsel %vm1167_vm6, %v7573_v13, %v3712_v38  ;;  %v3720_v6 = vsel %vm1167_vm6, %v3712_v38, %v7510_v2  ;;  %v3631_v42 = vsel %vm1023_vm9, %v7583_v22, %v3628_v27  ;;  %v3637_v13 = vsel %vm1023_vm9, %v3628_v27, %v7508_v44 }
 0x53e   :  { %v3749_v43 = vmul.f32 %v3734_v46, %v3714_v62  ;;  %v3750_v63 = vmul.f32 %v3738_v29, %v3720_v6  ;;  %v3546_v2 = vrot.slane %v7605_v17, %v5800_v19  ;;  %v7761_v38 = vrot.slane %v4596_v32, %v8386_v8 }
 0x53f   :  { %v3444_v44 = vsel %vm679_vm2, %v7537_v12, %v7635_v60  ;;  %v3523_v27 = vsel %vm823_vm5, %v7598_v51, %v7612_v41  ;;  %v7784_v62 = vmul.f32 %v3542_v1, %v3524_v14  ;;  %v3441_v14 = vsel %vm679_vm2, %v7626_v36, %v7633_v23 }
 0x540   :  { %v4944_v6 = vpack.c.bf16 %v3749_v43, %v3745_v31  ;;  %v7758_v29 = vpop.permute.xlu0 %3783  ;;  %v3630_v46 = vpop.permute.xlu1 %3629  ;;  %v4945_v22 = vpack.c.bf16 %v3750_v63, %v3746_v52  ;;  %v7774_v43 = vrot.slane %v4596_v32, %v5800_v19  ;;  %v3663_v31 = vmul.f32 %v3652_v21, %v3631_v42 }
 0x541   :  { %v3632_v17 = vsel %vm1023_vm9, %v7600_v37, %v3630_v46  ;;  %v3638_v16 = vsel %vm1023_vm9, %v3630_v46, %v7518_v50  ;;  %v3664_v63 = vmul.f32 %v3656_v47, %v3637_v13  ;;  %v3443_v37 = vsel %vm679_vm2, %v7529_v56, %v7626_v36 }
 0x542   :  { %v3667_v52 = vmul.f32 %v3652_v21, %v3632_v17  ;;  %v3668_v58 = vmul.f32 %v3656_v47, %v3638_v16  ;;  %4240 = vmatprep.subr.bf16.mxu1 %v4945_v22  ;;  %v7788_v50 = vrot.slane %v7667_v54, %v8386_v8  ;;  %v3474_v21 = vmul.f32 %v3456_v28, %v3444_v44 }
 0x543   :  { %4241 = vmatpush1.bf16.msra.mxu1 %v4944_v6  ;;  %v3442_v32 = vsel %vm679_vm2, %v7635_v60, %v7639_v57  ;;  %v7802_v6 = vrot.slane %v7667_v54, %v5800_v19  ;;  %v7806_v46 = vrot.slane %v7672_v61, %v8386_v8  ;;  %v7810_v60 = vrot.slane %v7672_v61, %v5800_v19 }
 0x544   :  { %v4940_v47 = vpack.c.bf16 %v3667_v52, %v3663_v31  ;;  %v3518_v51 = vpop.permute.xlu0 %3517  ;;  %v7794_v42 = vpop.permute.xlu1 %3785  ;;  %v4941_v13 = vpack.c.bf16 %v3668_v58, %v3664_v63  ;;  %v3553_v22 = vmul.f32 %v3542_v1, %v3523_v27  ;;  %v3470_v44 = vmul.f32 %v3456_v28, %v3443_v37 }
 0x545   :  { %v3361_v17 = vsel %vm535_vm3, %v7535_v20, %v7637_v49  ;;  %v7818_v36 = vrot.slane %v7682_v30, %v5711_v59  ;;  %v7821_v54 = vmul.f32 %v7689_v25, %v3442_v32  ;;  %v3521_v8 = vsel %vm823_vm5, %v7612_v41, %v3518_v51 }
 0x546   :  { %4242 = vmatprep.subr.bf16.mxu1 %v4941_v13  ;;  %v3527_v61 = vsel %vm823_vm5, %v3518_v51, %v7516_v45  ;;  %v7831_v1 = vrot.slane %v7682_v30, %v5800_v19  ;;  %v4932_v28 = vpack.c.bf16 %v7784_v62, %v3553_v22  ;;  %v3471_v16 = vmul.f32 %v7689_v25, %v3441_v14 }
 0x547   :  { %4243 = vmatpush1.bf16.msra.mxu1 %v4940_v47  ;;  %v3359_v31 = vsel %vm535_vm3, %v7637_v49, %v7641_v4  ;;  %v8431_v41 = vpack.c.bf16 %v7476_v48, %v7470_v11  ;;  %v4927_v52 = vpack.c.bf16 %v3474_v21, %v3470_v44  ;;  %v3388_v58 = vmul.f32 %v7693_v55, %v3361_v17 }
 0x548   :  { %v3436_v63 = vpop.permute.xlu0 %3435  ;;  %v3520_v45 = vpop.permute.xlu1 %3519  ;;  %v3362_v30 = vsel %vm535_vm3, %v7541_v40, %v7643_v24  ;;  %v3551_v27 = vmul.f32 %v3534_v10, %v3527_v61  ;;  %v3554_v11 = vmul.f32 %v3546_v2, %v3521_v8  ;;  %v4928_v62 = vpack.c.bf16 %v7821_v54, %v3471_v16 }
 0x549   :  { %4244 = vmatprep.subr.bf16.mxu1 %v8431_v41  ;;  %v3522_v25 = vsel %vm823_vm5, %v7628_v33, %v3520_v45  ;;  %v3528_v49 = vsel %vm823_vm5, %v3520_v45, %v7531_v15  ;;  %v7855_v21 = vmul.f32 %v7706_v39, %v3359_v31  ;;  %v3439_v32 = vsel %vm679_vm2, %v7633_v23, %v3436_v63 }
 0x54a   :  { %v3555_v48 = vmul.f32 %v3534_v10, %v3528_v49  ;;  %v3558_v37 = vmul.f32 %v3546_v2, %v3522_v25  ;;  %v3445_v33 = vsel %vm679_vm2, %v3436_v63, %v7529_v56  ;;  %v8432_v15 = vpack.c.bf16 %v7420_v5, %v7408_v35  ;;  %v8434_v63 = vld [vmem:[#allocation42_spill] sm:$0xff] }
 0x54b   :  { %v3392_v10 = vmul.f32 %v7693_v55, %v3362_v30  ;;  %v3360_v2 = vsel %vm535_vm3, %v7643_v24, %v7647_v34  ;;  %v3279_v56 = vsel %vm392_vm4, %v7539_v3, %v7645_v26  ;;  %v3280_v35 = vsel %vm392_vm4, %v7545_v0, %v7651_v18 }
 0x54c   :  { %4245 = vmatpush1.bf16.msra.mxu1 %v8432_v15  ;;  %v4930_v47 = vpack.c.bf16 %v3555_v48, %v3551_v27  ;;  %v3354_v51 = vpop.permute.xlu0 %3353  ;;  %v3438_v13 = vpop.permute.xlu1 %3437  ;;  %v4933_v14 = vpack.c.bf16 %v3558_v37, %v3554_v11  ;;  %v3469_v23 = vmul.f32 %v7761_v38, %v3445_v33  ;;  %v3472_v24 = vmul.f32 %v7774_v43, %v3439_v32  ;;  %v8436_v48 = vld [vmem:[#allocation31_spill] sm:$0xff]  ;;  %v8438_v32 = vld [vmem:[#allocation28_spill] sm:$0xff] }
 0x54d   :  { %v3440_v55 = vsel %vm679_vm2, %v7639_v57, %v3438_v13  ;;  %v3446_v5 = vsel %vm679_vm2, %v3438_v13, %v7537_v12  ;;  %v3393_v17 = vmul.f32 %v7706_v39, %v3360_v2  ;;  %v3357_v54 = vsel %vm535_vm3, %v7641_v4, %v3354_v51  ;;  %v8433_v12 = vld [vmem:[#allocation23_spill] sm:$0xff]  ;;  %v8440_v13 = vld [vmem:[#allocation41_spill] sm:$0xff] }
 0x54e   :  { %v3473_v22 = vmul.f32 %v7761_v38, %v3446_v5  ;;  %v3476_v44 = vmul.f32 %v7774_v43, %v3440_v55  ;;  %4204 = vmatpush1.bf16.msra.mxu0 %v4930_v47  ;;  %v3363_v57 = vsel %vm535_vm3, %v3354_v51, %v7535_v20  ;;  %4246 = vmatprep.subr.bf16.mxu1 %v4933_v14  ;;  %v8439_v51 = vld [vmem:[#allocation30_spill] sm:$0xff] }
 0x54f   :  { %4205 = vmatprep.subr.bf16.mxu0 %v4927_v52  ;;  %v3310_v8 = vmul.f32 %v8433_v12, %v3280_v35  ;;  %v4923_v31 = vpack.c.bf16 %v3392_v10, %v3388_v58  ;;  %v3306_v39 = vmul.f32 %v8433_v12, %v3279_v56  ;;  %v3278_v4 = vsel %vm392_vm4, %v7651_v18, %v8434_v63  ;;  %v8435_v18 = vld [vmem:[#allocation24_spill] sm:$0xff]  ;;  %v8441_v56 = vld [vmem:[#allocation63_spill] sm:$0xff] }
 0x550   :  { %v4926_v61 = vpack.c.bf16 %v3473_v22, %v3469_v23  ;;  %4247 = vmatpush1.bf16.msra.mxu1 %v4932_v28  ;;  %v3272_v38 = vpop.permute.xlu0 %3271  ;;  %v3356_v16 = vpop.permute.xlu1 %3355  ;;  %v4929_v43 = vpack.c.bf16 %v3476_v44, %v3472_v24  ;;  %v3387_v28 = vmul.f32 %v7788_v50, %v3363_v57  ;;  %v3390_v45 = vmul.f32 %v7802_v6, %v3357_v54  ;;  %v8442_v35 = vld [vmem:[#allocation32_spill] sm:$0xff]  ;;  %v8444_v54 = vld [vmem:[#allocation6_spill] sm:$0xff] }
 0x551   :  { %v3358_v20 = vsel %vm535_vm3, %v7647_v34, %v3356_v16  ;;  %v3364_v41 = vsel %vm535_vm3, %v3356_v16, %v7541_v40  ;;  %v4924_v30 = vpack.c.bf16 %v3393_v17, %v7855_v21  ;;  %v3275_v25 = vsel %vm392_vm4, %v8435_v18, %v3272_v38  ;;  %v8437_v21 = vld [vmem:[#allocation52_spill] sm:$0xff]  ;;  %v8445_v16 = vld [vmem:[#allocation49_spill] sm:$0xff] }
 0x552   :  { %v3391_v52 = vmul.f32 %v7788_v50, %v3364_v41  ;;  %v3394_v58 = vmul.f32 %v7802_v6, %v3358_v20  ;;  %4206 = vmatpush1.bf16.msra.mxu0 %v4926_v61  ;;  %v3281_v34 = vsel %vm392_vm4, %v3272_v38, %v7539_v3  ;;  %4248 = vmatprep.subr.bf16.mxu1 %v4929_v43  ;;  %v8448_v41 = vld [vmem:[#allocation21_spill] sm:$0xff] }
 0x553   :  { %4207 = vmatprep.subr.bf16.mxu0 %v4923_v31  ;;  %v3277_v40 = vsel %vm392_vm4, %v7645_v26, %v8435_v18  ;;  %v4919_v11 = vpack.c.bf16 %v3310_v8, %v3306_v39  ;;  %v3311_v37 = vmul.f32 %v8436_v48, %v3278_v4  ;;  %v3880_v3 = vsel %vm1455_vm0, %v8438_v32, %v8437_v21  ;;  %v8447_v4 = vld [vmem:[#allocation40_spill] sm:$0xff] }
 0x554   :  { %v4922_v50 = vpack.c.bf16 %v3391_v52, %v3387_v28  ;;  %4249 = vmatpush1.bf16.msra.mxu1 %v4928_v62  ;;  %v3874_v6 = vpop.permute.xlu0 %3873  ;;  %v3274_v49 = vpop.permute.xlu1 %3273  ;;  %v4925_v27 = vpack.c.bf16 %v3394_v58, %v3390_v45  ;;  %v3305_v62 = vmul.f32 %v7806_v46, %v3281_v34  ;;  %v3308_v15 = vmul.f32 %v7810_v60, %v3275_v25 }
 0x555   :  { %v3276_v33 = vsel %vm392_vm4, %v8434_v63, %v3274_v49  ;;  %v3282_v26 = vsel %vm392_vm4, %v3274_v49, %v7545_v0  ;;  %v3307_v47 = vmul.f32 %v8436_v48, %v3277_v40  ;;  %v3881_v14 = vsel %vm1455_vm0, %v8440_v13, %v8439_v51  ;;  %v8446_v63 = vld [vmem:[#allocation36_spill] sm:$0xff] }
 0x556   :  { %v3309_v10 = vmul.f32 %v7806_v46, %v3282_v26  ;;  %v3312_v2 = vmul.f32 %v7810_v60, %v3276_v33  ;;  %4208 = vmatpush1.bf16.msra.mxu0 %v4922_v50  ;;  %v3879_v0 = vsel %vm1455_vm0, %v8439_v51, %v8441_v56  ;;  %4250 = vmatprep.subr.bf16.mxu1 %v4925_v27  ;;  %v8443_v60 = vld [vmem:[#allocation65_spill] sm:$0xff]  ;;  %v8449_v50 = vld [vmem:[#allocation20_spill] sm:$0xff] }
 0x557   :  { %4209 = vmatprep.subr.bf16.mxu0 %v4919_v11  ;;  %v3882_v46 = vsel %vm1455_vm0, %v8442_v35, %v8438_v32  ;;  %v3912_v55 = vmul.f32 %v8443_v60, %v3880_v3  ;;  %v4920_v44 = vpack.c.bf16 %v3311_v37, %v3307_v47  ;;  %v3877_v17 = vsel %vm1455_vm0, %v8441_v56, %v3874_v6 }
 0x558   :  { %v4918_v5 = vpack.c.bf16 %v3309_v10, %v3305_v62  ;;  %4251 = vmatpush1.bf16.msra.mxu1 %v4924_v30  ;;  %v3788_v23 = vpop.permute.xlu0 %3787  ;;  %v3790_v24 = vpop.permute.xlu1 %3789  ;;  %v4921_v22 = vpack.c.bf16 %v3312_v2, %v3308_v15  ;;  %v3812_v57 = vrot.slane %v7702_v9, %v8444_v54  ;;  %v3816_v12 = vrot.slane %v7702_v9, %v5711_v59  ;;  %v5188_v2 = vld [vmem:[%s8040_s5] ss:$8 sps:$4 sm:$0xff]  }
 0x559   :  { %v3908_v8 = vmul.f32 %v8443_v60, %v3879_v0  ;;  %v3797_v61 = vsel %vm1311_vm1, %v7758_v29, %v3788_v23  ;;  %v3798_v38 = vsel %vm1311_vm1, %v7794_v42, %v3790_v24  ;;  %v3907_v43 = vmul.f32 %v8445_v16, %v3881_v14 }
 0x55a   :  { %4210 = vmatpush1.bf16.msra.mxu0 %v4918_v5  ;;  %4252 = vmatprep.subr.bf16.mxu1 %v4921_v22  ;;  %v3911_v31 = vmul.f32 %v8445_v16, %v3882_v46  ;;  %v3883_v59 = vsel %vm1455_vm0, %v3874_v6, %v8440_v13  ;;  %v3820_v39 = vrot.slane %v7702_v9, %v5800_v19 }
 0x55b   :  { %4211 = vmatprep.subr.bf16.mxu0 %v8446_v63  ;;  %v3799_v20 = vsel %vm1311_vm1, %v8447_v4, %v7758_v29  ;;  %v3800_v28 = vsel %vm1311_vm1, %v8448_v41, %v7794_v42  ;;  %v3909_v45 = vmul.f32 %v7818_v36, %v3877_v17  ;;  %v4951_v30 = vpack.c.bf16 %v3912_v55, %v3908_v8 }
 0x55c   :  { %4253 = vmatpush1.bf16.msra.mxu1 %v4920_v44  ;;  %v3792_v52 = vpop.permute.xlu0 %3791  ;;  %v3876_v58 = vpop.permute.xlu1 %3875  ;;  %v3826_v18 = vmul.f32 %v3812_v57, %v3797_v61  ;;  %v3830_v19 = vmul.f32 %v3812_v57, %v3798_v38  ;;  %v3910_v42 = vmul.f32 %v7831_v1, %v3883_v59  ;;  %v4950_v6 = vpack.c.bf16 %v3911_v31, %v3907_v43 }
 0x55d   :  { %v3878_v9 = vsel %vm1455_vm0, %v8437_v21, %v3876_v58  ;;  %v3884_v29 = vsel %vm1455_vm0, %v3876_v58, %v8442_v35  ;;  %4254 = vmatprep.subr.bf16.mxu1 %v8446_v63  ;;  %v3795_v25 = vsel %vm1311_vm1, %v3788_v23, %v3792_v52  ;;  %v3801_v49 = vsel %vm1311_vm1, %v3792_v52, %v8447_v4 }
 0x55e   :  { %v3913_v34 = vmul.f32 %v7818_v36, %v3878_v9  ;;  %v3914_v40 = vmul.f32 %v7831_v1, %v3884_v29  ;;  %4212 = vmatpush1.bf16.msra.mxu0 %v8449_v50  ;;  %v3825_v27 = vmul.f32 %v7742_v7, %v3799_v20  ;;  %v3829_v11 = vmul.f32 %v7742_v7, %v3800_v28 }
 0x55f   :  { %4225 = vmatprep.subr.bf16.mxu0 %v4951_v30  ;;  %v3827_v36 = vmul.f32 %v3816_v12, %v3795_v25  ;;  %v4947_v3 = vpack.c.bf16 %v3830_v19, %v3826_v18  ;;  %v3828_v33 = vmul.f32 %v3820_v39, %v3801_v49 }
 0x560   :  { %v4952_v48 = vpack.c.bf16 %v3913_v34, %v3909_v45  ;;  %4255 = vmatpush1.bf16.msra.mxu1 %v8449_v50  ;;  %v3794_v37 = vpop.permute.xlu1 %3793  ;;  %v4953_v21 = vpack.c.bf16 %v3914_v40, %v3910_v42  ;;  %v4946_v7 = vpack.c.bf16 %v3829_v11, %v3825_v27 }
 0x561   :  { %v3796_v1 = vsel %vm1311_vm1, %v3790_v24, %v3794_v37  ;;  %v3802_v32 = vsel %vm1311_vm1, %v3794_v37, %v8448_v41 }
 0x562   :  { %v3831_v26 = vmul.f32 %v3816_v12, %v3796_v1  ;;  %v3832_v62 = vmul.f32 %v3820_v39, %v3802_v32  ;;  %4226 = vmatpush2.bf16.msra.mxu0 %v4950_v6  ;;  %4268 = vmatprep.subr.bf16.mxu1 %v4953_v21 }
 0x563   :  { %4227 = vmatprep.subr.bf16.mxu0 %v4947_v3 }
 0x564   :  { %v4948_v15 = vpack.c.bf16 %v3831_v26, %v3827_v36  ;;  %4269 = vmatpush2.bf16.msra.mxu1 %v4952_v48  ;;  %v4949_v10 = vpack.c.bf16 %v3832_v62, %v3828_v33 }
 0x566   :  { %4228 = vmatpush2.bf16.msra.mxu0 %v4946_v7  ;;  %4270 = vmatprep.subr.bf16.mxu1 %v4949_v10 }
 0x568   :  { %4271 = vmatpush2.bf16.msra.mxu1 %v4948_v15 }
 0x569   :  { %4230 = vmatmul.mubr.bf16.vlgmr.msra.gmra.mxu0 %v5188_v2 }
 0x56b   :  { %4273 = vmatmul.mubr.bf16.vlgmr.msra.gmra.mxu1 %v5188_v2 }
 0x629   :  { %v4231_v53 = vpop.f32.mrf.mxu0 }
 0x62a   :  { %v4283_v47 = vmax.f32 %v4231_v53, 0.0 }
 0x62b   :  { %v4274_v51 = vpop.f32.mrf.mxu1  ;;  %v4233_v13 = vpop.f32.mrf.mxu0 }
 0x62c   :  { %4291 = vst [vmem:[%s8041_s7] sm:$0xff] %v4283_v47  ;;  %v4285_v14 = vmax.f32 %v4274_v51, 0.0  ;;  %v4284_v56 = vmax.f32 %v4233_v13, 0.0 }
 0x62d   :  { %v4276_v0 = vpop.f32.mrf.mxu1  ;;  %v4235_v35 = vpop.f32.mrf.mxu0 }
 0x62e   :  { %4293 = vst [vmem:[%s8041_s7 + $0x10] sm:$0xff] %v4285_v14  ;;  %4292 = vst [vmem:[%s8041_s7 + $0x8] sm:$0xff] %v4284_v56  ;;  %v4286_v46 = vmax.f32 %v4276_v0, 0.0  ;;  %v4287_v60 = vmax.f32 %v4235_v35, 0.0 }
 0x62f   :  { %v4278_v55 = vpop.f32.mrf.mxu1  ;;  %v4237_v5 = vpop.f32.mrf.mxu0 }
 0x630   :  { %4294 = vst [vmem:[%s8041_s7 + $0x18] sm:$0xff] %v4286_v46  ;;  %4295 = vst [vmem:[%s8041_s7 + $0x20] sm:$0xff] %v4287_v60  ;;  %v4289_v23 = vmax.f32 %v4278_v55, 0.0  ;;  %v4288_v24 = vmax.f32 %v4237_v5, 0.0 }
 0x631   :  { %v4280_v22 = vpop.f32.mrf.mxu1 }
 0x632   :  { %4297 = vst [vmem:[%s8041_s7 + $0x30] sm:$0xff] %v4289_v23  ;;  %4296 = vst [vmem:[%s8041_s7 + $0x28] sm:$0xff] %v4288_v24  ;;  %v4290_v44 = vmax.f32 %v4280_v22, 0.0 }
 0x634   :  { %4298 = vst [vmem:[%s8041_s7 + $0x38] sm:$0xff] %v4290_v44 }

</bundles_post_ra>
